<compile_context>
chip_gen: v7x
topology: tpu7x:2x2x1
jax: 0.10.0
libtpu: 0.0.40
codegen_flags: <defaults>
</compile_context>

<pallas_src>
import functools

import jax
import jax.numpy as jnp
from jax.experimental import pallas as pl
from jax.experimental.pallas import tpu as pltpu

LANE = 128  # TPU lane width; Cout zero-padded to a multiple of this.


def _round_up(x, m):
    return (x + m - 1) // m * m


# ---------------------------------------------------------------------------
# Kernel A: conv (in-kernel taps, accumulating MXU matmuls) + BN moments
# ---------------------------------------------------------------------------
def _conv_moments_kernel(x_ref, w_ref, conv_ref, mom_ref, *,
                         offsets, stride, r_out, wq, w_valid, h_valid):
    """x_ref: (r_in, Cin) bf16 flattened padded image; w_ref: (T, Cin, Cpad) bf16;
    conv_ref: (r_out, Cpad) bf16 raw conv; mom_ref: (2, Cpad) f32 [mean; M2]."""
    acc = None
    for t, off in enumerate(offsets):
        if stride == 1:
            lhs = x_ref[pl.ds(off, r_out), :]
        else:
            lhs = x_ref[pl.ds(off, r_out, stride), :]
        part = jnp.dot(lhs, w_ref[t], preferred_element_type=jnp.float32)
        acc = part if acc is None else acc + part
    conv_ref[...] = acc.astype(conv_ref.dtype)

    # Per-image masked moments (rows with column index >= w_valid are the
    # overcompute garbage inherent to the flat-row formulation).
    rows = jax.lax.broadcasted_iota(jnp.int32, (r_out, 1), 0)
    valid = (rows % wq < w_valid) & (rows < h_valid * wq)
    n = float(h_valid * w_valid)
    mean_t = jnp.sum(jnp.where(valid, acc, 0.0), axis=0, keepdims=True) / n
    cent = jnp.where(valid, acc - mean_t, 0.0)
    m2_t = jnp.sum(cent * cent, axis=0, keepdims=True)
    mom_ref[...] = jnp.concatenate([mean_t, m2_t], axis=0)


# ---------------------------------------------------------------------------
# Kernel B: BN affine + optional ReLU + optional residual add (mem-bound)
# ---------------------------------------------------------------------------
def _bn_act_kernel(conv_ref, coef_ref, *rest, relu, add_res, wq, w_valid, h_valid):
    if add_res:
        res_ref, out_ref = rest
    else:
        (out_ref,) = rest
    y = conv_ref[...].astype(jnp.float32)
    y = y * coef_ref[0:1, :] + coef_ref[1:2, :]
    if relu:
        y = jnp.maximum(y, 0.0)
    if add_res:
        # Module semantics: relu(bn(conv(.))) + residual (post-activation add).
        y = y + res_ref[...].astype(jnp.float32)
    rows = jax.lax.broadcasted_iota(jnp.int32, (y.shape[0], 1), 0)
    valid = (rows % wq < w_valid) & (rows < h_valid * wq)
    out_ref[...] = jnp.where(valid, y, 0.0).astype(out_ref.dtype)


# ---------------------------------------------------------------------------
# One conv + training-mode BN (+ReLU) (+residual) stage
# ---------------------------------------------------------------------------
def conv_bn_stage(x_flat, w_taps, gamma, beta, *, offsets, stride, wq,
                  h_out, w_out, eps, relu, res_flat=None,
                  out_dtype=jnp.bfloat16):
    """x_flat: (N, r_in, Cin) bf16 flattened padded image.  Output rows are laid
    out as o = h*wq + w (w < w_out valid), returned as (N, r_out, Cpad)."""
    n_img, r_in, cin = x_flat.shape
    n_taps, cin_w, c_pad = w_taps.shape
    assert cin == cin_w and len(offsets) == n_taps
    r_out = _round_up(h_out * wq, 8)
    assert max(offsets) + stride * (r_out - 1) < r_in

    kern_a = functools.partial(
        _conv_moments_kernel, offsets=tuple(offsets), stride=stride,
        r_out=r_out, wq=wq, w_valid=w_out, h_valid=h_out)
    conv_raw, mom = pl.pallas_call(
        kern_a,
        out_shape=(jax.ShapeDtypeStruct((n_img, r_out, c_pad), jnp.bfloat16),
                   jax.ShapeDtypeStruct((n_img, 2, c_pad), jnp.float32)),
        grid=(n_img,),
        in_specs=[
            pl.BlockSpec((None, r_in, cin), lambda n: (n, 0, 0)),
            pl.BlockSpec((n_taps, cin, c_pad), lambda n: (0, 0, 0)),
        ],
        out_specs=(pl.BlockSpec((None, r_out, c_pad), lambda n: (n, 0, 0)),
                   pl.BlockSpec((None, 2, c_pad), lambda n: (n, 0, 0))),
        compiler_params=pltpu.CompilerParams(
            dimension_semantics=("parallel",)),
    )(x_flat, w_taps)

    # Exact batch statistics from per-image (mean, M2): Chan combination (tiny).
    n_valid = h_out * w_out
    mean_i = mom[:, 0, :]
    m2_i = mom[:, 1, :]
    mean = jnp.mean(mean_i, axis=0)
    var = (jnp.sum(m2_i, axis=0)
           + n_valid * jnp.sum((mean_i - mean) ** 2, axis=0)) / (n_img * n_valid)
    inv = jax.lax.rsqrt(var + eps)
    g = jnp.pad(gamma, (0, c_pad - gamma.shape[0]))
    b = jnp.pad(beta, (0, c_pad - beta.shape[0]))
    scale = g * inv
    shift = b - mean * scale
    coef = jnp.stack([scale, shift], axis=0).astype(jnp.float32)   # (2, Cpad)

    kern_b = functools.partial(
        _bn_act_kernel, relu=relu, add_res=res_flat is not None,
        wq=wq, w_valid=w_out, h_valid=h_out)
    args = [conv_raw, coef]
    in_specs = [pl.BlockSpec((None, r_out, c_pad), lambda n: (n, 0, 0)),
                pl.BlockSpec((2, c_pad), lambda n: (0, 0))]
    if res_flat is not None:
        assert res_flat.shape == (n_img, r_out, c_pad)
        args.append(res_flat)
        in_specs.append(pl.BlockSpec((None, r_out, c_pad), lambda n: (n, 0, 0)))
    out = pl.pallas_call(
        kern_b,
        out_shape=jax.ShapeDtypeStruct((n_img, r_out, c_pad), out_dtype),
        grid=(n_img,),
        in_specs=in_specs,
        out_specs=pl.BlockSpec((None, r_out, c_pad), lambda n: (n, 0, 0)),
        compiler_params=pltpu.CompilerParams(
            dimension_semantics=("parallel",)),
    )(*args)
    return out


# ---------------------------------------------------------------------------
# JAX-side glue (thin: one bf16 pad/flatten per conv input, no 9x duplication)
# ---------------------------------------------------------------------------
def _img_to_flat(x_img, r_in):
    """NHWC image -> spatially (1,1)-padded, row-major flattened (N, r_in, C) bf16."""
    x = x_img.astype(jnp.bfloat16)
    xp = jnp.pad(x, ((0, 0), (1, 1), (1, 1), (0, 0)))
    n, hp, wp, c = xp.shape
    xf = xp.reshape(n, hp * wp, c)
    return jnp.pad(xf, ((0, 0), (0, r_in - hp * wp), (0, 0)))


def _flat_to_img(x_flat, h, w, wq, c):
    n = x_flat.shape[0]
    return x_flat[:, :h * wq, :].reshape(n, h, wq, -1)[:, :, :w, :c]


def _conv_w_taps(w_oihw, cin_pad, cout_pad):
    """(Cout, Cin, kh, kw) -> (kh*kw, cin_pad, cout_pad) bf16, tap-major."""
    co, ci, kh, kw = w_oihw.shape
    w = jnp.transpose(w_oihw, (2, 3, 1, 0)).reshape(kh * kw, ci, co)
    w = jnp.pad(w, ((0, 0), (0, cin_pad - ci), (0, cout_pad - co)))
    return w.astype(jnp.bfloat16)


def prepare_params(p, c_in, c_out, is_down):
    """Hoisted once-per-parameter-set weight re-layout (off the forward path)."""
    c_pad = _round_up(c_out, LANE)
    c1_in = c_in if is_down else c_out
    prep = {
        'c_out': c_out,
        'c_pad': c_pad,
        'w1': _conv_w_taps(p['w1'], c1_in, c_pad),
        'g1': p['g1'], 'b1': p['b1'],
        'w2': _conv_w_taps(p['w2'], c_pad, c_pad),
        'g2': p['g2'], 'b2': p['b2'],
    }
    if is_down:
        prep['wds'] = _conv_w_taps(p['wds'], c_in, c_pad)
        prep['gds'] = p['gds']
        prep['bds'] = p['bds']
    return prep


# ---------------------------------------------------------------------------
# BasicBlock forward
# ---------------------------------------------------------------------------
def basic_block_forward(x_nchw, prep, is_down=False, eps=1e-5):
    x = jnp.transpose(x_nchw, (0, 2, 3, 1)).astype(jnp.float32)   # NHWC
    n, h, w, c_in = x.shape
    c_out, c_pad = prep['c_out'], prep['c_pad']

    stride1 = 2 if is_down else 1
    h1 = (h - 1) // stride1 + 1
    w1 = (w - 1) // stride1 + 1

    # conv1: 3x3, stride s, pad 1 (no bias) + BN + ReLU
    wq1 = w + 2
    offs1 = [kh * wq1 + kw for kh in range(3) for kw in range(3)]
    r_out1 = _round_up(h1 * wq1, 8)
    r_in1 = _round_up(max((h + 2) * (w + 2), max(offs1) + stride1 * r_out1), 8)
    h1_flat = conv_bn_stage(
        _img_to_flat(x, r_in1), prep['w1'], prep['g1'], prep['b1'],
        offsets=offs1, stride=stride1, wq=wq1, h_out=h1, w_out=w1,
        eps=eps, relu=True, out_dtype=jnp.bfloat16)

    # conv2 geometry: 3x3, stride 1, pad 1 on the (h1, w1) map.
    wq2 = w1 + 2
    offs2 = [kh * wq2 + kw for kh in range(3) for kw in range(3)]
    r_out2 = _round_up(h1 * wq2, 8)
    r_in2 = _round_up(max((h1 + 2) * wq2, max(offs2) + r_out2), 8)

    # Residual branch, emitted directly in conv2's flat output layout (bf16,
    # no f32 padded copy).
    if is_down:
        # DownSample: 1x1 stride-2 conv (no bias) + BN.  Subsample in JAX, then
        # it is a single-tap matmul through the same conv+BN kernels.
        xds = x[:, ::2, ::2, :].astype(jnp.bfloat16)              # (n, h1, w1, c_in)
        xds = jnp.pad(xds, ((0, 0), (0, 0), (0, wq2 - w1), (0, 0)))
        xds = xds.reshape(n, h1 * wq2, c_in)
        xds = jnp.pad(xds, ((0, 0), (0, r_out2 - h1 * wq2), (0, 0)))
        res_flat = conv_bn_stage(
            xds, prep['wds'], prep['gds'], prep['bds'],
            offsets=[0], stride=1, wq=wq2, h_out=h1, w_out=w1,
            eps=eps, relu=False, out_dtype=jnp.bfloat16)
    else:
        assert c_in == c_out, "identity residual requires c_in == c_out"
        xr = jnp.pad(x.astype(jnp.bfloat16),
                     ((0, 0), (0, 0), (0, wq2 - w), (0, c_pad - c_in)))
        res_flat = jnp.pad(xr.reshape(n, h * wq2, c_pad),
                           ((0, 0), (0, r_out2 - h * wq2), (0, 0)))

    # conv2 (3x3 stride 1; bias skipped — exactly cancelled by training-mode BN)
    # + BN + ReLU + residual add, fused in kernel B.
    h1_img = _flat_to_img(h1_flat, h1, w1, wq1, c_pad)
    out_flat = conv_bn_stage(
        _img_to_flat(h1_img, r_in2), prep['w2'], prep['g2'], prep['b2'],
        offsets=offs2, stride=1, wq=wq2, h_out=h1, w_out=w1,
        eps=eps, relu=True, res_flat=res_flat, out_dtype=jnp.float32)

    out = _flat_to_img(out_flat, h1, w1, wq2, c_out)
    return jnp.transpose(out, (0, 3, 1, 2))


# ---------------------------------------------------------------------------
# Deterministic parameter construction (shapes follow the torch __init__)
# ---------------------------------------------------------------------------
def init_params(key, c_in, c_out, is_down):
    k1, k2, k3, k4, k5, k6 = jax.random.split(key, 6)
    c1_in = c_in if is_down else c_out
    return {
        'w1': jax.random.normal(k1, (c_out, c1_in, 3, 3), jnp.float32) * 0.1,
        'g1': 1.0 + 0.1 * jax.random.normal(k5, (c_out,), jnp.float32),
        'b1': 0.1 * jax.random.normal(k6, (c_out,), jnp.float32),
        'w2': jax.random.normal(k2, (c_out, c_out, 3, 3), jnp.float32) * 0.1,
        'bias2': jax.random.normal(k3, (c_out,), jnp.float32) * 0.1,
        'g2': jnp.ones((c_out,), jnp.float32),
        'b2': jnp.zeros((c_out,), jnp.float32),
        'wds': jax.random.normal(k4, (c_out, c_in, 1, 1), jnp.float32) * 0.1,
        'gds': jnp.ones((c_out,), jnp.float32),
        'bds': jnp.zeros((c_out,), jnp.float32),
    }


# ---------------------------------------------------------------------------
# Pure-JAX reference (sanity check only)
# ---------------------------------------------------------------------------
def ref_forward(x_nchw, p, is_down, eps=1e-5):
    def conv(x, w, stride, pad, bias=None):
        y = jax.lax.conv_general_dilated(
            x, w, (stride, stride), ((pad, pad), (pad, pad)),
            dimension_numbers=('NCHW', 'OIHW', 'NCHW'))
        if bias is not None:
            y = y + bias[None, :, None, None]
        return y

    def bn(x, g, b):
        mean = jnp.mean(x, axis=(0, 2, 3), keepdims=True)
        var = jnp.mean((x - mean) ** 2, axis=(0, 2, 3), keepdims=True)
        return ((x - mean) * jax.lax.rsqrt(var + eps)
                * g[None, :, None, None] + b[None, :, None, None])

    s = 2 if is_down else 1
    h = jnp.maximum(bn(conv(x_nchw, p['w1'], s, 1), p['g1'], p['b1']), 0.0)
    h = jnp.maximum(bn(conv(h, p['w2'], 1, 1, p['bias2']), p['g2'], p['b2']), 0.0)
    if is_down:
        r = bn(conv(x_nchw, p['wds'], 2, 0), p['gds'], p['bds'])
    else:
        r = x_nchw
    return h + r


if __name__ == "__main__":
    key = jax.random.PRNGKey(0)
    kx, kp1, kp2 = jax.random.split(key, 3)

    # Tolerance loosened vs a pure-f32 run: bf16 MXU operands plus bf16
    # intermediate activations / residual storage.
    TOL = 1e-1

    # Case 1: is_down=False (identity residual), c_in == c_out == 8
    x = jax.random.normal(kx, (2, 8, 16, 16), jnp.float32)
    p1 = init_params(kp1, 8, 8, is_down=False)
    prep1 = prepare_params(p1, 8, 8, is_down=False)
    y1 = jax.block_until_ready(basic_block_forward(x, prep1, is_down=False))
    r1 = ref_forward(x, p1, is_down=False)
    assert y1.shape == (2, 8, 16, 16), y1.shape
    err1 = float(jnp.max(jnp.abs(y1 - r1)))
    assert err1 < TOL, f"is_down=False max abs err {err1}"

    # Case 2: is_down=True (1x1 stride-2 conv + BN residual), 8 -> 16 channels
    p2 = init_params(kp2, 8, 16, is_down=True)
    prep2 = prepare_params(p2, 8, 16, is_down=True)
    y2 = jax.block_until_ready(basic_block_forward(x, prep2, is_down=True))
    r2 = ref_forward(x, p2, is_down=True)
    assert y2.shape == (2, 16, 8, 8), y2.shape
    err2 = float(jnp.max(jnp.abs(y2 - r2)))
    assert err2 < TOL, f"is_down=True max abs err {err2}"

    print("KERNEL_OK")
</pallas_src>

<mosaic_0001>
module attributes {stable_mosaic.version = 11 : i64} {
  func.func @_conv_moments_kernel(%arg0: i32, %arg1: memref<1x328x8xbf16, #tpu.memory_space<vmem>>, %arg2: memref<9x8x128xbf16, #tpu.memory_space<vmem>>, %arg3: memref<1x288x128xbf16, #tpu.memory_space<vmem>>, %arg4: memref<1x2x128xf32, #tpu.memory_space<vmem>>) attributes {dimension_semantics = [#tpu.dimension_semantics<parallel>], iteration_bounds = array<i64: 2>, scalar_prefetch = 0 : i64, scratch_operands = 0 : i64, tpu.core_type = #tpu.core_type<tc>, window_params = [{transform_indices = @transform_0, window_bounds = array<i64: 1, 328, 8>}, {pipeline_mode = #tpu.pipeline_mode<synchronous>, transform_indices = @transform_1, window_bounds = array<i64: 9, 8, 128>}, {transform_indices = @transform_2, window_bounds = array<i64: 1, 288, 128>}, {transform_indices = @transform_3, window_bounds = array<i64: 1, 2, 128>}]} {
    %c0 = arith.constant 0 : index
    %c0_0 = arith.constant 0 : index
    %c0_1 = arith.constant 0 : index
    %0 = vector.load %arg1[%c0, %c0_0, %c0_1] : memref<1x328x8xbf16, #tpu.memory_space<vmem>>, vector<1x288x8xbf16>
    %1 = vector.shape_cast %0 : vector<1x288x8xbf16> to vector<288x8xbf16>
    %c0_2 = arith.constant 0 : index
    %c0_3 = arith.constant 0 : index
    %c0_4 = arith.constant 0 : index
    %2 = vector.load %arg2[%c0_2, %c0_3, %c0_4] : memref<9x8x128xbf16, #tpu.memory_space<vmem>>, vector<1x8x128xbf16>
    %3 = vector.shape_cast %2 : vector<1x8x128xbf16> to vector<8x128xbf16>
    %cst = arith.constant dense<0.000000e+00> : vector<288x128xf32>
    %4 = tpu.matmul %1, %3, %cst {dimension_numbers = #tpu.dot_dimension_numbers<[1], [0], [0], [1], [0, 0, 1, 1], [], []>} : vector<288x8xbf16>, vector<8x128xbf16>, vector<288x128xf32> -> vector<288x128xf32>
    %c0_5 = arith.constant 0 : index
    %c1 = arith.constant 1 : index
    %c0_6 = arith.constant 0 : index
    %5 = vector.load %arg1[%c0_5, %c1, %c0_6] : memref<1x328x8xbf16, #tpu.memory_space<vmem>>, vector<1x288x8xbf16>
    %6 = vector.shape_cast %5 : vector<1x288x8xbf16> to vector<288x8xbf16>
    %c1_7 = arith.constant 1 : index
    %c0_8 = arith.constant 0 : index
    %c0_9 = arith.constant 0 : index
    %7 = vector.load %arg2[%c1_7, %c0_8, %c0_9] : memref<9x8x128xbf16, #tpu.memory_space<vmem>>, vector<1x8x128xbf16>
    %8 = vector.shape_cast %7 : vector<1x8x128xbf16> to vector<8x128xbf16>
    %cst_10 = arith.constant dense<0.000000e+00> : vector<288x128xf32>
    %9 = tpu.matmul %6, %8, %cst_10 {dimension_numbers = #tpu.dot_dimension_numbers<[1], [0], [0], [1], [0, 0, 1, 1], [], []>} : vector<288x8xbf16>, vector<8x128xbf16>, vector<288x128xf32> -> vector<288x128xf32>
    %10 = arith.addf %4, %9 : vector<288x128xf32>
    %c0_11 = arith.constant 0 : index
    %c2 = arith.constant 2 : index
    %c0_12 = arith.constant 0 : index
    %11 = vector.load %arg1[%c0_11, %c2, %c0_12] : memref<1x328x8xbf16, #tpu.memory_space<vmem>>, vector<1x288x8xbf16>
    %12 = vector.shape_cast %11 : vector<1x288x8xbf16> to vector<288x8xbf16>
    %c2_13 = arith.constant 2 : index
    %c0_14 = arith.constant 0 : index
    %c0_15 = arith.constant 0 : index
    %13 = vector.load %arg2[%c2_13, %c0_14, %c0_15] : memref<9x8x128xbf16, #tpu.memory_space<vmem>>, vector<1x8x128xbf16>
    %14 = vector.shape_cast %13 : vector<1x8x128xbf16> to vector<8x128xbf16>
    %cst_16 = arith.constant dense<0.000000e+00> : vector<288x128xf32>
    %15 = tpu.matmul %12, %14, %cst_16 {dimension_numbers = #tpu.dot_dimension_numbers<[1], [0], [0], [1], [0, 0, 1, 1], [], []>} : vector<288x8xbf16>, vector<8x128xbf16>, vector<288x128xf32> -> vector<288x128xf32>
    %16 = arith.addf %10, %15 : vector<288x128xf32>
    %c0_17 = arith.constant 0 : index
    %c18 = arith.constant 18 : index
    %c0_18 = arith.constant 0 : index
    %17 = vector.load %arg1[%c0_17, %c18, %c0_18] : memref<1x328x8xbf16, #tpu.memory_space<vmem>>, vector<1x288x8xbf16>
    %18 = vector.shape_cast %17 : vector<1x288x8xbf16> to vector<288x8xbf16>
    %c3 = arith.constant 3 : index
    %c0_19 = arith.constant 0 : index
    %c0_20 = arith.constant 0 : index
    %19 = vector.load %arg2[%c3, %c0_19, %c0_20] : memref<9x8x128xbf16, #tpu.memory_space<vmem>>, vector<1x8x128xbf16>
    %20 = vector.shape_cast %19 : vector<1x8x128xbf16> to vector<8x128xbf16>
    %cst_21 = arith.constant dense<0.000000e+00> : vector<288x128xf32>
    %21 = tpu.matmul %18, %20, %cst_21 {dimension_numbers = #tpu.dot_dimension_numbers<[1], [0], [0], [1], [0, 0, 1, 1], [], []>} : vector<288x8xbf16>, vector<8x128xbf16>, vector<288x128xf32> -> vector<288x128xf32>
    %22 = arith.addf %16, %21 : vector<288x128xf32>
    %c0_22 = arith.constant 0 : index
    %c19 = arith.constant 19 : index
    %c0_23 = arith.constant 0 : index
    %23 = vector.load %arg1[%c0_22, %c19, %c0_23] : memref<1x328x8xbf16, #tpu.memory_space<vmem>>, vector<1x288x8xbf16>
    %24 = vector.shape_cast %23 : vector<1x288x8xbf16> to vector<288x8xbf16>
    %c4 = arith.constant 4 : index
    %c0_24 = arith.constant 0 : index
    %c0_25 = arith.constant 0 : index
    %25 = vector.load %arg2[%c4, %c0_24, %c0_25] : memref<9x8x128xbf16, #tpu.memory_space<vmem>>, vector<1x8x128xbf16>
    %26 = vector.shape_cast %25 : vector<1x8x128xbf16> to vector<8x128xbf16>
    %cst_26 = arith.constant dense<0.000000e+00> : vector<288x128xf32>
    %27 = tpu.matmul %24, %26, %cst_26 {dimension_numbers = #tpu.dot_dimension_numbers<[1], [0], [0], [1], [0, 0, 1, 1], [], []>} : vector<288x8xbf16>, vector<8x128xbf16>, vector<288x128xf32> -> vector<288x128xf32>
    %28 = arith.addf %22, %27 : vector<288x128xf32>
    %c0_27 = arith.constant 0 : index
    %c20 = arith.constant 20 : index
    %c0_28 = arith.constant 0 : index
    %29 = vector.load %arg1[%c0_27, %c20, %c0_28] : memref<1x328x8xbf16, #tpu.memory_space<vmem>>, vector<1x288x8xbf16>
    %30 = vector.shape_cast %29 : vector<1x288x8xbf16> to vector<288x8xbf16>
    %c5 = arith.constant 5 : index
    %c0_29 = arith.constant 0 : index
    %c0_30 = arith.constant 0 : index
    %31 = vector.load %arg2[%c5, %c0_29, %c0_30] : memref<9x8x128xbf16, #tpu.memory_space<vmem>>, vector<1x8x128xbf16>
    %32 = vector.shape_cast %31 : vector<1x8x128xbf16> to vector<8x128xbf16>
    %cst_31 = arith.constant dense<0.000000e+00> : vector<288x128xf32>
    %33 = tpu.matmul %30, %32, %cst_31 {dimension_numbers = #tpu.dot_dimension_numbers<[1], [0], [0], [1], [0, 0, 1, 1], [], []>} : vector<288x8xbf16>, vector<8x128xbf16>, vector<288x128xf32> -> vector<288x128xf32>
    %34 = arith.addf %28, %33 : vector<288x128xf32>
    %c0_32 = arith.constant 0 : index
    %c36 = arith.constant 36 : index
    %c0_33 = arith.constant 0 : index
    %35 = vector.load %arg1[%c0_32, %c36, %c0_33] : memref<1x328x8xbf16, #tpu.memory_space<vmem>>, vector<1x288x8xbf16>
    %36 = vector.shape_cast %35 : vector<1x288x8xbf16> to vector<288x8xbf16>
    %c6 = arith.constant 6 : index
    %c0_34 = arith.constant 0 : index
    %c0_35 = arith.constant 0 : index
    %37 = vector.load %arg2[%c6, %c0_34, %c0_35] : memref<9x8x128xbf16, #tpu.memory_space<vmem>>, vector<1x8x128xbf16>
    %38 = vector.shape_cast %37 : vector<1x8x128xbf16> to vector<8x128xbf16>
    %cst_36 = arith.constant dense<0.000000e+00> : vector<288x128xf32>
    %39 = tpu.matmul %36, %38, %cst_36 {dimension_numbers = #tpu.dot_dimension_numbers<[1], [0], [0], [1], [0, 0, 1, 1], [], []>} : vector<288x8xbf16>, vector<8x128xbf16>, vector<288x128xf32> -> vector<288x128xf32>
    %40 = arith.addf %34, %39 : vector<288x128xf32>
    %c0_37 = arith.constant 0 : index
    %c37 = arith.constant 37 : index
    %c0_38 = arith.constant 0 : index
    %41 = vector.load %arg1[%c0_37, %c37, %c0_38] : memref<1x328x8xbf16, #tpu.memory_space<vmem>>, vector<1x288x8xbf16>
    %42 = vector.shape_cast %41 : vector<1x288x8xbf16> to vector<288x8xbf16>
    %c7 = arith.constant 7 : index
    %c0_39 = arith.constant 0 : index
    %c0_40 = arith.constant 0 : index
    %43 = vector.load %arg2[%c7, %c0_39, %c0_40] : memref<9x8x128xbf16, #tpu.memory_space<vmem>>, vector<1x8x128xbf16>
    %44 = vector.shape_cast %43 : vector<1x8x128xbf16> to vector<8x128xbf16>
    %cst_41 = arith.constant dense<0.000000e+00> : vector<288x128xf32>
    %45 = tpu.matmul %42, %44, %cst_41 {dimension_numbers = #tpu.dot_dimension_numbers<[1], [0], [0], [1], [0, 0, 1, 1], [], []>} : vector<288x8xbf16>, vector<8x128xbf16>, vector<288x128xf32> -> vector<288x128xf32>
    %46 = arith.addf %40, %45 : vector<288x128xf32>
    %c0_42 = arith.constant 0 : index
    %c38 = arith.constant 38 : index
    %c0_43 = arith.constant 0 : index
    %47 = vector.load %arg1[%c0_42, %c38, %c0_43] : memref<1x328x8xbf16, #tpu.memory_space<vmem>>, vector<1x288x8xbf16>
    %48 = vector.shape_cast %47 : vector<1x288x8xbf16> to vector<288x8xbf16>
    %c8 = arith.constant 8 : index
    %c0_44 = arith.constant 0 : index
    %c0_45 = arith.constant 0 : index
    %49 = vector.load %arg2[%c8, %c0_44, %c0_45] : memref<9x8x128xbf16, #tpu.memory_space<vmem>>, vector<1x8x128xbf16>
    %50 = vector.shape_cast %49 : vector<1x8x128xbf16> to vector<8x128xbf16>
    %cst_46 = arith.constant dense<0.000000e+00> : vector<288x128xf32>
    %51 = tpu.matmul %48, %50, %cst_46 {dimension_numbers = #tpu.dot_dimension_numbers<[1], [0], [0], [1], [0, 0, 1, 1], [], []>} : vector<288x8xbf16>, vector<8x128xbf16>, vector<288x128xf32> -> vector<288x128xf32>
    %52 = arith.addf %46, %51 : vector<288x128xf32>
    %53 = arith.truncf %52 : vector<288x128xf32> to vector<288x128xbf16>
    %c0_47 = arith.constant 0 : index
    %c0_48 = arith.constant 0 : index
    %c0_49 = arith.constant 0 : index
    %54 = vector.load %arg3[%c0_47, %c0_48, %c0_49] : memref<1x288x128xbf16, #tpu.memory_space<vmem>>, vector<1x288x128xbf16>
    %55 = vector.shape_cast %54 : vector<1x288x128xbf16> to vector<288x128xbf16>
    %56 = vector.shape_cast %53 : vector<288x128xbf16> to vector<1x288x128xbf16>
    tpu.vector_store %arg3[%c0_47, %c0_48, %c0_49], %56 {strides = array<i32>} : memref<1x288x128xbf16, #tpu.memory_space<vmem>>, vector<1x288x128xbf16>,
    %57 = tpu.iota {dimensions = array<i32: 0>} : vector<288x1xi32>
    %c18_i32 = arith.constant 18 : i32
    %c0_i32 = arith.constant 0 : i32
    %58 = arith.cmpi eq, %c18_i32, %c0_i32 : i32
    %c1_i32 = arith.constant 1 : i32
    %59 = arith.select %58, %c1_i32, %c18_i32 : i32
    %60 = vector.broadcast %59 : i32 to vector<288x1xi32>
    %61 = arith.remsi %57, %60 : vector<288x1xi32>
    %c0_i32_50 = arith.constant 0 : i32
    %62 = vector.broadcast %c0_i32_50 : i32 to vector<288x1xi32>
    %63 = arith.cmpi ne, %61, %62 : vector<288x1xi32>
    %c0_i32_51 = arith.constant 0 : i32
    %64 = vector.broadcast %c0_i32_51 : i32 to vector<288x1xi32>
    %65 = arith.cmpi slt, %61, %64 : vector<288x1xi32>
    %c0_i32_52 = arith.constant 0 : i32
    %66 = arith.cmpi slt, %59, %c0_i32_52 : i32
    %67 = vector.broadcast %66 : i1 to vector<288x1xi1>
    %68 = vector.broadcast %67 : vector<288x1xi1> to vector<288x1xi1>
    %69 = arith.xori %65, %68 : vector<288x1xi1>
    %70 = arith.andi %69, %63 : vector<288x1xi1>
    %71 = vector.broadcast %59 : i32 to vector<288x1xi32>
    %72 = arith.addi %61, %71 : vector<288x1xi32>
    %73 = arith.select %70, %72, %61 : vector<288x1xi1>, vector<288x1xi32>
    %c16_i32 = arith.constant 16 : i32
    %74 = vector.broadcast %c16_i32 : i32 to vector<288x1xi32>
    %75 = arith.cmpi slt, %73, %74 : vector<288x1xi32>
    %c288_i32 = arith.constant 288 : i32
    %76 = vector.broadcast %c288_i32 : i32 to vector<288x1xi32>
    %77 = arith.cmpi slt, %57, %76 : vector<288x1xi32>
    %78 = arith.andi %75, %77 : vector<288x1xi1>
    %cst_53 = arith.constant 0.000000e+00 : f32
    %79 = vector.shape_cast %78 : vector<288x1xi1> to vector<288x1xi1>
    %80 = vector.broadcast %79 : vector<288x1xi1> to vector<288x128xi1>
    %81 = vector.broadcast %cst_53 : f32 to vector<288x128xf32>
    %82 = arith.select %80, %52, %81 : vector<288x128xi1>, vector<288x128xf32>
    %cst_54 = arith.constant dense<0.000000e+00> : vector<128xf32>
    %83 = vector.multi_reduction <add>, %82, %cst_54 [0] : vector<288x128xf32> to vector<128xf32>
    %84 = vector.shape_cast %83 : vector<128xf32> to vector<1x128xf32>
    %cst_55 = arith.constant 2.560000e+02 : f32
    %85 = vector.broadcast %cst_55 : f32 to vector<1x128xf32>
    %86 = arith.divf %84, %85 : vector<1x128xf32>
    %87 = vector.broadcast %86 : vector<1x128xf32> to vector<288x128xf32>
    %88 = arith.subf %52, %87 : vector<288x128xf32>
    %cst_56 = arith.constant 0.000000e+00 : f32
    %89 = vector.shape_cast %78 : vector<288x1xi1> to vector<288x1xi1>
    %90 = vector.broadcast %89 : vector<288x1xi1> to vector<288x128xi1>
    %91 = vector.broadcast %cst_56 : f32 to vector<288x128xf32>
    %92 = arith.select %90, %88, %91 : vector<288x128xi1>, vector<288x128xf32>
    %93 = arith.mulf %92, %92 : vector<288x128xf32>
    %cst_57 = arith.constant dense<0.000000e+00> : vector<128xf32>
    %94 = vector.multi_reduction <add>, %93, %cst_57 [0] : vector<288x128xf32> to vector<128xf32>
    %95 = vector.shape_cast %94 : vector<128xf32> to vector<1x128xf32>
    %96 = tpu.concatenate %86, %95 in 0 : vector<1x128xf32>, vector<1x128xf32> -> vector<2x128xf32>
    %c0_58 = arith.constant 0 : index
    %c0_59 = arith.constant 0 : index
    %c0_60 = arith.constant 0 : index
    %97 = vector.load %arg4[%c0_58, %c0_59, %c0_60] : memref<1x2x128xf32, #tpu.memory_space<vmem>>, vector<1x2x128xf32>
    %98 = vector.shape_cast %97 : vector<1x2x128xf32> to vector<2x128xf32>
    %99 = vector.shape_cast %96 : vector<2x128xf32> to vector<1x2x128xf32>
    tpu.vector_store %arg4[%c0_58, %c0_59, %c0_60], %99 {strides = array<i32>} : memref<1x2x128xf32, #tpu.memory_space<vmem>>, vector<1x2x128xf32>,
    return
  }
  func.func @transform_0(%arg0: i32) -> (i32, i32, i32) {
    %c0_i32 = arith.constant 0 : i32
    %c0_i32_0 = arith.constant 0 : i32
    %c0_i32_1 = arith.constant 0 : i32
    return %arg0, %c0_i32, %c0_i32_0 : i32, i32, i32
  }
  func.func @transform_1(%arg0: i32) -> (i32, i32, i32) {
    %c0_i32 = arith.constant 0 : i32
    %c0_i32_0 = arith.constant 0 : i32
    %c0_i32_1 = arith.constant 0 : i32
    %c0_i32_2 = arith.constant 0 : i32
    return %c0_i32, %c0_i32_0, %c0_i32_1 : i32, i32, i32
  }
  func.func @transform_2(%arg0: i32) -> (i32, i32, i32) {
    %c0_i32 = arith.constant 0 : i32
    %c0_i32_0 = arith.constant 0 : i32
    %c0_i32_1 = arith.constant 0 : i32
    return %arg0, %c0_i32, %c0_i32_0 : i32, i32, i32
  }
  func.func @transform_3(%arg0: i32) -> (i32, i32, i32) {
    %c0_i32 = arith.constant 0 : i32
    %c0_i32_0 = arith.constant 0 : i32
    %c0_i32_1 = arith.constant 0 : i32
    return %arg0, %c0_i32, %c0_i32_0 : i32, i32, i32
  }
}

</mosaic_0001>

<bundles_post_ra>
// kernel: tpu_custom_call.1
= control target key start
LH: loop header
LB: loop body
LE: loop exit
PB: predicated region body
PF: predicated region fallthrough
CT: control target
= control target key end

     0   :  { %9 = vsyncpa [#allocation3], 0  ;;  %s9185_s0 = inlined_call_operand.vmem [shape: bf16[2,328,8], index: 0, kind: input, shape index: {}]   ;;  %s9186_s1 = inlined_call_operand.vmem [shape: bf16[9,8,128], index: 1, kind: input, shape index: {}]   ;;  %s9187_s2 = inlined_call_operand.hbm [shape: bf16[2,288,128], index: 2, kind: output, shape index: {0}]   ;;  %s9188_s3 = inlined_call_operand.hbm [shape: f32[2,2,128], index: 3, kind: output, shape index: {1}]  }
   0x1   :  { %11 = vsyncpa [#allocation3 + $0x1], 0 }
   0x2   :  { %12 = vsyncpa [#allocation5], 0 }
   0x3   :  { %14 = vsyncpa [#allocation5 + $0x1], 0  ;;  %s6508_s12 = smov 0   ;;  %s6510_s13 = smov 0  }
   0x4   :  { %s6512_s14 = smov 0   ;;  %s6514_s15 = smov 0  }
   0x5 LB: > { %s6529_s16 = sadd.s32 4294967295, %s6482_s15   ;;  %s4959_s17 = sadd.s32 4294967294, %s6482_s15   ;;  %s6482_s15 = sphi %s6514_s15, %s9604_s15   ;;  %s6478_s14 = sphi %s6512_s14, %s9603_s14   ;;  %s6474_s13 = sphi %s6510_s13, %s9602_s13   ;;  %s6470_s12 = sphi %s6508_s12, %s9601_s12  }
   0x6   : > { %s6533_s18 = sadd.s32 1, %s6482_s15   ;;  %s74_s19 = sadd.s32 1, %s6478_s14 }
   0x7   : > { %s71_s20 = ssub.s32 %s6482_s15, %s6533_s18  ;;  %p84_p0 = scmp.ne.s32.totalorder %s6478_s14, %s6474_s13 }
   0x8   : > { %p72_p1 = scmp.eq.s32.totalorder %s71_s20, 0  ;;  %p85_p2 = scmp.eq.s32.totalorder %s6529_s16, 1 }
   0x9   : > { %p90_p3 = scmp.ne.s32.totalorder %s6474_s13, %s6470_s12  ;;  %p91_p4 = scmp.eq.s32.totalorder %s4959_s17, 1 }
   0xa   : > { %s6544_s21 = scalar_select %p72_p1, %s6478_s14, %s74_s19  }
   0xb   : > { %p6546_p5 = por %p85_p2, %p84_p0  ;;  %p6550_p6 = por %p91_p4, %p90_p3 }
   0xc   : > { %p4962_p7 = scmp.ge.s32.totalorder %s6482_s15, 1  ;;  %p146_p8 = scmp.lt.s32.totalorder %s6482_s15, 3 }
   0xe   : > { %p147_p9 = pnand %p4962_p7, %p146_p8 }
  0x10   : > { %150 = sbr.rel (%p147_p9) target bundleno = 748 (0x2ec), region = 28 }
  0x17   : > { %vm518_vm0 = vcmask 1043456   ;;  %v5079_v0 = vld [vmem:[%s9186_s1 + $0x10] sm:$0xf]  ;;  %v4965_v1 = vld [vmem:[%s9186_s1 + $0x4] sm:$0xf]  ;;  %p175_p10 = scmp.lt.s32.totalorder %s6529_s16, 1 }
  0x18   : > { %6188 = vmatprep.subr.msk.bf16.mxu0 %vm518_vm0, %v5079_v0  ;;  %6184 = vmatprep.subr.msk.bf16.mxu1 %vm518_vm0, %v4965_v1  ;;  %v6566_v2 = vsel %vm518_vm0, %v5079_v0, 0  ;;  %v520_v3 = vsel %vm518_vm0, %v4965_v1, 0  ;;  %v5099_v4 = vld [vmem:[%s9186_s1 + $0x14] sm:$0xf]  ;;  %v217_v5 = vld [vmem:[%s9186_s1] sm:$0xf] }
  0x19   : > { %5705 = vmatpush3.bf16.msra.mxu0 %v6566_v2  ;;  %5553 = vmatpush3.bf16.msra.mxu1 %v520_v3  ;;  %s176_s28 = scalar_select %p175_p10, %s6529_s16, 1  ;;  %vm314_vm1 = vsmask.f32 7424  ;;  %vm463_vm2 = vcmask 64512   ;;  %v6585_v6 = vsel %vm518_vm0, %v5099_v4, 0  ;;  %v736_v12 = vsel %vm518_vm0, %v217_v5, 0 }
  0x1a   : > { %6190 = vmatprep.subr.msk.bf16.mxu0 %vm518_vm0, %v5099_v4  ;;  %6185 = vmatprep.subr.msk.bf16.mxu1 %vm518_vm0, %v217_v5  ;;  %vm1674_vm3 = vsmask.f32 6400  ;;  %v6633_v39 = vld [vmem:[%s9186_s1 + $0x8] sm:$0xf]  ;;  %v6667_v1 = vld [vmem:[%s9186_s1 + $0x18] sm:$0xf] }
  0x1b   : > { %s6195_s6 = smul.u32 164, %s176_s28  ;;  %vm2121_vm4 = vcmask 1045504   ;;  %vm921_vm5 = vcmask 1046528   ;;  %vm2874_vm6 = vsmask.f32 5376  ;;  %vm3321_vm7 = vcmask 1044480  }
  0x1c   : > { %s7887_s4 = sand.u32 1, %s6474_s13   ;;  %s6268_s7 = smul.u32 2304, %s6529_s16 }
  0x1d   : > { %s6582_s9 = scalar_lea.vmem %s9185_s0, %s6195_s6  ;;  %s6194_s5 = smul.u32 144, %s7887_s4 }
  0x1e   : > { %v181_v7 = vld [vmem:[%s6582_s9] sm:$0xf]  ;;  %v6589_v8 = vld [vmem:[%s6582_s9 + $0x4] sm:$0xf]  ;;  %v6595_v10 = vld [vmem:[%s6582_s9 + $0x8] sm:$0xff]   ;;  %s8888_s11 = scalar_lea.hbm %s9187_s2, %s6268_s7  ;;  %s4834_s17 = scalar_lea.sflag [#allocation3], %s7887_s4 }
  0x1f   : > { %v6592_v9 = vcombine.low %v181_v7, %v6589_v8  ;;  %v1229_v11 = vld [vmem:[%s6582_s9 + $0x8] sm:$0xe]  ;;  %v6600_v13 = vld [vmem:[%s6582_s9 + $0xc] sm:$0xf]  ;;  %v323_v16 = vshll.u32 %v6595_v10, 16  ;;  %v327_v17 = vshrl.u32 %v6595_v10, 16 }
  0x20   : > { %v6607_v18 = vld [vmem:[%s6582_s9 + $0x10] sm:$0xff]   ;;  %v6613_v20 = vcombine.low %v1229_v11, %v6600_v13  ;;  %v6621_v28 = vld [vmem:[%s6582_s9 + $0x18] sm:$0xff]   ;;  %v6627_v34 = vld [vmem:[%s6582_s9 + $0x20] sm:$0xff]   ;;  %s8064_s6 = scalar_lea.vmem [#allocation2], %s6194_s5  ;;  %s6484_s20 = smov [#allocation2]  }
  0x21   : > { %v316_v14 = vshrl.u32 %v6592_v9, 16  ;;  %v318_v15 = vshll.u32 %v6592_v9, 16  ;;  %v6610_v19 = vld [vmem:[%s6582_s9 + $0x10] sm:$0xff]   ;;  %v325_v22 = vrot.slane %v323_v16, 1  ;;  %v1684_v23 = vshrl.u32 %v6607_v18, 16  ;;  %v6624_v33 = vld [vmem:[%s6582_s9 + $0x18] sm:$0xff]  }
  0x22   : > { %v1687_v24 = vshll.u32 %v6607_v18, 16  ;;  %v1676_v25 = vshrl.u32 %v6613_v20, 16  ;;  %v1679_v26 = vshll.u32 %v6613_v20, 16  ;;  %v331_v27 = vshll.u32 %v6610_v19, 16  ;;  %v6642_v48 = vld [vmem:[%s6582_s9 + $0x20] sm:$0xff]   ;;  %v6645_v49 = vld [vmem:[%s6582_s9 + $0x28] sm:$0xff]  }
  0x23   : > { %v320_v21 = vrot.slane %v318_v15, 1  ;;  %v329_v30 = vor.u32 %v327_v17, %v325_v22  ;;  %v1686_v31 = vrot.slane %v1684_v23, 1  ;;  %v1693_v38 = vshrl.u32 %v6621_v28, 16  ;;  %v6651_v54 = vld [vmem:[%s6582_s9 + $0x28] sm:$0xff]   ;;  %v6657_v59 = vld [vmem:[%s6582_s9 + $0x30] sm:$0xff]   ;;  %v6681_v23 = vld [vmem:[%s6582_s9 + $0x38] sm:$0xff]  }
  0x24   : > { %v1689_v32 = vrot.slane %v1687_v24, 2  ;;  %v1678_v35 = vrot.slane %v1676_v25, 1  ;;  %v1681_v36 = vrot.slane %v1679_v26, 2  ;;  %v333_v37 = vrot.slane %v331_v27, 1  ;;  %v6662_v0 = vld [vmem:[%s6582_s9 + $0x30] sm:$0xff]   ;;  %s4852_s8 = sshll.u32 %s8064_s6, 4  ;;  %s8878_s8 = int_to_ptr.vmem [resolvable:$true] %s4852_s8 }
  0x25   : > { %v321_v29 = vor.u32 %v320_v21, %v316_v14  ;;  %v1696_v42 = vshll.u32 %v6621_v28, 16  ;;  %v335_v43 = vshrl.u32 %v6610_v19, 16  ;;  %v1695_v46 = vrot.slane %v1693_v38, 1  ;;  %s6388_s19 = scalar_lea.vmem %s8878_s8, 2304  ;;  %s6392_s24 = sshll.u32 %s6484_s20, 4  ;;  %s6393_s24 = int_to_ptr.vmem [resolvable:$false] %s6392_s24 }
  0x26   : > { %v1690_v41 = vor.u32 %v1689_v32, %v1686_v31  ;;  %v1682_v44 = vor.u32 %v1681_v36, %v1678_v35  ;;  %v334_v45 = vsel %vm314_vm1, %v329_v30, %v333_v37  ;;  %v339_v47 = vshll.u32 %v6624_v33, 16  ;;  %v6690_v35 = vld [vmem:[%s6582_s9 + $0x38] sm:$0xff]   ;;  %p6389_p11 = scmp.ne.s32.totalorder %s8878_s8, %s6388_s19  ;;  %s6394_s25 = scalar_lea.vmem %s6393_s24, 4608 }
  0x27   : > { %v326_v40 = vsel %vm314_vm1, %v321_v29, %v325_v22  ;;  %v1698_v50 = vrot.slane %v1696_v42, 2  ;;  %v337_v51 = vor.u32 %v335_v43, %v333_v37  ;;  %v1702_v52 = vshrl.u32 %v6627_v34, 16  ;;  %p6395_p0 = scmp.lt.s32.totalorder %s8878_s8, %s6393_s24  ;;  %p6396_p1 = scmp.lt.s32.totalorder %s6394_s25, %s6388_s19 }
  0x28   : > { %5554 = vmatprep.mubr.msk.bf16.mxu1 %vm463_vm2, %v326_v40  ;;  %v1705_v53 = vshll.u32 %v6627_v34, 16  ;;  %v1691_v55 = vsel %vm1674_vm3, %v1682_v44, %v1690_v41  ;;  %v341_v56 = vrot.slane %v339_v47, 1  ;;  %v343_v57 = vshrl.u32 %v6624_v33, 16  ;;  %v6701_v44 = vld [vmem:[%s6582_s9 + $0x40] sm:$0xff]   ;;  %p6390_p12 = pnand %p6389_p11, %p6546_p5 }
  0x29   : > { %5555 = vmatmul.mubr.msk.bf16.vlgmr.msra.gmra.mrb[0].mxu1 %vm463_vm2, %v334_v45  ;;  %v347_v58 = vshll.u32 %v6642_v48, 16  ;;  %5706 = vmatprep.mubr.msk.bf16.mxu0 %vm463_vm2, %v1691_v55  ;;  %v1699_v60 = vor.u32 %v1698_v50, %v1695_v46  ;;  %v1704_v61 = vrot.slane %v1702_v52, 1  ;;  %v1711_v63 = vshrl.u32 %v6645_v49, 16  ;;  %p6397_p2 = por %p6396_p1, %p6395_p0 }
  0x2a   : > { %5591 = vmatpush3.bf16.msra.mxu1 %v736_v12  ;;  %v1707_v62 = vrot.slane %v1705_v53, 2  ;;  %v342_v3 = vsel %vm314_vm1, %v337_v51, %v341_v56  ;;  %v345_v4 = vor.u32 %v343_v57, %v341_v56  ;;  %v1714_v7 = vshll.u32 %v6645_v49, 16  ;;  %v6706_v51 = vld [vmem:[%s6582_s9 + $0x40] sm:$0xff]   ;;  %p6391_p13 = pneg %p6390_p12 }
  0x2b   : > { %6186 = vmatprep.subr.msk.bf16.mxu1 %vm518_vm0, %v6633_v39  ;;  %v349_v5 = vrot.slane %v347_v58, 1  ;;  %v1700_v11 = vsel %vm1674_vm3, %v1690_v41, %v1699_v60  ;;  %5558 = vmatprep.mubr.msk.bf16.mxu1 %vm463_vm2, %v342_v3  ;;  %v1713_v14 = vrot.slane %v1711_v63, 1  ;;  %v351_v15 = vshrl.u32 %v6642_v48, 16  ;;  %v6717_v63 = vld [vmem:[%s6582_s9 + $0x48] sm:$0xff]  }
  0x2c   : > { %v1708_v12 = vor.u32 %v1707_v62, %v1704_v61  ;;  %5707 = vmatmul.mubr.msk.bf16.vlgmr.msra.gmra.mrb[0].mxu0 %vm463_vm2, %v1700_v11  ;;  %v1716_v17 = vrot.slane %v1714_v7, 2  ;;  %v355_v21 = vshll.u32 %v6651_v54, 16  ;;  %v1720_v22 = vshrl.u32 %v6657_v59, 16  ;;  %v6714_v62 = vld [vmem:[%s6582_s9 + $0x48] sm:$0xff]   ;;  %p6398_p3 = pnand %p6397_p2, %p6391_p13 }
  0x2d   : > { %v350_v16 = vsel %vm314_vm1, %v345_v4, %v349_v5  ;;  %5743 = vmatpush3.bf16.msra.mxu0 %v6585_v6  ;;  %v353_v25 = vor.u32 %v351_v15, %v349_v5  ;;  %v1723_v26 = vshll.u32 %v6657_v59, 16  ;;  %v359_v27 = vshrl.u32 %v6651_v54, 16 }
  0x2e   : > { %v1709_v24 = vsel %vm1674_vm3, %v1699_v60, %v1708_v12  ;;  %v1717_v29 = vor.u32 %v1716_v17, %v1713_v14  ;;  %v357_v30 = vrot.slane %v355_v21, 1  ;;  %v1722_v31 = vrot.slane %v1720_v22, 1  ;;  %6191 = vmatprep.subr.msk.bf16.mxu0 %vm518_vm0, %v6667_v1  ;;  %v6726_v14 = vld [vmem:[%s6582_s9 + $0x50] sm:$0xff]  }
  0x2f   : > { %5710 = vmatprep.mubr.msk.bf16.mxu0 %vm463_vm2, %v1709_v24  ;;  %v363_v32 = vshll.u32 %v6662_v0, 16  ;;  %v1725_v6 = vrot.slane %v1723_v26, 2  ;;  %v1729_v36 = vshrl.u32 %v6681_v23, 16  ;;  %v1732_v37 = vshll.u32 %v6681_v23, 16 }
  0x30   : > { %v367_v38 = vshrl.u32 %v6662_v0, 16  ;;  %v1718_v40 = vsel %vm1674_vm3, %v1708_v12, %v1717_v29  ;;  %v358_v41 = vsel %vm314_vm1, %v353_v25, %v357_v30  ;;  %v361_v42 = vor.u32 %v359_v27, %v357_v30  ;;  %v6734_v25 = vld [vmem:[%s6582_s9 + $0x50] sm:$0xff]  }
  0x31   : > { %5559 = vmatmul.mubr.msk.bf16.gmra.mrb[4].mxu1 %vm463_vm2, %v350_v16  ;;  %v365_v43 = vrot.slane %v363_v32, 1  ;;  %v1726_v45 = vor.u32 %v1725_v6, %v1722_v31  ;;  %v1731_v46 = vrot.slane %v1729_v36, 1  ;;  %v1734_v47 = vrot.slane %v1732_v37, 2 }
  0x32   : > { %5562 = vmatprep.mubr.msk.bf16.mxu1 %vm463_vm2, %v358_v41  ;;  %v371_v50 = vshll.u32 %v6690_v35, 16  ;;  %v1738_v55 = vshrl.u32 %v6701_v44, 16  ;;  %v1741_v56 = vshll.u32 %v6701_v44, 16  ;;  %v375_v61 = vshrl.u32 %v6690_v35, 16  ;;  %v6744_v41 = vld [vmem:[%s6582_s9 + $0x58] sm:$0xff]  }
  0x33   : > { %v366_v52 = vsel %vm314_vm1, %v361_v42, %v365_v43  ;;  %v369_v53 = vor.u32 %v367_v38, %v365_v43  ;;  %v1727_v57 = vsel %vm1674_vm3, %v1717_v29, %v1726_v45  ;;  %v1735_v58 = vor.u32 %v1734_v47, %v1731_v46  ;;  %v6739_v29 = vld [vmem:[%s6582_s9 + $0x58] sm:$0xff]  }
  0x34   : > { %v373_v60 = vrot.slane %v371_v50, 1  ;;  %5711 = vmatmul.mubr.msk.bf16.gmra.mrb[4].mxu0 %vm463_vm2, %v1718_v40  ;;  %v1740_v3 = vrot.slane %v1738_v55, 1  ;;  %v1743_v4 = vrot.slane %v1741_v56, 2  ;;  %v379_v5 = vshll.u32 %v6706_v51, 16 }
  0x35   : > { %v383_v7 = vshrl.u32 %v6706_v51, 16  ;;  %5714 = vmatprep.mubr.msk.bf16.mxu0 %vm463_vm2, %v1727_v57  ;;  %v1747_v12 = vshrl.u32 %v6714_v62, 16  ;;  %v1750_v16 = vshll.u32 %v6714_v62, 16  ;;  %v387_v17 = vshll.u32 %v6717_v63, 16  ;;  %v2115_v57 = vld [vmem:[%s6582_s9 + $0x8] sm:$0xc] }
  0x36   : > { %v374_v11 = vsel %vm314_vm1, %v369_v53, %v373_v60  ;;  %v1744_v15 = vor.u32 %v1743_v4, %v1740_v3  ;;  %v381_v21 = vrot.slane %v379_v5, 1  ;;  %v1756_v22 = vshrl.u32 %v6726_v14, 16 }
  0x37   : > { %v1759_v24 = vshll.u32 %v6726_v14, 16  ;;  %v1736_v26 = vsel %vm1674_vm3, %v1726_v45, %v1735_v58  ;;  %v377_v27 = vor.u32 %v375_v61, %v373_v60  ;;  %v1749_v30 = vrot.slane %v1747_v12, 1 }
  0x38   : > { %v1752_v31 = vrot.slane %v1750_v16, 2  ;;  %v385_v32 = vor.u32 %v383_v7, %v381_v21  ;;  %v389_v6 = vrot.slane %v387_v17, 1  ;;  %v1745_v36 = vsel %vm1674_vm3, %v1735_v58, %v1744_v15  ;;  %v6758_v58 = vld [vmem:[%s6582_s9 + $0x60] sm:$0xff]  }
  0x39   : > { %5563 = vmatmul.mubr.msk.bf16.gmra.mrb[8].mxu1 %vm463_vm2, %v366_v52  ;;  %v1758_v37 = vrot.slane %v1756_v22, 1  ;;  %v1761_v38 = vrot.slane %v1759_v24, 2  ;;  %v395_v40 = vshll.u32 %v6734_v25, 16  ;;  %v382_v42 = vsel %vm314_vm1, %v377_v27, %v381_v21 }
  0x3a   : > { %5566 = vmatprep.mubr.msk.bf16.mxu1 %vm463_vm2, %v374_v11  ;;  %v391_v43 = vshrl.u32 %v6717_v63, 16  ;;  %v1765_v45 = vshrl.u32 %v6739_v29, 16  ;;  %v1768_v46 = vshll.u32 %v6739_v29, 16  ;;  %v1753_v47 = vor.u32 %v1752_v31, %v1749_v30  ;;  %v6763_v11 = vld [vmem:[%s6582_s9 + $0x68] sm:$0xff]  }
  0x3b   : > { %v390_v50 = vsel %vm314_vm1, %v385_v32, %v389_v6  ;;  %v399_v52 = vshrl.u32 %v6734_v25, 16  ;;  %v403_v53 = vshll.u32 %v6744_v41, 16  ;;  %v1762_v55 = vor.u32 %v1761_v38, %v1758_v37  ;;  %v6780_v32 = vld [vmem:[%s6582_s9 + $0x70] sm:$0xff]  }
  0x3c   : > { %5715 = vmatmul.mubr.msk.bf16.gmra.mrb[8].mxu0 %vm463_vm2, %v1736_v26  ;;  %v397_v56 = vrot.slane %v395_v40, 1  ;;  %v393_v60 = vor.u32 %v391_v43, %v389_v6  ;;  %v1767_v61 = vrot.slane %v1765_v45, 1  ;;  %v1770_v3 = vrot.slane %v1768_v46, 2  ;;  %v6786_v40 = vld [vmem:[%s6582_s9 + $0x78] sm:$0xff]  }
  0x3d   : > { %5718 = vmatprep.mubr.msk.bf16.mxu0 %vm463_vm2, %v1745_v36  ;;  %v1754_v4 = vsel %vm1674_vm3, %v1744_v15, %v1753_v47  ;;  %v405_v7 = vrot.slane %v403_v53, 1  ;;  %v1763_v12 = vsel %vm1674_vm3, %v1753_v47, %v1762_v55  ;;  %v5100_v16 = vcombine.low %v2115_v57, %v6600_v13 }
  0x3e   : > { %v401_v5 = vor.u32 %v399_v52, %v397_v56  ;;  %v411_v17 = vshll.u32 %v6758_v58, 16  ;;  %v398_v21 = vsel %vm314_vm1, %v393_v60, %v397_v56  ;;  %v407_v22 = vshrl.u32 %v6744_v41, 16  ;;  %v6801_v56 = vld [vmem:[%s6582_s9 + $0x80] sm:$0xff]  }
  0x3f   : > { %v6772_v15 = vor.u32 %v1770_v3, %v1767_v61  ;;  %v415_v26 = vshrl.u32 %v6758_v58, 16  ;;  %v419_v27 = vshll.u32 %v6763_v11, 16  ;;  %v2122_v13 = vrot.slane %v5100_v16, 2 }
  0x40   : > { %v406_v24 = vsel %vm314_vm1, %v401_v5, %v405_v7  ;;  %v2123_v30 = vrot.slane %v6607_v18, 2  ;;  %v413_v31 = vrot.slane %v411_v17, 1  ;;  %v409_v6 = vor.u32 %v407_v22, %v405_v7 }
  0x41   : > { %5567 = vmatmul.mubr.msk.bf16.gmra.mrb[12].mxu1 %vm463_vm2, %v382_v42  ;;  %v1772_v36 = vsel %vm1674_vm3, %v1762_v55, %v6772_v15  ;;  %v421_v38 = vrot.slane %v419_v27, 1  ;;  %v427_v18 = vshll.u32 %v6780_v32, 16  ;;  %v2125_v45 = vrot.slane %v6621_v28, 2  ;;  %v6831_v27 = vld [vmem:[%s6582_s9 + $0x90] ss:$0 sps:$4 sm:$0x11]  }
  0x42   : > { %5570 = vmatprep.mubr.msk.bf16.mxu1 %vm463_vm2, %v390_v50  ;;  %v417_v37 = vor.u32 %v415_v26, %v413_v31  ;;  %v2124_v42 = vsel %vm2121_vm4, %v2122_v13, %v2123_v30  ;;  %v414_v43 = vsel %vm314_vm1, %v409_v6, %v413_v31  ;;  %v423_v46 = vshrl.u32 %v6763_v11, 16 }
  0x43   : > { %v431_v50 = vshrl.u32 %v6780_v32, 16  ;;  %v435_v52 = vshll.u32 %v6786_v40, 16  ;;  %v2127_v53 = vrot.slane %v6627_v34, 2  ;;  %v429_v55 = vrot.slane %v427_v18, 1  ;;  %v6814_v34 = vld [vmem:[%s9186_s1 + $0x1c] sm:$0xf] }
  0x44   : > { %5719 = vmatmul.mubr.msk.bf16.gmra.mrb[12].mxu0 %vm463_vm2, %v1754_v4  ;;  %v422_v47 = vsel %vm314_vm1, %v417_v37, %v421_v38  ;;  %v2653_v28 = vsel %vm518_vm0, %v6667_v1, 0  ;;  %v425_v57 = vor.u32 %v423_v46, %v421_v38  ;;  %v2126_v60 = vsel %vm2121_vm4, %v2123_v30, %v2125_v45  ;;  %v6808_v4 = vld [vmem:[%s6582_s9 + $0x88] sm:$0xff]  }
  0x45   : > { %5722 = vmatprep.mubr.msk.bf16.mxu0 %vm463_vm2, %v1763_v12  ;;  %v433_v61 = vor.u32 %v431_v50, %v429_v55  ;;  %v437_v3 = vrot.slane %v435_v52, 1  ;;  %v2128_v5 = vsel %vm2121_vm4, %v2125_v45, %v2127_v53  ;;  %v443_v7 = vshll.u32 %v6801_v56, 16 }
  0x46   : > { %v430_v1 = vsel %vm314_vm1, %v425_v57, %v429_v55  ;;  %v2129_v12 = vrot.slane %v6645_v49, 2  ;;  %v439_v16 = vshrl.u32 %v6786_v40, 16  ;;  %v451_v22 = vshll.u32 %v6808_v4, 16  ;;  %v6858_v55 = vld [vmem:[%s6582_s9 + $0x60] sm:$0xff]   ;;  %v6877_v57 = vld [vmem:[%s6582_s9 + $0x68] sm:$0xff]  }
  0x47   : > { %v438_v17 = vsel %vm314_vm1, %v433_v61, %v437_v3  ;;  %v445_v26 = vrot.slane %v443_v7, 1  ;;  %v459_v37 = vshll.u32 %v6831_v27, 16  ;;  %v2133_v38 = vrot.slane %v6681_v23, 2  ;;  %v6895_v7 = vld [vmem:[%s6582_s9 + $0x78] sm:$0xff]  }
  0x48   : > { %v441_v49 = vor.u32 %v439_v16, %v437_v3  ;;  %v2130_v13 = vsel %vm2121_vm4, %v2127_v53, %v2129_v12  ;;  %v453_v31 = vrot.slane %v451_v22, 1  ;;  %v2135_v18 = vrot.slane %v6701_v44, 2  ;;  %v6911_v22 = vld [vmem:[%s6582_s9 + $0x88] sm:$0xff]  }
  0x49   : > { %5571 = vmatmul.mubr.msk.bf16.gmra.mrb[16].mxu1 %vm463_vm2, %v398_v21  ;;  %v447_v21 = vshrl.u32 %v6801_v56, 16  ;;  %v461_v45 = vrot.slane %v459_v37, 1  ;;  %v2137_v23 = vrot.slane %v6714_v62, 2  ;;  %v2139_v44 = vrot.slane %v6726_v14, 2 }
  0x4a   : > { %5574 = vmatprep.mubr.msk.bf16.mxu1 %vm463_vm2, %v406_v24  ;;  %v2131_v24 = vrot.slane %v6657_v59, 2  ;;  %v446_v59 = vsel %vm314_vm1, %v441_v49, %v445_v26  ;;  %v2141_v62 = vrot.slane %v6739_v29, 2  ;;  %v1014_v14 = vsel %vm518_vm0, %v6633_v39, 0 }
  0x4b   : > { %v449_v30 = vor.u32 %v447_v21, %v445_v26  ;;  %v2138_v52 = vsel %vm2121_vm4, %v2135_v18, %v2137_v23  ;;  %v2140_v53 = vsel %vm2121_vm4, %v2137_v23, %v2139_v44  ;;  %v2145_v61 = vrot.slane %v6877_v57, 2  ;;  %v6915_v26 = vld [vmem:[%s6582_s9 + $0x90] sm:$0xff]  }
  0x4c   : > { %5723 = vmatmul.mubr.msk.bf16.gmra.mrb[16].mxu0 %vm463_vm2, %v1772_v36  ;;  %v2132_v6 = vsel %vm2121_vm4, %v2129_v12, %v2131_v24  ;;  %v455_v36 = vshrl.u32 %v6808_v4, 16  ;;  %v2134_v46 = vsel %vm2121_vm4, %v2131_v24, %v2133_v38  ;;  %v2142_v29 = vsel %vm2121_vm4, %v2139_v44, %v2141_v62  ;;  %v6899_v12 = vld [vmem:[%s6582_s9 + $0x80] sm:$0xff]  }
  0x4d   : > { %5744 = vmatprep.mubr.msk.bf16.mxu0 %vm463_vm2, %v2124_v42  ;;  %v454_v42 = vsel %vm314_vm1, %v449_v30, %v453_v31  ;;  %v2149_v16 = vrot.slane %v6895_v7, 2  ;;  %v2153_v49 = vrot.slane %v6911_v22, 2  ;;  %v2429_v30 = vld [vmem:[%s6582_s9 + $0x10] sm:$0xc] }
  0x51   : > { %5575 = vmatmul.mubr.msk.bf16.gmra.mrb[20].mxu1 %vm463_vm2, %v414_v43  ;;  %v457_v43 = vor.u32 %v455_v36, %v453_v31  ;;  %v6925_v31 = vld [vmem:[%s6582_s9 + $0x14] sm:$0xf] }
  0x52   : > { %5578 = vmatprep.mubr.msk.bf16.mxu1 %vm463_vm2, %v422_v47  ;;  %v2136_v47 = vsel %vm2121_vm4, %v2133_v38, %v2135_v18  ;;  %v6935_v37 = vcombine.low %v2429_v30, %v6925_v31  ;;  %v6938_v38 = vld [vmem:[%s6582_s9 + $0x18] sm:$0xff]  }
  0x53   : > { %v462_v50 = vsel %vm314_vm1, %v457_v43, %v461_v45  ;;  %v2562_v43 = vrot.slane %v6938_v38, 2 }
  0x54   : > { %5745 = vmatmul.mubr.msk.bf16.vlgmr.msra.gmra.mrb[0].mxu0 %vm463_vm2, %v2126_v60  ;;  %v6883_v60 = vld [vmem:[%s6582_s9 + $0x70] sm:$0xff]   ;;  %v2561_v18 = vrot.slane %v6935_v37, 2 }
  0x55   : > { %5781 = vmatpush3.bf16.msra.mxu0 %v2653_v28  ;;  %5748 = vmatprep.mubr.msk.bf16.mxu0 %vm463_vm2, %v2128_v5  ;;  %v2143_v28 = vrot.slane %v6858_v55, 2  ;;  %v2147_v3 = vrot.slane %v6883_v60, 2 }
  0x56   : > { %6192 = vmatprep.subr.msk.bf16.mxu0 %vm518_vm0, %v6814_v34 }
  0x57   : > { %v2144_v39 = vsel %vm2121_vm4, %v2141_v62, %v2143_v28  ;;  %v2146_v5 = vsel %vm2121_vm4, %v2143_v28, %v2145_v61  ;;  %v2150_v21 = vsel %vm2121_vm4, %v2147_v3, %v2149_v16  ;;  %v3100_v62 = vsel %vm518_vm0, %v6814_v34, 0  ;;  %v6973_v28 = vld [vmem:[%s6582_s9 + $0x38] sm:$0xff]  }
  0x59   : > { %5579 = vmatmul.mubr.msk.bf16.gmra.mrb[24].mxu1 %vm463_vm2, %v430_v1  ;;  %v2148_v1 = vsel %vm2121_vm4, %v2145_v61, %v2147_v3  ;;  %v2570_v61 = vrot.slane %v6973_v28, 2  ;;  %v6992_v3 = vld [vmem:[%s6582_s9 + $0x40] sm:$0xff]  }
  0x5a   : > { %5582 = vmatprep.mubr.msk.bf16.mxu1 %vm463_vm2, %v438_v17  ;;  %v2151_v17 = vrot.slane %v6899_v12, 2 }
  0x5c   : > { %5749 = vmatmul.mubr.msk.bf16.gmra.mrb[4].mxu0 %vm463_vm2, %v2130_v13  ;;  %v2152_v24 = vsel %vm2121_vm4, %v2149_v16, %v2151_v17  ;;  %v2155_v13 = vrot.slane %v6915_v26, 2  ;;  %v915_v16 = vld [vmem:[%s6582_s9] sm:$0xe] }
  0x5d   : > { %5752 = vmatprep.mubr.msk.bf16.mxu0 %vm463_vm2, %v2132_v6  ;;  %v2154_v6 = vsel %vm2121_vm4, %v2151_v17, %v2153_v49  ;;  %v2572_v17 = vrot.slane %v6992_v3, 2 }
  0x5e   : > { %v2156_v36 = vsel %vm2121_vm4, %v2153_v49, %v2155_v13 }
  0x5f   : > { %v2573_v49 = vsel %vm2121_vm4, %v2570_v61, %v2572_v17 }
  0x61   : > { %5583 = vmatmul.mubr.msk.bf16.gmra.mrb[28].mxu1 %vm463_vm2, %v446_v59  ;;  %v6931_v59 = vld [vmem:[%s6582_s9 + $0x98] ss:$0 sps:$4 sm:$0x33]  }
  0x62   : > { %5586 = vmatprep.mubr.msk.bf16.mxu1 %vm463_vm2, %v454_v42  ;;  %v2157_v42 = vrot.slane %v6931_v59, 2 }
  0x64   : > { %5753 = vmatmul.mubr.msk.bf16.gmra.mrb[8].mxu0 %vm463_vm2, %v2134_v46  ;;  %v2158_v45 = vsel %vm2121_vm4, %v2155_v13, %v2157_v42  ;;  %v6951_v46 = vld [vmem:[%s6582_s9 + $0x20] sm:$0xff]   ;;  %v7010_v13 = vld [vmem:[%s6582_s9 + $0x50] sm:$0xff]  }
  0x65   : > { %5756 = vmatprep.mubr.msk.bf16.mxu0 %vm463_vm2, %v2136_v47  ;;  %v2563_v47 = vsel %vm2121_vm4, %v2561_v18, %v2562_v43  ;;  %v2564_v23 = vrot.slane %v6951_v46, 2  ;;  %v2576_v42 = vrot.slane %v7010_v13, 2 }
  0x69   : > { %5587 = vmatmul.mubr.msk.bf16.gmra.mrb[32].mxu1 %vm463_vm2, %v462_v50  ;;  %v6955_v50 = vld [vmem:[%s6582_s9 + $0x28] sm:$0xff]  }
  0x6a   : > { %5592 = vmatprep.mubr.msk.bf16.mxu1 %vm463_vm2, %v6592_v9  ;;  %v6869_v9 = vld [vmem:[%s9186_s1 + $0xc] sm:$0xf]  ;;  %v2566_v44 = vrot.slane %v6955_v50, 2 }
  0x6c   : > { %5757 = vmatmul.mubr.msk.bf16.gmra.mrb[12].mxu0 %vm463_vm2, %v2138_v52  ;;  %v2565_v52 = vsel %vm2121_vm4, %v2562_v43, %v2564_v23 }
  0x6d   : > { %5760 = vmatprep.mubr.msk.bf16.mxu0 %vm463_vm2, %v2140_v53  ;;  %v6967_v53 = vld [vmem:[%s6582_s9 + $0x30] sm:$0xff]  }
  0x71   : > { %5593 = vmatmul.mubr.msk.bf16.vlgmr.msra.gmra.mrb[0].mxu1 %vm463_vm2, %v6595_v10 }
  0x72   : > { %5596 = vmatprep.mubr.msk.bf16.mxu1 %vm463_vm2, %v6610_v19  ;;  %5629 = vmatpush3.bf16.msra.mxu1 %v1014_v14  ;;  %v2567_v14 = vsel %vm2121_vm4, %v2564_v23, %v2566_v44  ;;  %v927_v23 = vrot.slane %v6624_v33, 1 }
  0x73   : > { %6187 = vmatprep.subr.msk.bf16.mxu1 %vm518_vm0, %v6869_v9 }
  0x74   : > { %5761 = vmatmul.mubr.msk.bf16.gmra.mrb[16].mxu0 %vm463_vm2, %v2142_v29  ;;  %v6978_v29 = vld [vmem:[%s9186_s1 + $0x20] sm:$0xf] }
  0x75   : > { %5764 = vmatprep.mubr.msk.bf16.mxu0 %vm463_vm2, %v2144_v39  ;;  %v2568_v39 = vrot.slane %v6967_v53, 2 }
  0x77   : > { %v2569_v34 = vsel %vm2121_vm4, %v2566_v44, %v2568_v39 }
  0x79   : > { %5597 = vmatmul.mubr.msk.bf16.gmra.mrb[4].mxu1 %vm463_vm2, %v6624_v33 }
  0x7a   : > { %5600 = vmatprep.mubr.msk.bf16.mxu1 %vm463_vm2, %v6642_v48 }
  0x7c   : > { %5765 = vmatmul.mubr.msk.bf16.gmra.mrb[20].mxu0 %vm463_vm2, %v2146_v5  ;;  %v2571_v5 = vsel %vm2121_vm4, %v2568_v39, %v2570_v61  ;;  %v1453_v39 = vsel %vm518_vm0, %v6869_v9, 0  ;;  %v929_v61 = vrot.slane %v6642_v48, 1  ;;  %v6377_v9 = vld [vmem:[%s9186_s1 + $0x10] sm:$0xf] }
  0x7d   : > { %5768 = vmatprep.mubr.msk.bf16.mxu0 %vm463_vm2, %v2148_v1  ;;  %v6996_v1 = vld [vmem:[%s6582_s9 + $0x48] sm:$0xff]  }
  0x7e   : > { %v930_v48 = vsel %vm921_vm5, %v927_v23, %v929_v61 }
  0x81   : > { %5601 = vmatmul.mubr.msk.bf16.gmra.mrb[8].mxu1 %vm463_vm2, %v6651_v54 }
  0x82   : > { %5604 = vmatprep.mubr.msk.bf16.mxu1 %vm463_vm2, %v6662_v0 }
  0x84   : > { %5769 = vmatmul.mubr.msk.bf16.gmra.mrb[24].mxu0 %vm463_vm2, %v2150_v21  ;;  %v5022_v21 = vcombine.low %v915_v16, %v6589_v8  ;;  %v7015_v8 = vld [vmem:[%s6582_s9 + $0x58] sm:$0xff]   ;;  %v931_v16 = vrot.slane %v6651_v54, 1 }
  0x85   : > { %5772 = vmatprep.mubr.msk.bf16.mxu0 %vm463_vm2, %v2152_v24  ;;  %v2574_v24 = vrot.slane %v6996_v1, 2  ;;  %v2578_v43 = vrot.slane %v7015_v8, 2 }
  0x86   : > { %v922_v30 = vrot.slane %v5022_v21, 1  ;;  %v7057_v21 = vld [vmem:[%s6582_s9 + $0x78] sm:$0xff]   ;;  %v932_v54 = vsel %vm921_vm5, %v929_v61, %v931_v16 }
  0x87   : > { %v2579_v44 = vsel %vm2121_vm4, %v2576_v42, %v2578_v43 }
  0x89   : > { %5605 = vmatmul.mubr.msk.bf16.gmra.mrb[12].mxu1 %vm463_vm2, %v6690_v35 }
  0x8a   : > { %5608 = vmatprep.mubr.msk.bf16.mxu1 %vm463_vm2, %v6706_v51 }
  0x8c   : > { %5773 = vmatmul.mubr.msk.bf16.gmra.mrb[28].mxu0 %vm463_vm2, %v2154_v6  ;;  %v923_v6 = vrot.slane %v6595_v10, 1  ;;  %v925_v10 = vrot.slane %v6610_v19, 1 }
  0x8d   : > { %5776 = vmatprep.mubr.msk.bf16.mxu0 %vm463_vm2, %v2156_v36  ;;  %v2575_v36 = vsel %vm2121_vm4, %v2572_v17, %v2574_v24 }
  0x8e   : > { %v924_v18 = vsel %vm921_vm5, %v922_v30, %v923_v6  ;;  %v933_v30 = vrot.slane %v6662_v0, 1 }
  0x91   : > { %5609 = vmatmul.mubr.msk.bf16.gmra.mrb[16].mxu1 %vm463_vm2, %v6717_v63 }
  0x92   : > { %5612 = vmatprep.mubr.msk.bf16.mxu1 %vm463_vm2, %v6734_v25 }
  0x94   : > { %5777 = vmatmul.mubr.msk.bf16.gmra.mrb[32].mxu0 %vm463_vm2, %v2158_v45  ;;  %v2577_v45 = vsel %vm2121_vm4, %v2574_v24, %v2576_v42  ;;  %v935_v42 = vrot.slane %v6690_v35, 1  ;;  %v937_v35 = vrot.slane %v6706_v51, 1 }
  0x95   : > { %5782 = vmatprep.mubr.msk.bf16.mxu0 %vm463_vm2, %v2563_v47  ;;  %v7028_v47 = vld [vmem:[%s6582_s9 + $0x60] sm:$0xff]  }
  0x96   : > { %v2580_v19 = vrot.slane %v7028_v47, 2 }
  0x99   : > { %5613 = vmatmul.mubr.msk.bf16.gmra.mrb[20].mxu1 %vm463_vm2, %v6744_v41 }
  0x9a   : > { %5616 = vmatprep.mubr.msk.bf16.mxu1 %vm463_vm2, %v6758_v58 }
  0x9c   : > { %5783 = vmatmul.mubr.msk.bf16.vlgmr.msra.gmra.mrb[0].mxu0 %vm463_vm2, %v2565_v52  ;;  %v7033_v52 = vld [vmem:[%s6582_s9 + $0x68] sm:$0xff]  }
  0x9d   : > { %5819 = vmatpush3.bf16.msra.mxu0 %v3100_v62  ;;  %5786 = vmatprep.mubr.msk.bf16.mxu0 %vm463_vm2, %v2567_v14  ;;  %v926_v62 = vsel %vm921_vm5, %v923_v6, %v925_v10  ;;  %v928_v14 = vsel %vm921_vm5, %v925_v10, %v927_v23  ;;  %v2582_v33 = vrot.slane %v7033_v52, 2  ;;  %v934_v10 = vsel %vm921_vm5, %v931_v16, %v933_v30 }
  0x9e   : > { %6193 = vmatprep.subr.msk.bf16.mxu0 %vm518_vm0, %v6978_v29  ;;  %v2876_v16 = vshrl.u32 %v6935_v37, 16 }
  0x9f   : > { %v2583_v17 = vsel %vm2121_vm4, %v2580_v19, %v2582_v33 }
  0xa1   : > { %5617 = vmatmul.mubr.msk.bf16.gmra.mrb[24].mxu1 %vm463_vm2, %v6763_v11 }
  0xa2   : > { %5620 = vmatprep.mubr.msk.bf16.mxu1 %vm463_vm2, %v6780_v32 }
  0xa4   : > { %5787 = vmatmul.mubr.msk.bf16.gmra.mrb[4].mxu0 %vm463_vm2, %v2569_v34  ;;  %v2581_v34 = vsel %vm2121_vm4, %v2578_v43, %v2580_v19  ;;  %v7075_v43 = vld [vmem:[%s6582_s9 + $0x88] sm:$0xff]   ;;  %v939_v19 = vrot.slane %v6717_v63, 1  ;;  %v2879_v63 = vshll.u32 %v6935_v37, 16 }
  0xa5   : > { %5790 = vmatprep.mubr.msk.bf16.mxu0 %vm463_vm2, %v2571_v5  ;;  %v7048_v5 = vld [vmem:[%s6582_s9 + $0x70] sm:$0xff]   ;;  %v2590_v23 = vrot.slane %v7075_v43, 2 }
  0xa6   : > { %v2584_v24 = vrot.slane %v7048_v5, 2  ;;  %v940_v51 = vsel %vm921_vm5, %v937_v35, %v939_v19 }
  0xa8   : > { %v2585_v6 = vsel %vm2121_vm4, %v2582_v33, %v2584_v24  ;;  %v938_v33 = vsel %vm921_vm5, %v935_v42, %v937_v35 }
  0xa9   : > { %5621 = vmatmul.mubr.msk.bf16.gmra.mrb[28].mxu1 %vm463_vm2, %v6786_v40 }
  0xaa   : > { %5624 = vmatprep.mubr.msk.bf16.mxu1 %vm463_vm2, %v6801_v56 }
  0xac   : > { %5791 = vmatmul.mubr.msk.bf16.gmra.mrb[8].mxu0 %vm463_vm2, %v2573_v49  ;;  %v2586_v49 = vrot.slane %v7057_v21, 2 }
  0xad   : > { %5794 = vmatprep.mubr.msk.bf16.mxu0 %vm463_vm2, %v2575_v36  ;;  %v7070_v36 = vld [vmem:[%s6582_s9 + $0x80] sm:$0xff]  }
  0xae   : > { %v2588_v0 = vrot.slane %v7070_v36, 2 }
  0xb1   : > { %5625 = vmatmul.mubr.msk.bf16.gmra.mrb[32].mxu1 %vm463_vm2, %v6808_v4 }
  0xb2   : > { %5630 = vmatprep.mubr.msk.bf16.mxu1 %vm463_vm2, %v924_v18  ;;  %v2587_v18 = vsel %vm2121_vm4, %v2584_v24, %v2586_v49 }
  0xb4   : > { %5795 = vmatmul.mubr.msk.bf16.gmra.mrb[12].mxu0 %vm463_vm2, %v2577_v45  ;;  %v936_v45 = vsel %vm921_vm5, %v933_v30, %v935_v42  ;;  %v943_v30 = vrot.slane %v6744_v41, 1  ;;  %v2881_v42 = vrot.slane %v2879_v63, 3  ;;  %v2902_v41 = vshrl.u32 %v6955_v50, 16 }
  0xb5   : > { %5798 = vmatprep.mubr.msk.bf16.mxu0 %vm463_vm2, %v2579_v44  ;;  %v2589_v44 = vsel %vm2121_vm4, %v2586_v49, %v2588_v0  ;;  %v6373_v49 = vld [vmem:[%s6582_s9 + $0xa0] ss:$0 sps:$4 sm:$0x33]  }
  0xb9   : > { %5631 = vmatmul.mubr.msk.bf16.vlgmr.msra.gmra.mrb[0].mxu1 %vm463_vm2, %v926_v62  ;;  %v7088_v62 = vld [vmem:[%s6582_s9 + $0x90] sm:$0xff]  }
  0xba   : > { %5634 = vmatprep.mubr.msk.bf16.mxu1 %vm463_vm2, %v928_v14  ;;  %5667 = vmatpush3.bf16.msra.mxu1 %v1453_v39  ;;  %v7092_v14 = vld [vmem:[%s6582_s9 + $0x98] sm:$0xff]   ;;  %v2591_v39 = vsel %vm2121_vm4, %v2588_v0, %v2590_v23  ;;  %v2592_v61 = vrot.slane %v7088_v62, 2  ;;  %v2596_v0 = vrot.slane %v6373_v49, 2 }
  0xbb   : > { %6189 = vmatprep.subr.msk.bf16.mxu1 %vm518_vm0, %v6377_v9  ;;  %v2884_v9 = vshrl.u32 %v6938_v38, 16 }
  0xbc   : > { %5799 = vmatmul.mubr.msk.bf16.gmra.mrb[16].mxu0 %vm463_vm2, %v2581_v34  ;;  %v2594_v34 = vrot.slane %v7092_v14, 2  ;;  %v2593_v24 = vsel %vm2121_vm4, %v2590_v23, %v2592_v61  ;;  %v2896_v23 = vshll.u32 %v6951_v46, 16 }
  0xbd   : > { %5802 = vmatprep.mubr.msk.bf16.mxu0 %vm463_vm2, %v2583_v17  ;;  %v2887_v17 = vshll.u32 %v6938_v38, 16  ;;  %v2886_v37 = vrot.slane %v2884_v9, 2  ;;  %v2904_v9 = vrot.slane %v2902_v41, 2  ;;  %v2929_v41 = vshrl.u32 %v6992_v3, 16 }
  0xc1   : > { %5635 = vmatmul.mubr.msk.bf16.gmra.mrb[4].mxu1 %vm463_vm2, %v930_v48  ;;  %v941_v48 = vrot.slane %v6734_v25, 1 }
  0xc2   : > { %5638 = vmatprep.mubr.msk.bf16.mxu1 %vm463_vm2, %v932_v54  ;;  %v2595_v54 = vsel %vm2121_vm4, %v2592_v61, %v2594_v34 }
  0xc3   : > { %v944_v25 = vsel %vm921_vm5, %v941_v48, %v943_v30 }
  0xc4   : > { %5803 = vmatmul.mubr.msk.bf16.gmra.mrb[20].mxu0 %vm463_vm2, %v2585_v6  ;;  %v2878_v6 = vrot.slane %v2876_v16, 2  ;;  %v947_v16 = vrot.slane %v6763_v11, 1  ;;  %v2920_v11 = vshrl.u32 %v6973_v28, 16 }
  0xc5   : > { %5806 = vmatprep.mubr.msk.bf16.mxu0 %vm463_vm2, %v2587_v18  ;;  %v2889_v18 = vrot.slane %v2887_v17, 3 }
  0xc6   : > { %v2882_v35 = vor.u32 %v2881_v42, %v2878_v6  ;;  %v2923_v6 = vshll.u32 %v6973_v28, 16 }
  0xc9   : > { %5639 = vmatmul.mubr.msk.bf16.gmra.mrb[8].mxu1 %vm463_vm2, %v934_v10  ;;  %v942_v10 = vsel %vm921_vm5, %v939_v19, %v941_v48  ;;  %v945_v19 = vrot.slane %v6758_v58, 1  ;;  %v2911_v58 = vshrl.u32 %v6967_v53, 16 }
  0xca   : > { %5642 = vmatprep.mubr.msk.bf16.mxu1 %vm463_vm2, %v936_v45  ;;  %v2893_v45 = vshrl.u32 %v6951_v46, 16 }
  0xcb   : > { %v946_v48 = vsel %vm921_vm5, %v943_v30, %v945_v19  ;;  %v949_v30 = vrot.slane %v6780_v32, 1  ;;  %v2932_v32 = vshll.u32 %v6992_v3, 16 }
  0xcc   : > { %5807 = vmatmul.mubr.msk.bf16.gmra.mrb[24].mxu0 %vm463_vm2, %v2589_v44  ;;  %v2890_v44 = vor.u32 %v2889_v18, %v2886_v37  ;;  %v2895_v61 = vrot.slane %v2893_v45, 2  ;;  %v2913_v37 = vrot.slane %v2911_v58, 2  ;;  %v2922_v45 = vrot.slane %v2920_v11, 2 }
  0xcd   : > { %5810 = vmatprep.mubr.msk.bf16.mxu0 %vm463_vm2, %v2591_v39  ;;  %v2905_v39 = vshll.u32 %v6955_v50, 16  ;;  %v2947_v58 = vshrl.u32 %v7010_v13, 16  ;;  %v2959_v11 = vshll.u32 %v7015_v8, 16 }
  0xce   : > { %v2891_v63 = vsel %vm2874_vm6, %v2882_v35, %v2890_v44  ;;  %v950_v35 = vsel %vm921_vm5, %v947_v16, %v949_v30 }
  0xcf   : > { %v2907_v17 = vrot.slane %v2905_v39, 3 }
  0xd1   : > { %5643 = vmatmul.mubr.msk.bf16.gmra.mrb[12].mxu1 %vm463_vm2, %v938_v33  ;;  %v2597_v33 = vsel %vm2121_vm4, %v2594_v34, %v2596_v0  ;;  %v2914_v34 = vshll.u32 %v6967_v53, 16  ;;  %v2908_v49 = vor.u32 %v2907_v17, %v2904_v9  ;;  %v3414_v0 = vsel %vm518_vm0, %v6978_v29, 0 }
  0xd2   : > { %5646 = vmatprep.mubr.msk.bf16.mxu1 %vm463_vm2, %v940_v51  ;;  %v2898_v51 = vrot.slane %v2896_v23, 3  ;;  %v2925_v23 = vrot.slane %v2923_v6, 3  ;;  %v2938_v29 = vshrl.u32 %v6996_v1, 16 }
  0xd3   : > { %v2916_v18 = vrot.slane %v2914_v34, 3  ;;  %v2950_v34 = vshll.u32 %v7010_v13, 16 }
  0xd4   : > { %5811 = vmatmul.mubr.msk.bf16.gmra.mrb[28].mxu0 %vm463_vm2, %v2593_v24  ;;  %v2899_v24 = vor.u32 %v2898_v51, %v2895_v61  ;;  %v2926_v39 = vor.u32 %v2925_v23, %v2922_v45  ;;  %v2931_v61 = vrot.slane %v2929_v41, 2  ;;  %v2934_v51 = vrot.slane %v2932_v32, 3 }
  0xd5   : > { %5814 = vmatprep.mubr.msk.bf16.mxu0 %vm463_vm2, %v2595_v54  ;;  %v948_v54 = vsel %vm921_vm5, %v945_v19, %v947_v16  ;;  %v2941_v19 = vshll.u32 %v6996_v1, 16  ;;  %v2940_v17 = vrot.slane %v2938_v29, 2  ;;  %v2961_v23 = vrot.slane %v2959_v11, 3  ;;  %v6379_v29 = vld [vmem:[%s6582_s9 + $0x18] sm:$0xff]  }
  0xd6   : > { %v2900_v42 = vsel %vm2874_vm6, %v2890_v44, %v2899_v24  ;;  %v2917_v44 = vor.u32 %v2916_v18, %v2913_v37  ;;  %v2952_v37 = vrot.slane %v2950_v34, 3  ;;  %v1361_v18 = vrot.slane %v6613_v20, 1 }
  0xd7   : > { %v2965_v32 = vshrl.u32 %v7028_v47, 16  ;;  %v2968_v20 = vshll.u32 %v7028_v47, 16  ;;  %v2986_v34 = vshll.u32 %v7048_v5, 16  ;;  %v2995_v11 = vshll.u32 %v7057_v21, 16 }
  0xd8   : > { %v2918_v16 = vsel %vm2874_vm6, %v2908_v49, %v2917_v44  ;;  %v2927_v9 = vsel %vm2874_vm6, %v2917_v44, %v2926_v39 }
  0xd9   : > { %5647 = vmatmul.mubr.msk.bf16.gmra.mrb[16].mxu1 %vm463_vm2, %v942_v10  ;;  %v951_v10 = vrot.slane %v6786_v40, 1 }
  0xda   : > { %5650 = vmatprep.mubr.msk.bf16.mxu1 %vm463_vm2, %v944_v25  ;;  %v2909_v25 = vsel %vm2874_vm6, %v2899_v24, %v2908_v49 }
  0xdb   : > { %v952_v40 = vsel %vm921_vm5, %v949_v30, %v951_v10  ;;  %v957_v30 = vrot.slane %v6831_v27, 1 }
  0xdc   : > { %5815 = vmatmul.mubr.msk.bf16.gmra.mrb[32].mxu0 %vm463_vm2, %v2597_v33  ;;  %v953_v33 = vrot.slane %v6801_v56, 1 }
  0xdd   : > { %5820 = vmatprep.mubr.msk.bf16.mxu0 %vm463_vm2, %v2891_v63  ;;  %v955_v63 = vrot.slane %v6808_v4, 1  ;;  %v2956_v4 = vshrl.u32 %v7015_v8, 16 }
  0xde   : > { %v954_v24 = vsel %vm921_vm5, %v951_v10, %v953_v33  ;;  %v6378_v10 = vld [vmem:[%s6582_s9 + $0x10] sm:$0xff]  }
  0xdf   : > { %v956_v56 = vsel %vm921_vm5, %v953_v33, %v955_v63  ;;  %v2958_v45 = vrot.slane %v2956_v4, 2  ;;  %v2992_v4 = vshrl.u32 %v7057_v21, 16 }
  0xe1   : > { %5651 = vmatmul.mubr.msk.bf16.gmra.mrb[20].mxu1 %vm463_vm2, %v946_v48  ;;  %v2943_v48 = vrot.slane %v2941_v19, 3  ;;  %v2962_v44 = vor.u32 %v2961_v23, %v2958_v45  ;;  %v1364_v19 = vrot.slane %v6379_v29, 1  ;;  %v2994_v45 = vrot.slane %v2992_v4, 2 }
  0xe2   : > { %5654 = vmatprep.mubr.msk.bf16.mxu1 %vm463_vm2, %v948_v54  ;;  %v2935_v54 = vor.u32 %v2934_v51, %v2931_v61  ;;  %v2967_v61 = vrot.slane %v2965_v32, 2  ;;  %v2970_v51 = vrot.slane %v2968_v20, 3  ;;  %v2997_v23 = vrot.slane %v2995_v11, 3  ;;  %v6385_v11 = vld [vmem:[%s6582_s9 + $0x48] sm:$0xff]  }
  0xe3   : > { %v2944_v49 = vor.u32 %v2943_v48, %v2940_v17  ;;  %v3004_v32 = vshll.u32 %v7070_v36, 16  ;;  %v3031_v4 = vshll.u32 %v7092_v14, 16 }
  0xe4   : > { %5821 = vmatmul.mubr.msk.bf16.vlgmr.msra.gmra.mrb[0].mxu0 %vm463_vm2, %v2900_v42  ;;  %v2936_v6 = vsel %vm2874_vm6, %v2926_v39, %v2935_v54  ;;  %v2949_v42 = vrot.slane %v2947_v58, 2  ;;  %v2977_v39 = vshll.u32 %v7033_v52, 16  ;;  %v2983_v58 = vshrl.u32 %v7048_v5, 16 }
  0xe5   : > { %5857 = vmatpush3.bf16.msra.mxu0 %v3414_v0  ;;  %5824 = vmatprep.mubr.msk.bf16.mxu0 %vm463_vm2, %v2909_v25  ;;  %v1362_v0 = vrot.slane %v6378_v10, 1  ;;  %v2945_v25 = vsel %vm2874_vm6, %v2935_v54, %v2944_v49  ;;  %v2971_v54 = vor.u32 %v2970_v51, %v2967_v61  ;;  %v6382_v10 = vld [vmem:[%s6582_s9 + $0x30] sm:$0xff]   ;;  %v2998_v20 = vor.u32 %v2997_v23, %v2994_v45  ;;  %v6384_v51 = vld [vmem:[%s6582_s9 + $0x40] sm:$0xff]  }
  0xe6   : > { %v2953_v41 = vor.u32 %v2952_v37, %v2949_v42  ;;  %v2979_v48 = vrot.slane %v2977_v39, 3  ;;  %v2985_v37 = vrot.slane %v2983_v58, 2  ;;  %v6383_v39 = vld [vmem:[%s6582_s9 + $0x38] sm:$0xff]   ;;  %v3006_v61 = vrot.slane %v3004_v32, 3 }
  0xe7   : > { %v1363_v27 = vsel %vm921_vm5, %v1361_v18, %v1362_v0  ;;  %v2972_v42 = vsel %vm2874_vm6, %v2962_v44, %v2971_v54  ;;  %v2988_v18 = vrot.slane %v2986_v34, 3  ;;  %v1372_v29 = vrot.slane %v6383_v39, 1 }
  0xe8   : > { %v2954_v33 = vsel %vm2874_vm6, %v2944_v49, %v2953_v41  ;;  %v3022_v58 = vshll.u32 %v7088_v62, 16  ;;  %v3033_v23 = vrot.slane %v3031_v4, 3  ;;  %v3327_v4 = vrot.slane %v6955_v50, 3 }
  0xe9   : > { %5655 = vmatmul.mubr.msk.bf16.gmra.mrb[24].mxu1 %vm463_vm2, %v950_v35  ;;  %v958_v35 = vsel %vm921_vm5, %v955_v63, %v957_v30  ;;  %v3329_v50 = vrot.slane %v6967_v53, 3 }
  0xea   : > { %5658 = vmatprep.mubr.msk.bf16.mxu1 %vm463_vm2, %v952_v40  ;;  %v2974_v40 = vshrl.u32 %v7033_v52, 16 }
  0xec   : > { %5825 = vmatmul.mubr.msk.bf16.gmra.mrb[4].mxu0 %vm463_vm2, %v2918_v16  ;;  %v6380_v16 = vld [vmem:[%s6582_s9 + $0x20] sm:$0xff]   ;;  %v2976_v17 = vrot.slane %v2974_v40, 2  ;;  %v3013_v40 = vshll.u32 %v7075_v43, 16 }
  0xed   : > { %5828 = vmatprep.mubr.msk.bf16.mxu0 %vm463_vm2, %v2927_v9  ;;  %v1366_v63 = vrot.slane %v6380_v16, 1  ;;  %v2963_v9 = vsel %vm2874_vm6, %v2953_v41, %v2962_v44  ;;  %v2989_v41 = vor.u32 %v2988_v18, %v2985_v37  ;;  %v3010_v44 = vshrl.u32 %v7075_v43, 16  ;;  %v6386_v18 = vld [vmem:[%s6582_s9 + $0x50] sm:$0xff]  }
  0xee   : > { %v2980_v49 = vor.u32 %v2979_v48, %v2976_v17  ;;  %v1374_v16 = vrot.slane %v6384_v51, 1  ;;  %v3015_v17 = vrot.slane %v3013_v40, 3  ;;  %v3024_v37 = vrot.slane %v3022_v58, 3  ;;  %v6387_v40 = vld [vmem:[%s6582_s9 + $0x58] sm:$0xff]  }
  0xef   : > { %v1380_v39 = vrot.slane %v6387_v40, 1  ;;  %v1783_v40 = vshrl.u32 %v6877_v57, 16 }
  0xf1   : > { %5659 = vmatmul.mubr.msk.bf16.gmra.mrb[28].mxu1 %vm463_vm2, %v954_v24  ;;  %v1365_v24 = vsel %vm921_vm5, %v1362_v0, %v1364_v19  ;;  %v1370_v0 = vrot.slane %v6382_v10, 1  ;;  %v1378_v10 = vrot.slane %v6386_v18, 1  ;;  %v3331_v18 = vrot.slane %v6973_v28, 3 }
  0xf2   : > { %5662 = vmatprep.mubr.msk.bf16.mxu1 %vm463_vm2, %v956_v56  ;;  %v1367_v56 = vsel %vm921_vm5, %v1364_v19, %v1366_v63  ;;  %v2990_v19 = vsel %vm2874_vm6, %v2980_v49, %v2989_v41 }
  0xf3   : > { %v1373_v48 = vsel %vm921_vm5, %v1370_v0, %v1372_v29  ;;  %v3332_v53 = vsel %vm3321_vm7, %v3329_v50, %v3331_v18 }
  0xf4   : > { %5829 = vmatmul.mubr.msk.bf16.gmra.mrb[8].mxu0 %vm463_vm2, %v2936_v6  ;;  %v6381_v6 = vld [vmem:[%s6582_s9 + $0x28] sm:$0xff]  }
  0xf5   : > { %5832 = vmatprep.mubr.msk.bf16.mxu0 %vm463_vm2, %v2945_v25  ;;  %v1368_v30 = vrot.slane %v6381_v6, 1  ;;  %v2981_v25 = vsel %vm2874_vm6, %v2971_v54, %v2980_v49  ;;  %v1375_v54 = vsel %vm921_vm5, %v1372_v29, %v1374_v16  ;;  %v3028_v49 = vshrl.u32 %v7092_v14, 16 }
  0xf6   : > { %v1376_v6 = vrot.slane %v6385_v11, 1  ;;  %v1388_v11 = vrot.slane %v6895_v7, 1 }
  0xf7   : > { %v3030_v45 = vrot.slane %v3028_v49, 2 }
  0xf9   : > { %5663 = vmatmul.mubr.msk.bf16.gmra.mrb[32].mxu1 %vm463_vm2, %v958_v35  ;;  %v1369_v35 = vsel %vm921_vm5, %v1366_v63, %v1368_v30  ;;  %v2999_v63 = vsel %vm2874_vm6, %v2989_v41, %v2998_v20 }
  0xfa   : > { %5668 = vmatprep.mubr.msk.bf16.mxu1 %vm463_vm2, %v1363_v27  ;;  %v3001_v27 = vshrl.u32 %v7070_v36, 16 }
  0xfc   : > { %5833 = vmatmul.mubr.msk.bf16.gmra.mrb[12].mxu0 %vm463_vm2, %v2954_v33  ;;  %v3003_v33 = vrot.slane %v3001_v27, 2 }
  0xfd   : > { %5836 = vmatprep.mubr.msk.bf16.mxu0 %vm463_vm2, %v2963_v9  ;;  %v3012_v9 = vrot.slane %v3010_v44, 2  ;;  %v3315_v44 = vld [vmem:[%s6582_s9 + $0x10] sm:$0x8] }
  0xff   : > { %v3016_v34 = vor.u32 %v3015_v17, %v3012_v9 }
 0x101   : > { %5669 = vmatmul.mubr.msk.bf16.vlgmr.msra.gmra.mrb[0].mxu1 %vm463_vm2, %v1365_v24  ;;  %v3007_v24 = vor.u32 %v3006_v61, %v3003_v33  ;;  %v1382_v61 = vrot.slane %v6858_v55, 1 }
 0x102   : > { %5672 = vmatprep.mubr.msk.bf16.mxu1 %vm463_vm2, %v1367_v56  ;;  %5895 = vmatpush3.bf16.msra.mxu1 %v6566_v2  ;;  %v1371_v2 = vsel %vm921_vm5, %v1368_v30, %v1370_v0  ;;  %v3019_v56 = vshrl.u32 %v7088_v62, 16  ;;  %v7228_v0 = vld [vmem:[%s6582_s9 + $0xa0] ss:$0 sps:$4 sm:$0x77]  }
 0x103   : > { %v3008_v30 = vsel %vm2874_vm6, %v2998_v20, %v3007_v24  ;;  %v3037_v27 = vshrl.u32 %v7228_v0, 16  ;;  %v3040_v32 = vshll.u32 %v7228_v0, 16  ;;  %v3034_v20 = vor.u32 %v3033_v23, %v3030_v45 }
 0x104   : > { %5837 = vmatmul.mubr.msk.bf16.gmra.mrb[16].mxu0 %vm463_vm2, %v2972_v42  ;;  %v3021_v42 = vrot.slane %v3019_v56, 2  ;;  %v1383_v17 = vsel %vm921_vm5, %v1380_v39, %v1382_v61  ;;  %v1386_v56 = vrot.slane %v6883_v60, 1  ;;  %v1394_v45 = vrot.slane %v6915_v26, 1 }
 0x105   : > { %5840 = vmatprep.mubr.msk.bf16.mxu0 %vm463_vm2, %v2981_v25  ;;  %v3017_v25 = vsel %vm2874_vm6, %v3007_v24, %v3016_v34  ;;  %v3042_v33 = vrot.slane %v3040_v32, 3  ;;  %v3323_v24 = vrot.slane %v6938_v38, 3  ;;  %v3325_v38 = vrot.slane %v6951_v46, 3 }
 0x106   : > { %v3025_v41 = vor.u32 %v3024_v37, %v3021_v42  ;;  %v1389_v46 = vsel %vm921_vm5, %v1386_v56, %v1388_v11  ;;  %v1774_v23 = vshrl.u32 %v6858_v55, 16 }
 0x107   : > { %v3328_v42 = vsel %vm3321_vm7, %v3325_v38, %v3327_v4 }
 0x108   : > { %v3026_v29 = vsel %vm2874_vm6, %v3016_v34, %v3025_v41  ;;  %v3035_v51 = vsel %vm2874_vm6, %v3025_v41, %v3034_v20  ;;  %v6376_v41 = vld [vmem:[%s6582_s9 + $0x98] ss:$0 sps:$4 sm:$0x11]   ;;  %v1776_v32 = vrot.slane %v1774_v23, 1 }
 0x109   : > { %5673 = vmatmul.mubr.msk.bf16.gmra.mrb[4].mxu1 %vm463_vm2, %v1369_v35  ;;  %v1377_v35 = vsel %vm921_vm5, %v1374_v16, %v1376_v6  ;;  %v5178_v16 = vcombine.low %v3315_v44, %v6925_v31  ;;  %v3335_v44 = vrot.slane %v6996_v1, 3 }
 0x10a   : > { %5676 = vmatprep.mubr.msk.bf16.mxu1 %vm463_vm2, %v1371_v2  ;;  %v1379_v2 = vsel %vm921_vm5, %v1376_v6, %v1378_v10  ;;  %v3326_v6 = vsel %vm3321_vm7, %v3323_v24, %v3325_v38 }
 0x10c   : > { %5841 = vmatmul.mubr.msk.bf16.gmra.mrb[20].mxu0 %vm463_vm2, %v2990_v19  ;;  %v3039_v19 = vrot.slane %v3037_v27, 2 }
 0x10d   : > { %5844 = vmatprep.mubr.msk.bf16.mxu0 %vm463_vm2, %v2999_v63  ;;  %v1381_v63 = vsel %vm921_vm5, %v1378_v10, %v1380_v39  ;;  %v1392_v10 = vrot.slane %v6911_v22, 1  ;;  %v1786_v39 = vshll.u32 %v6877_v57, 16 }
 0x10e   : > { %v3043_v9 = vor.u32 %v3042_v33, %v3039_v19  ;;  %v1795_v33 = vshll.u32 %v6883_v60, 16 }
 0x10f   : > { %v1395_v27 = vsel %vm921_vm5, %v1392_v10, %v1394_v45 }
 0x110   : > { %v3044_v31 = vsel %vm2874_vm6, %v3034_v20, %v3043_v9 }
 0x111   : > { %5677 = vmatmul.mubr.msk.bf16.gmra.mrb[8].mxu1 %vm463_vm2, %v1373_v48  ;;  %v3322_v48 = vrot.slane %v5178_v16, 3  ;;  %v1788_v16 = vrot.slane %v1786_v39, 2 }
 0x112   : > { %5680 = vmatprep.mubr.msk.bf16.mxu1 %vm463_vm2, %v1375_v54  ;;  %v1384_v54 = vrot.slane %v6877_v57, 1 }
 0x113   : > { %v3324_v58 = vsel %vm3321_vm7, %v3322_v48, %v3323_v24  ;;  %v3339_v48 = vrot.slane %v7015_v8, 3  ;;  %v1801_v24 = vshrl.u32 %v6895_v7, 16 }
 0x114   : > { %5845 = vmatmul.mubr.msk.bf16.gmra.mrb[24].mxu0 %vm463_vm2, %v3008_v30  ;;  %v1385_v34 = vsel %vm921_vm5, %v1382_v61, %v1384_v54  ;;  %v1387_v49 = vsel %vm921_vm5, %v1384_v54, %v1386_v56  ;;  %v1390_v30 = vrot.slane %v6899_v12, 1  ;;  %v1804_v54 = vshll.u32 %v6895_v7, 16 }
 0x115   : > { %5848 = vmatprep.mubr.msk.bf16.mxu0 %vm463_vm2, %v3017_v25  ;;  %v3330_v25 = vsel %vm3321_vm7, %v3327_v4, %v3329_v50 }
 0x116   : > { %v1391_v37 = vsel %vm921_vm5, %v1388_v11, %v1390_v30  ;;  %v1393_v28 = vsel %vm921_vm5, %v1390_v30, %v1392_v10  ;;  %v1806_v38 = vrot.slane %v1804_v54, 2  ;;  %v1819_v30 = vshrl.u32 %v6911_v22, 16 }
 0x118   : > { %v1821_v10 = vrot.slane %v1819_v30, 1 }
 0x119   : > { %5681 = vmatmul.mubr.msk.bf16.gmra.mrb[12].mxu1 %vm463_vm2, %v1377_v35  ;;  %v1777_v35 = vshll.u32 %v6858_v55, 16  ;;  %v1396_v55 = vrot.slane %v6376_v41, 1  ;;  %v1840_v41 = vshll.u32 %v6931_v59, 16 }
 0x11a   : > { %5684 = vmatprep.mubr.msk.bf16.mxu1 %vm463_vm2, %v1379_v2  ;;  %v3333_v2 = vrot.slane %v6992_v3, 3  ;;  %v1792_v3 = vshrl.u32 %v6883_v60, 16 }
 0x11b   : > { %v1779_v20 = vrot.slane %v1777_v35, 2  ;;  %v1397_v1 = vsel %vm921_vm5, %v1394_v45, %v1396_v55  ;;  %v3345_v45 = vrot.slane %v7048_v5, 3 }
 0x11c   : > { %5849 = vmatmul.mubr.msk.bf16.gmra.mrb[28].mxu0 %vm463_vm2, %v3026_v29  ;;  %v3334_v29 = vsel %vm3321_vm7, %v3331_v18, %v3333_v2  ;;  %v3336_v61 = vsel %vm3321_vm7, %v3333_v2, %v3335_v44  ;;  %v1794_v9 = vrot.slane %v1792_v3, 1  ;;  %v3355_v3 = vrot.slane %v7092_v14, 3 }
 0x11d   : > { %5852 = vmatprep.mubr.msk.bf16.mxu0 %vm463_vm2, %v3035_v51  ;;  %v1780_v19 = vor.u32 %v1779_v20, %v1776_v32  ;;  %v1785_v51 = vrot.slane %v1783_v40, 1  ;;  %v3351_v40 = vrot.slane %v7075_v43, 3 }
 0x11f   : > { %v1781_v57 = vsel %vm1674_vm3, %v6772_v15, %v1780_v19  ;;  %v1789_v60 = vor.u32 %v1788_v16, %v1785_v51  ;;  %v1813_v15 = vshll.u32 %v6899_v12, 16  ;;  %v3809_v51 = vlaneseq }
 0x121   : > { %5685 = vmatmul.mubr.msk.bf16.gmra.mrb[16].mxu1 %vm463_vm2, %v1381_v63  ;;  %v3337_v63 = vrot.slane %v7010_v13, 3  ;;  %v1810_v13 = vshrl.u32 %v6899_v12, 16  ;;  %v1790_v8 = vsel %vm1674_vm3, %v1780_v19, %v1789_v60  ;;  %v1815_v11 = vrot.slane %v1813_v15, 2 }
 0x122   : > { %5688 = vmatprep.mubr.msk.bf16.mxu1 %vm463_vm2, %v1383_v17  ;;  %v1797_v17 = vrot.slane %v1795_v33, 2 }
 0x123   : > { %v1812_v4 = vrot.slane %v1810_v13, 1 }
 0x124   : > { %5853 = vmatmul.mubr.msk.bf16.gmra.mrb[32].mxu0 %vm463_vm2, %v3044_v31  ;;  %v3338_v31 = vsel %vm3321_vm7, %v3335_v44, %v3337_v63  ;;  %v1798_v56 = vor.u32 %v1797_v17, %v1794_v9  ;;  %v3349_v44 = vrot.slane %v7070_v36, 3  ;;  %v3353_v36 = vrot.slane %v7088_v62, 3 }
 0x125   : > { %5858 = vmatprep.mubr.msk.bf16.mxu0 %vm463_vm2, %v3324_v58  ;;  %v3340_v58 = vsel %vm3321_vm7, %v3337_v63, %v3339_v48  ;;  %v1816_v50 = vor.u32 %v1815_v11, %v1812_v4  ;;  %v7361_v62 = vshrl.u32 %v3809_v51, 7 }
 0x126   : > { %v1799_v7 = vsel %vm1674_vm3, %v1789_v60, %v1798_v56  ;;  %v3354_v43 = vsel %vm3321_vm7, %v3351_v40, %v3353_v36  ;;  %v3356_v33 = vsel %vm3321_vm7, %v3353_v36, %v3355_v3 }
 0x127   : > { %v3812_v14 = vadd.s32 16, %v7361_v62  ;;  %v3813_v16 = vadd.s32 24, %v7361_v62  ;;  %v3811_v9 = vadd.s32 8, %v7361_v62  ;;  %v3814_v13 = vadd.s32 32, %v7361_v62 }
 0x129   : > { %5689 = vmatmul.mubr.msk.bf16.gmra.mrb[20].mxu1 %vm463_vm2, %v1385_v34  ;;  %v1803_v34 = vrot.slane %v1801_v24, 1  ;;  %v7376_v24 = vmul.u32.u64.low 3817748708, %v3811_v9  ;;  %v7377_v54 = vmul.u32.u64.high 3817748708, %v3811_v9, %v7376_v24 }
 0x12a   : > { %5692 = vmatprep.mubr.msk.bf16.mxu1 %vm463_vm2, %v1387_v49  ;;  %v3341_v49 = vrot.slane %v7028_v47, 3  ;;  %v1828_v47 = vshrl.u32 %v6915_v26, 16  ;;  %v7391_v4 = vmul.u32.u64.low 3817748708, %v3814_v13  ;;  %v7392_v11 = vmul.u32.u64.high 3817748708, %v3814_v13, %v7391_v4 }
 0x12b   : > { %v1807_v12 = vor.u32 %v1806_v38, %v1803_v34 }
 0x12c   : > { %5859 = vmatmul.mubr.msk.bf16.vlgmr.msra.gmra.mrb[0].mxu0 %vm463_vm2, %v3326_v6  ;;  %v3343_v6 = vrot.slane %v7033_v52, 3  ;;  %v1830_v23 = vrot.slane %v1828_v47, 1 }
 0x12d   : > { %5862 = vmatprep.mubr.msk.bf16.mxu0 %vm463_vm2, %v3328_v42  ;;  %v1822_v42 = vshll.u32 %v6911_v22, 16  ;;  %v1808_v52 = vsel %vm1674_vm3, %v1798_v56, %v1807_v12  ;;  %v1817_v22 = vsel %vm1674_vm3, %v1807_v12, %v1816_v50 }
 0x12e   : > { %v3344_v18 = vsel %vm3321_vm7, %v3341_v49, %v3343_v6  ;;  %v3346_v2 = vsel %vm3321_vm7, %v3343_v6, %v3345_v45  ;;  %v7395_v6 = vadd.s32 40, %v7361_v62 }
 0x131   : > { %5693 = vmatmul.mubr.msk.bf16.gmra.mrb[24].mxu1 %vm463_vm2, %v1389_v46  ;;  %v3342_v46 = vsel %vm3321_vm7, %v3339_v48, %v3341_v49  ;;  %v7370_v17 = vmul.u32.u64.low 3817748708, %v7361_v62  ;;  %v7371_v48 = vmul.u32.u64.high 3817748708, %v7361_v62, %v7370_v17 }
 0x132   : > { %5696 = vmatprep.mubr.msk.bf16.mxu1 %vm463_vm2, %v1391_v37  ;;  %v1831_v37 = vshll.u32 %v6915_v26, 16 }
 0x133   : > { %v3852_v15 = vshrl.u32 %v7371_v48, 4 }
 0x134   : > { %5863 = vmatmul.mubr.msk.bf16.gmra.mrb[4].mxu0 %vm463_vm2, %v3330_v25  ;;  %v1824_v25 = vrot.slane %v1822_v42, 2  ;;  %v1833_v35 = vrot.slane %v1831_v37, 2 }
 0x135   : > { %5866 = vmatprep.mubr.msk.bf16.mxu0 %vm463_vm2, %v3332_v53  ;;  %v3347_v53 = vrot.slane %v7057_v21, 3  ;;  %v1842_v21 = vrot.slane %v1840_v41, 2  ;;  %v3853_v12 = vmul.u32 18, %v3852_v15 }
 0x136   : > { %v1825_v26 = vor.u32 %v1824_v25, %v1821_v10 }
 0x137   : > { %v3348_v5 = vsel %vm3321_vm7, %v3345_v45, %v3347_v53  ;;  %v3350_v39 = vsel %vm3321_vm7, %v3347_v53, %v3349_v44  ;;  %v7411_v10 = vsub.s32 %v7361_v62, %v3853_v12 }
 0x138   : > { %v1826_v32 = vsel %vm1674_vm3, %v1816_v50, %v1825_v26 }
 0x139   : > { %5697 = vmatmul.mubr.msk.bf16.gmra.mrb[28].mxu1 %vm463_vm2, %v1393_v28  ;;  %v1837_v28 = vshrl.u32 %v6931_v59, 16  ;;  %vm4242_vm10 = vcmp.ne.s32.totalorder %v7411_v10, 0  ;;  %vm4278_vm11 = vcmp.lt.s32.totalorder %v7411_v10, 0 }
 0x13a   : > { %5700 = vmatprep.mubr.msk.bf16.mxu1 %vm463_vm2, %v1395_v27  ;;  %v1834_v27 = vor.u32 %v1833_v35, %v1830_v23  ;;  %v3896_v35 = vshrl.u32 %v7392_v11, 4  ;;  %vm7463_vm1 = vmand %vm4278_vm11, %vm4242_vm10 }
 0x13b   : > { %v1839_v20 = vrot.slane %v1837_v28, 1 }
 0x13c   : > { %5867 = vmatmul.mubr.msk.bf16.gmra.mrb[8].mxu0 %vm463_vm2, %v3334_v29  ;;  %v1835_v55 = vsel %vm1674_vm3, %v1825_v26, %v1834_v27  ;;  %v3352_v29 = vsel %vm3321_vm7, %v3349_v44, %v3351_v40  ;;  %v3897_v40 = vmul.u32 18, %v3896_v35 }
 0x13d   : > { %5870 = vmatprep.mubr.msk.bf16.mxu0 %vm463_vm2, %v3336_v61  ;;  %v1843_v59 = vor.u32 %v1842_v21, %v1839_v20  ;;  %v3357_v61 = vrot.slane %v7228_v0, 3  ;;  %v7373_v0 = vmul.u32.u64.low 3817748708, %v3813_v16  ;;  %v7374_v60 = vmul.u32.u64.high 3817748708, %v3813_v16, %v7373_v0 }
 0x13e   : > { %v7446_v21 = vadd.s32 18, %v7411_v10 }
 0x13f   : > { %v1844_v19 = vsel %vm1674_vm3, %v1834_v27, %v1843_v59  ;;  %v7461_v59 = vadd.s32 72, %v7361_v62 }
 0x141   : > { %5701 = vmatmul.mubr.msk.bf16.gmra.mrb[32].mxu1 %vm463_vm2, %v1397_v1  ;;  %v3358_v1 = vsel %vm3321_vm7, %v3355_v3, %v3357_v61 }
 0x142   : > { %5726 = vmatprep.mubr.msk.bf16.mxu1 %vm463_vm2, %v1781_v57  ;;  %v7365_v63 = vmul.u32.u64.low 3817748708, %v3812_v14  ;;  %v7366_v57 = vmul.u32.u64.high 3817748708, %v3812_v14, %v7365_v63 }
 0x144   : > { %5871 = vmatmul.mubr.msk.bf16.gmra.mrb[12].mxu0 %vm463_vm2, %v3338_v31  ;;  %v3816_v31 = vadd.s32 48, %v7361_v62  ;;  %v3874_v56 = vshrl.u32 %v7366_v57, 4  ;;  %v7494_v57 = vsub.s32 %v3814_v13, %v3897_v40 }
 0x145   : > { %5874 = vmatprep.mubr.msk.bf16.mxu0 %vm463_vm2, %v3340_v58  ;;  %v7384_v58 = vadd.s32 56, %v7361_v62 }
 0x146   : > { %v7387_v34 = vmul.u32.u64.low 3817748708, %v3816_v31  ;;  %v7388_v38 = vmul.u32.u64.high 3817748708, %v3816_v31, %v7387_v34  ;;  %v3875_v49 = vmul.u32 18, %v3874_v56  ;;  %vm4246_vm6 = vcmp.ne.s32.totalorder %v7494_v57, 0 }
 0x147   : > { %v7398_v30 = vmul.u32.u64.low 3817748708, %v7384_v58  ;;  %v7399_v42 = vmul.u32.u64.high 3817748708, %v7384_v58, %v7398_v30  ;;  %v7529_v34 = vadd.s32 112, %v7361_v62  ;;  %vm4282_vm7 = vcmp.lt.s32.totalorder %v7494_v57, 0 }
 0x148   : > { %v7401_v50 = vsub.s32 %v3812_v14, %v3875_v49  ;;  %v3918_v45 = vshrl.u32 %v7388_v38, 4  ;;  %v7532_v38 = vadd.s32 96, %v7361_v62  ;;  %vm7573_vm11 = vmand %vm4282_vm7, %vm4246_vm6 }
 0x149   : > { %5727 = vmatmul.mubr.msk.bf16.vlgmr.msra.gmra.mrb[20].mxu1 %vm463_vm2, %v1790_v8  ;;  %v3885_v8 = vshrl.u32 %v7374_v60, 4 }
 0x14a   : > { %5730 = vmatprep.mubr.msk.bf16.mxu1 %vm463_vm2, %v1799_v7  ;;  %v3863_v7 = vshrl.u32 %v7377_v54, 4  ;;  %vm4244_vm8 = vcmp.ne.s32.totalorder %v7401_v50, 0  ;;  %vm4280_vm9 = vcmp.lt.s32.totalorder %v7401_v50, 0  ;;  %v7426_v26 = vadd.s32 18, %v7401_v50 }
 0x14b   : > { %v3919_v44 = vmul.u32 18, %v3918_v45  ;;  %vm7454_vm14 = vmand %vm4280_vm9, %vm4244_vm8 }
 0x14c   : > { %5875 = vmatmul.mubr.msk.bf16.gmra.mrb[16].mxu0 %vm463_vm2, %v3342_v46  ;;  %v3886_v46 = vmul.u32 18, %v3885_v8  ;;  %v3864_v47 = vmul.u32 18, %v3863_v7  ;;  %v7543_v7 = vadd.s32 18, %v7494_v57 }
 0x14d   : > { %5878 = vmatprep.mubr.msk.bf16.mxu0 %vm463_vm2, %v3344_v18  ;;  %v7404_v37 = vmul.u32.u64.low 3817748708, %v7395_v6  ;;  %v7405_v18 = vmul.u32.u64.high 3817748708, %v7395_v6, %v7404_v37 }
 0x14e   : > { %v7413_v25 = vsub.s32 %v3813_v16, %v3886_v46  ;;  %v7420_v23 = vsub.s32 %v3811_v9, %v3864_v47  ;;  %v7490_v16 = vsub.s32 %v3816_v31, %v3919_v44  ;;  %v7557_v46 = vadd.s32 104, %v7361_v62 }
 0x14f   : > { %v7497_v9 = vmul.u32.u64.low 3817748708, %v7461_v59  ;;  %v7498_v17 = vmul.u32.u64.high 3817748708, %v7461_v59, %v7497_v9  ;;  %v7583_v44 = vadd.s32 144, %v7361_v62 }
 0x150   : > { %vm4245_vm12 = vcmp.ne.s32.totalorder %v7413_v25, 0  ;;  %vm4281_vm13 = vcmp.lt.s32.totalorder %v7413_v25, 0  ;;  %vm4243_vm15 = vcmp.ne.s32.totalorder %v7420_v23, 0  ;;  %vm4279_vm0 = vcmp.lt.s32.totalorder %v7420_v23, 0  ;;  %9267 = vst [vmem:[#allocation8_spill] sm:$0xff] %v7490_v16 }
 0x151   : > { %5731 = vmatmul.mubr.msk.bf16.gmra.mrb[24].mxu1 %vm463_vm2, %v1808_v52  ;;  %v7408_v52 = vadd.s32 80, %v7361_v62  ;;  %vm7486_vm3 = vmand %vm4279_vm0, %vm4243_vm15  ;;  %vm4248_vm4 = vcmp.ne.s32.totalorder %v7490_v16, 0  ;;  %vm4284_vm5 = vcmp.lt.s32.totalorder %v7490_v16, 0  ;;  %v7535_v49 = vadd.s32 18, %v7490_v16 }
 0x152   : > { %5734 = vmatprep.mubr.msk.bf16.mxu1 %vm463_vm2, %v1817_v22  ;;  %vm7549_vm8 = vmand %vm4284_vm5, %vm4248_vm4 }
 0x153   : > { %v7429_v28 = vmul.u32.u64.low 3817748708, %v7408_v52  ;;  %v7430_v41 = vmul.u32.u64.high 3817748708, %v7408_v52, %v7429_v28  ;;  %9273 = vst [vmem:[#allocation14_spill] sm:$0xff] %v7535_v49 }
 0x154   : > { %5879 = vmatmul.mubr.msk.bf16.gmra.mrb[20].mxu0 %vm463_vm2, %v3346_v2  ;;  %v7433_v2 = vadd.s32 64, %v7361_v62  ;;  %v3951_v28 = vshrl.u32 %v7498_v17, 4  ;;  %v7600_v9 = vmul.u32.u64.low 3817748708, %v7557_v46  ;;  %v7601_v17 = vmul.u32.u64.high 3817748708, %v7557_v46, %v7600_v9 }
 0x155   : > { %5882 = vmatprep.mubr.msk.bf16.mxu0 %vm463_vm2, %v3348_v5  ;;  %v3929_v5 = vshrl.u32 %v7399_v42, 4  ;;  %v3962_v24 = vshrl.u32 %v7430_v41, 4 }
 0x156   : > { %v7472_v36 = vmul.u32.u64.low 3817748708, %v7433_v2  ;;  %v7473_v3 = vmul.u32.u64.high 3817748708, %v7433_v2, %v7472_v36 }
 0x157   : > { %v3930_v61 = vmul.u32 18, %v3929_v5  ;;  %v3963_v11 = vmul.u32 18, %v3962_v24 }
 0x158   : > { %v3940_v12 = vshrl.u32 %v7473_v3, 4 }
 0x159   : > { %5735 = vmatmul.mubr.msk.bf16.gmra.mrb[28].mxu1 %vm463_vm2, %v1826_v32  ;;  %v7441_v32 = vadd.s32 88, %v7361_v62  ;;  %v7522_v15 = vsub.s32 %v7384_v58, %v3930_v61  ;;  %v7540_v58 = vadd.s32 120, %v7361_v62  ;;  %v7595_v61 = vadd.s32 128, %v7361_v62 }
 0x15a   : > { %5738 = vmatprep.mubr.msk.bf16.mxu1 %vm463_vm2, %v1835_v55  ;;  %v3941_v3 = vmul.u32 18, %v3940_v12  ;;  %v9339_v55 = vmov 0 }
 0x15b   : > { %9271 = vst [vmem:[#allocation12_spill] sm:$0xff] %v7522_v15  ;;  %vm4249_vm9 = vcmp.ne.s32.totalorder %v7522_v15, 0  ;;  %vm4285_vm10 = vcmp.lt.s32.totalorder %v7522_v15, 0  ;;  %v7579_v41 = vmul.u32.u64.low 3817748708, %v7540_v58  ;;  %v7580_v5 = vmul.u32.u64.high 3817748708, %v7540_v58, %v7579_v41 }
 0x15c   : > { %5883 = vmatmul.mubr.msk.bf16.gmra.mrb[24].mxu0 %vm463_vm2, %v3350_v39  ;;  %v7592_v36 = vadd.s32 18, %v7522_v15  ;;  %v7626_v41 = vmul.u32.u64.low 3817748708, %v7583_v44  ;;  %v7627_v9 = vmul.u32.u64.high 3817748708, %v7583_v44, %v7626_v41  ;;  %v7636_v56 = vsub.s32 %v7433_v2, %v3941_v3 }
 0x15d   : > { %5886 = vmatprep.mubr.msk.bf16.mxu0 %vm463_vm2, %v3352_v29  ;;  %v7468_v29 = vadd.s32 18, %v7413_v25  ;;  %v7639_v0 = vmul.u32.u64.low 3817748708, %v7595_v61  ;;  %v7640_v13 = vmul.u32.u64.high 3817748708, %v7595_v61, %v7639_v0 }
 0x15e   : > { %9280 = vst [vmem:[#allocation17_spill] sm:$0xff] %v7592_v36  ;;  %vm4250_vm6 = vcmp.ne.s32.totalorder %v7636_v56, 0  ;;  %vm4286_vm7 = vcmp.lt.s32.totalorder %v7636_v56, 0 }
 0x161   : > { %5739 = vmatmul.mubr.msk.bf16.gmra.mrb[32].mxu1 %vm463_vm2, %v1844_v19  ;;  %v3907_v19 = vshrl.u32 %v7405_v18, 4  ;;  %v7564_v37 = vmul.u32.u64.low 3817748708, %v7532_v38  ;;  %v7565_v18 = vmul.u32.u64.high 3817748708, %v7532_v38, %v7564_v37 }
 0x162   : > { %v3952_v37 = vmul.u32 18, %v3951_v28 }
 0x163   : > { %v3908_v60 = vmul.u32 18, %v3907_v19  ;;  %v7630_v19 = vadd.s32 136, %v7361_v62  ;;  %v3984_v3 = vshrl.u32 %v7565_v18, 4 }
 0x164   : > { %5887 = vmatmul.mubr.msk.bf16.gmra.mrb[28].mxu0 %vm463_vm2, %v3354_v43  ;;  %v7664_v31 = vsub.s32 %v7461_v59, %v3952_v37  ;;  %v7682_v59 = vadd.s32 176, %v7361_v62  ;;  %v7688_v37 = vadd.s32 18, %v7636_v56 }
 0x165   : > { %5890 = vmatprep.mubr.msk.bf16.mxu0 %vm463_vm2, %v3356_v33  ;;  %v7480_v33 = vadd.s32 18, %v7420_v23  ;;  %v7546_v4 = vsub.s32 %v7395_v6, %v3908_v60  ;;  %v7560_v47 = vmul.u32.u64.low 3817748708, %v7529_v34  ;;  %v7561_v6 = vmul.u32.u64.high 3817748708, %v7529_v34, %v7560_v47 }
 0x166   : > { %v7604_v60 = vadd.s32 152, %v7361_v62  ;;  %v7623_v47 = vsub.s32 %v7408_v52, %v3963_v11 }
 0x167   : > { %vm4283_vm15 = vcmp.lt.s32.totalorder %v7546_v4, 0  ;;  %v7633_v12 = vadd.s32 18, %v7546_v4  ;;  %v4006_v0 = vshrl.u32 %v7561_v6, 4 }
 0x168   : > { %v7654_v41 = vmul.u32.u64.low 3817748708, %v7604_v60  ;;  %v7655_v2 = vmul.u32.u64.high 3817748708, %v7604_v60, %v7654_v41  ;;  %vm4252_vm4 = vcmp.ne.s32.totalorder %v7623_v47, 0  ;;  %vm4288_vm5 = vcmp.lt.s32.totalorder %v7623_v47, 0 }
 0x169   : > { %v7678_v18 = vadd.s32 18, %v7623_v47 }
 0x16c   : > { %5891 = vmatmul.mubr.msk.bf16.gmra.mrb[32].mxu0 %vm463_vm2, %v3358_v1  ;;  %vm7475_vm2 = vmand %vm4281_vm13, %vm4245_vm12  ;;  %v7483_v1 = vmul.u32.u64.low 3817748708, %v7441_v32  ;;  %v7484_v51 = vmul.u32.u64.high 3817748708, %v7441_v32, %v7483_v1  ;;  %vm4247_vm13 = vcmp.ne.s32.totalorder %v7546_v4, 0 }
 0x16d   : > { %vm7616_vm12 = vmand %vm4285_vm10, %vm4249_vm9  ;;  %vm4287_vm9 = vcmp.lt.s32.totalorder %v7664_v31, 0 }
 0x16e   : > { %v3973_v42 = vshrl.u32 %v7484_v51, 4  ;;  %vm7646_vm0 = vmand %vm4283_vm15, %vm4247_vm13  ;;  %vm4251_vm15 = vcmp.ne.s32.totalorder %v7664_v31, 0 }
 0x16f   : > { %vm7702_vm13 = vmand %vm4288_vm5, %vm4252_vm4 }
 0x170   : > { %v3974_v51 = vmul.u32 18, %v3973_v42  ;;  %v9283_v42 = vmov 0 }
 0x171   : > { %v9284_v42 = vsel %vm7616_vm12, 4294967295, %v9283_v42  ;;  %vm7713_vm12 = vmand %vm4286_vm7, %vm4250_vm6 }
 0x172   : > { %9285 = vst [vmem:[#allocation20_spill] sm:$0xff] %v9284_v42  ;;  %v7651_v28 = vsub.s32 %v7441_v32, %v3974_v51  ;;  %v4017_v32 = vshrl.u32 %v7580_v5, 4  ;;  %vm7738_vm6 = vmand %vm4287_vm9, %vm4251_vm15 }
 0x174   : > { %9288 = vst [vmem:[#allocation21_spill] sm:$0xff] %v7651_v28  ;;  %vm4289_vm10 = vcmp.lt.s32.totalorder %v7651_v28, 0  ;;  %vm9298_vm4 = vcmp.ne.s32.totalorder %v7651_v28, 0 }
 0x175   : > { %vm7727_vm5 = vmand %vm4289_vm10, %vm9298_vm4 }
 0x1d4   : > { %v7416_v22 = vpop.f32.mrb[0].mxu1 }
 0x1d5   : > { %v7423_v53 = vpop.f32.mrb[1].mxu1 }
 0x1d6   : > { %v7435_v27 = vpop.f32.mrb[2].mxu1 }
 0x1d7   : > { %v7443_v20 = vpop.f32.mrb[3].mxu1 }
 0x1dc   : > { %v7492_v63 = vpop.f32.mrb[4].mxu1 }
 0x1dd   : > { %9268 = vst [vmem:[#allocation9_spill] sm:$0xff] %v7492_v63  ;;  %v7500_v48 = vpop.f32.mrb[5].mxu1 }
 0x1de   : > { %9269 = vst [vmem:[#allocation10_spill] sm:$0xff] %v7500_v48  ;;  %v7507_v54 = vpop.f32.mrb[6].mxu1  ;;  %v4061_v48 = vshrl.u32 %v7655_v2, 4 }
 0x1df   : > { %9270 = vst [vmem:[#allocation11_spill] sm:$0xff] %v7507_v54  ;;  %v7524_v8 = vpop.f32.mrb[7].mxu1  ;;  %v7735_v54 = vadd.s32 18, %v7664_v31 }
 0x1e0   : > { %9272 = vst [vmem:[#allocation13_spill] sm:$0xff] %v7524_v8  ;;  %v7723_v8 = vadd.s32 184, %v7361_v62 }
 0x1e4   : > { %v7567_v45 = vpop.f32.mrb[8].mxu1 }
 0x1e5   : > { %9276 = vst [vmem:[#allocation15_spill] sm:$0xff] %v7567_v45  ;;  %v7585_v40 = vpop.f32.mrb[9].mxu1 }
 0x1e6   : > { %9279 = vst [vmem:[#allocation16_spill] sm:$0xff] %v7585_v40  ;;  %v7597_v1 = vpop.f32.mrb[10].mxu1  ;;  %v7719_v40 = vmul.u32.u64.low 3817748708, %v7682_v59  ;;  %v7720_v45 = vmul.u32.u64.high 3817748708, %v7682_v59, %v7719_v40 }
 0x1e7   : > { %9281 = vst [vmem:[#allocation18_spill] sm:$0xff] %v7597_v1  ;;  %v7606_v24 = vpop.f32.mrb[11].mxu1  ;;  %v7696_v1 = vadd.s32 160, %v7361_v62  ;;  %v9303_v40 = vmov 0 }
 0x1e8   : > { %9282 = vst [vmem:[#allocation19_spill] sm:$0xff] %v7606_v24  ;;  %v7668_v51 = vmul.u32.u64.low 3817748708, %v7630_v19  ;;  %v7669_v24 = vmul.u32.u64.high 3817748708, %v7630_v19, %v7668_v51  ;;  %v9304_v40 = vsel %vm7738_vm6, 4294967295, %v9303_v40  ;;  %v4094_v2 = vshrl.u32 %v7720_v45, 4 }
 0x1e9   : > { %v3995_v51 = vshrl.u32 %v7601_v17, 4  ;;  %v4018_v17 = vmul.u32 18, %v4017_v32  ;;  %v7732_v32 = vadd.s32 18, %v7651_v28 }
 0x1ea   : > { %v7749_v36 = vmul.u32.u64.low 3817748708, %v7696_v1  ;;  %v7750_v42 = vmul.u32.u64.high 3817748708, %v7696_v1, %v7749_v36 }
 0x1eb   : > { %9302 = vst [vmem:[#allocation28_spill] sm:$0xff] %v7732_v32 }
 0x1ec   : > { %v7661_v52 = vpop.f32.mrb[12].mxu1 }
 0x1ed   : > { %9289 = vst [vmem:[#allocation22_spill] sm:$0xff] %v7661_v52  ;;  %v7671_v41 = vpop.f32.mrb[13].mxu1  ;;  %v3985_v52 = vmul.u32 18, %v3984_v3  ;;  %v4028_v3 = vshrl.u32 %v7640_v13, 4  ;;  %v3996_v13 = vmul.u32 18, %v3995_v51  ;;  %v7766_v51 = vsub.s32 %v7540_v58, %v4018_v17 }
 0x1ee   : > { %9290 = vst [vmem:[#allocation23_spill] sm:$0xff] %v7671_v41  ;;  %v7684_v5 = vpop.f32.mrb[14].mxu1  ;;  %v4007_v41 = vmul.u32 18, %v4006_v0  ;;  %v9296_v0 = vmov 0 }
 0x1ef   : > { %9291 = vst [vmem:[#allocation24_spill] sm:$0xff] %v7684_v5  ;;  %v7692_v6 = vpop.f32.mrb[15].mxu1  ;;  %v9293_v5 = vmov 0  ;;  %v9297_v0 = vsel %vm7713_vm12, 4294967295, %v9296_v0  ;;  %v7746_v15 = vsub.s32 %v7532_v38, %v3985_v52  ;;  %v4039_v38 = vshrl.u32 %v7669_v24, 4 }
 0x1f0   : > { %9292 = vst [vmem:[#allocation25_spill] sm:$0xff] %v7692_v6  ;;  %v9294_v5 = vsel %vm7702_vm13, 4294967295, %v9293_v5  ;;  %v4050_v6 = vshrl.u32 %v7627_v9, 4  ;;  %v9299_v9 = vmov 0  ;;  %v7743_v63 = vsub.s32 %v7529_v34, %v4007_v41 }
 0x1f1   : > { %9295 = vst [vmem:[#allocation26_spill] sm:$0xff] %v9294_v5  ;;  %v9300_v9 = vsel %vm7727_vm5, 4294967295, %v9299_v9  ;;  %v4029_v36 = vmul.u32 18, %v4028_v3  ;;  %v7783_v58 = vsub.s32 %v7557_v46, %v3996_v13  ;;  %v7795_v3 = vadd.s32 18, %v7746_v15 }
 0x1f2   : > { %9301 = vst [vmem:[#allocation27_spill] sm:$0xff] %v9300_v9  ;;  %v4051_v41 = vmul.u32 18, %v4050_v6  ;;  %v4062_v6 = vmul.u32 18, %v4061_v48  ;;  %vm4292_vm9 = vcmp.lt.s32.totalorder %v7743_v63, 0  ;;  %v7807_v24 = vadd.s32 18, %v7766_v51 }
 0x1f3   : > { %v4040_v48 = vmul.u32 18, %v4039_v38  ;;  %v7803_v13 = vsub.s32 %v7595_v61, %v4029_v36  ;;  %vm9310_vm4 = vcmp.ne.s32.totalorder %v7743_v63, 0  ;;  %v7826_v45 = vadd.s32 18, %v7783_v58 }
 0x1f4   : > { %v7752_v16 = vpop.f32.mrb[16].mxu1  ;;  %v7798_v46 = vsub.s32 %v7583_v44, %v4051_v41  ;;  %v7811_v34 = vsub.s32 %v7604_v60, %v4062_v6  ;;  %v7814_v44 = vadd.s32 168, %v7361_v62  ;;  %vm7820_vm7 = vmand %vm4292_vm9, %vm9310_vm4  ;;  %v4072_v60 = vshrl.u32 %v7750_v42, 4 }
 0x1f5   : > { %9305 = vst [vmem:[#allocation29_spill] sm:$0xff] %v7752_v16  ;;  %v7763_v52 = vpop.f32.mrb[17].mxu1  ;;  %v7769_v16 = vmul.u32.u64.low 3817748708, %v7723_v8  ;;  %v7770_v49 = vmul.u32.u64.high 3817748708, %v7723_v8, %v7769_v16  ;;  %v7830_v41 = vadd.s32 208, %v7361_v62  ;;  %v9314_v38 = vsel %vm7463_vm1, %v7446_v21, %v7411_v10 }
 0x1f6   : > { %9306 = vst [vmem:[#allocation30_spill] sm:$0xff] %v7763_v52  ;;  %v7772_v5 = vpop.f32.mrb[18].mxu1  ;;  %v7790_v16 = vadd.s32 18, %v7743_v63  ;;  %9309 = vst [vmem:[#allocation33_spill] sm:$0xff] %v7814_v44  ;;  %vm7837_vm9 = vcmp.lt.s32.totalorder %v9314_v38, 16  ;;  %v9315_v36 = vmov 0  ;;  %v9318_v6 = vsel %vm7486_vm3, %v7480_v33, %v7420_v23 }
 0x1f7   : > { %9307 = vst [vmem:[#allocation31_spill] sm:$0xff] %v7772_v5  ;;  %v7785_v17 = vpop.f32.mrb[19].mxu1  ;;  %9313 = vst [vmem:[#allocation34_spill] sm:$0xff] %v7830_v41  ;;  %v9316_v36 = vsel %vm7837_vm9, 4294967295, %v9315_v36  ;;  %vm7846_vm4 = vcmp.lt.s32.totalorder %v9318_v6, 16  ;;  %vm9322_vm10 = vcmp.ne.s32.totalorder %v7746_v15, 0  ;;  %v7861_v10 = vsub.s32 %v7630_v19, %v4040_v48 }
 0x1f8   : > { %9308 = vst [vmem:[#allocation32_spill] sm:$0xff] %v7785_v17  ;;  %9317 = vst [vmem:[#allocation35_spill] sm:$0xff] %v9316_v36  ;;  %v9319_v17 = vmov 0  ;;  %vm9323_vm15 = vcmp.lt.s32.totalorder %v7746_v15, 0  ;;  %vm4296_vm13 = vcmp.lt.s32.totalorder %v7798_v46, 0  ;;  %v7864_v23 = vadd.s32 192, %v7361_v62 }
 0x1f9   : > { %v9320_v17 = vsel %vm7846_vm4, 4294967295, %v9319_v17  ;;  %vm7854_vm5 = vmand %vm9323_vm15, %vm9322_vm10  ;;  %vm9326_vm3 = vcmp.ne.s32.totalorder %v7766_v51, 0  ;;  %vm9327_vm6 = vcmp.lt.s32.totalorder %v7766_v51, 0  ;;  %v4095_v33 = vmul.u32 18, %v4094_v2 }
 0x1fa   : > { %9321 = vst [vmem:[#allocation36_spill] sm:$0xff] %v9320_v17  ;;  %vm7870_vm12 = vmand %vm9327_vm6, %vm9326_vm3  ;;  %v4105_v14 = vshrl.u32 %v7770_v49, 4  ;;  %v9330_v19 = vsel %vm7454_vm14, %v7426_v26, %v7401_v50  ;;  %v9331_v42 = vmov 0  ;;  %vm9334_vm6 = vcmp.ne.s32.totalorder %v7783_v58, 0 }
 0x1fb   : > { %vm7882_vm1 = vcmp.lt.s32.totalorder %v9330_v19, 16  ;;  %vm9335_vm3 = vcmp.lt.s32.totalorder %v7783_v58, 0  ;;  %vm4297_vm4 = vcmp.lt.s32.totalorder %v7811_v34, 0  ;;  %vm9338_vm14 = vcmp.ne.s32.totalorder %v7798_v46, 0 }
 0x1fc   : > { %v9332_v42 = vsel %vm7882_vm1, 4294967295, %v9331_v42  ;;  %vm7893_vm15 = vmand %vm9335_vm3, %vm9334_vm6  ;;  %v7900_v50 = vmul.u32.u64.low 3817748708, %v7814_v44  ;;  %v7901_v26 = vmul.u32.u64.high 3817748708, %v7814_v44, %v7900_v50  ;;  %v7910_v49 = vadd.s32 18, %v7798_v46 }
 0x1fd   : > { %9333 = vst [vmem:[#allocation37_spill] sm:$0xff] %v9332_v42  ;;  %vm7905_vm1 = vmand %vm4296_vm13, %vm9338_vm14  ;;  %v7913_v48 = vadd.s32 18, %v7803_v13  ;;  %v7916_v38 = vadd.s32 18, %v7811_v34  ;;  %v4073_v6 = vmul.u32 18, %v4072_v60  ;;  %v9341_v19 = vsel %vm7475_vm2, %v7468_v29, %v7413_v25 }
 0x1fe   : > { %v9340_v55 = vsel %vm7905_vm1, 4294967295, %v9339_v55  ;;  %vm7923_vm6 = vcmp.lt.s32.totalorder %v9341_v19, 16  ;;  %v9342_v50 = vmov 0  ;;  %vm9345_vm13 = vcmp.ne.s32.totalorder %v7803_v13, 0 }
 0x1ff   : > { %v9343_v50 = vsel %vm7923_vm6, 4294967295, %v9342_v50  ;;  %vm9346_vm3 = vcmp.lt.s32.totalorder %v7803_v13, 0  ;;  %vm4259_vm10 = vcmp.ne.s32.totalorder %v7861_v10, 0  ;;  %vm4295_vm9 = vcmp.lt.s32.totalorder %v7861_v10, 0  ;;  %v5860_v25 = vpop.f32.mrb[0].mxu0 }
 0x200   : > { %9344 = vst [vmem:[#allocation38_spill] sm:$0xff] %v9343_v50  ;;  %vm7931_vm14 = vmand %vm9346_vm3, %vm9345_vm13  ;;  %v7938_v43 = vmul.u32.u64.low 3817748708, %v7830_v41  ;;  %v7939_v60 = vmul.u32.u64.high 3817748708, %v7830_v41, %v7938_v43  ;;  %vm9349_vm2 = vcmp.ne.s32.totalorder %v7811_v34, 0  ;;  %v9350_v29 = vmov 0 }
 0x201   : > { %vm7944_vm6 = vmand %vm4297_vm4, %vm9349_vm2  ;;  %v7949_v19 = vsub.s32 %v7682_v59, %v4095_v33  ;;  %v4106_v52 = vmul.u32 18, %v4105_v14  ;;  %v7952_v28 = vmul.u32.u64.low 3817748708, %v7864_v23  ;;  %v7953_v32 = vmul.u32.u64.high 3817748708, %v7864_v23, %v7952_v28  ;;  %v3450_v43 = vpop.f32.mrb[1].mxu0 }
 0x202   : > { %v9351_v29 = vsel %vm7944_vm6, 4294967295, %v9350_v29  ;;  %v7956_v9 = vadd.f32 %v5860_v25, %v7416_v22  ;;  %v9353_v41 = vsel %vm7573_vm11, %v7543_v7, %v7494_v57  ;;  %v9354_v44 = vmov 0  ;;  %v5861_v57 = vpop.f32.mrb[2].mxu0  ;;  %vm7997_vm11 = vmand %vm4295_vm9, %vm4259_vm10 }
 0x203   : > { %vm7963_vm4 = vcmp.lt.s32.totalorder %v9353_v41, 16  ;;  %v7976_v28 = vadd.s32 18, %v7861_v10  ;;  %v7979_v35 = vadd.f32 %v3450_v43, %v7423_v53  ;;  %v9358_v53 = vmov 0  ;;  %v3453_v25 = vpop.f32.mrb[3].mxu0 }
 0x204   : > { %9352 = vst [vmem:[#allocation39_spill] sm:$0xff] %v7956_v9  ;;  %v9355_v44 = vsel %vm7963_vm4, 4294967295, %v9354_v44  ;;  %v9359_v53 = vsel %vm7997_vm11, 4294967295, %v9358_v53  ;;  %v8002_v14 = vadd.f32 %v5861_v57, %v7435_v27  ;;  %v9361_v43 = vsel %vm7646_vm0, %v7633_v12, %v7546_v4  ;;  %v9367_v27 = vld [vmem:[#allocation8_spill] sm:$0xff] }
 0x205   : > { %9356 = vst [vmem:[#allocation40_spill] sm:$0xff] %v9355_v44  ;;  %9357 = vst [vmem:[#allocation41_spill] sm:$0xff] %v7979_v35  ;;  %vm8009_vm13 = vcmp.lt.s32.totalorder %v9361_v43, 16  ;;  %v9362_v7 = vmov 0  ;;  %v8022_v11 = vsub.s32 %v7696_v1, %v4073_v6  ;;  %v8025_v4 = vadd.f32 %v3453_v25, %v7443_v20  ;;  %v9366_v43 = vld [vmem:[#allocation14_spill] sm:$0xff]  ;;  %v9377_v20 = vld [vmem:[#allocation12_spill] sm:$0xff] }
 0x206   : > { %9360 = vst [vmem:[#allocation42_spill] sm:$0xff] %v8002_v14  ;;  %v9363_v7 = vsel %vm8009_vm13, 4294967295, %v9362_v7  ;;  %v8030_v12 = vsub.s32 %v7723_v8, %v4106_v52  ;;  %v5282_v57 = vpack.c.bf16 %v8002_v14, %v7956_v9  ;;  %v9368_v33 = vsel %vm7549_vm8, %v9366_v43, %v9367_v27  ;;  %v9374_v27 = vld [vmem:[#allocation20_spill] sm:$0xff]  ;;  %v9376_v43 = vld [vmem:[#allocation17_spill] sm:$0xff] }
 0x207   : > { %9364 = vst [vmem:[#allocation43_spill] sm:$0xff] %v9363_v7  ;;  %9365 = vst [vmem:[#allocation44_spill] sm:$0xff] %v8025_v4  ;;  %vm8039_vm10 = vcmp.lt.s32.totalorder %v9368_v33, 16  ;;  %v9369_v1 = vmov 0  ;;  %v8048_v8 = vadd.s32 18, %v7949_v19  ;;  %v4083_v52 = vshrl.u32 %v7901_v26, 4 }
 0x208   : > { %v9370_v1 = vsel %vm8039_vm10, 4294967295, %v9369_v1  ;;  %vm9372_vm3 = vnez %v9316_v36  ;;  %v5277_v6 = vpack.c.bf16 %v8025_v4, %v7979_v35  ;;  %vm9373_vm8 = vnez %v9320_v17  ;;  %5364 = vst [vmem:[%s8064_s6 + $0x8] sm:$0xff] %v5282_v57   ;;  %v9395_v17 = vld [vmem:[#allocation11_spill] sm:$0xff]  ;;  %v9417_v44 = vld [vmem:[#allocation33_spill] sm:$0xff] }
 0x209   : > { %9371 = vst [vmem:[#allocation14_spill] sm:$0xff] %v9370_v1  ;;  %v4602_v30 = vsel %vm9372_vm3, %v7979_v35, 0.0  ;;  %v4603_v33 = vsel %vm9373_vm8, %v8025_v4, 0.0  ;;  %v8060_v25 = vadd.s32 216, %v7361_v62  ;;  %vm9375_vm2 = vnez %v9374_v27  ;;  %v9421_v35 = vld [vmem:[#allocation21_spill] sm:$0xff] }
 0x20a   : > { %v4638_v26 = vadd.f32 %v4603_v33, %v4602_v30  ;;  %v9378_v59 = vsel %vm9375_vm2, %v9376_v43, %v9377_v20  ;;  %v9379_v41 = vmov 0  ;;  %v4138_v22 = vshrl.u32 %v7939_v60, 4  ;;  %5278 = vst [vmem:[%s8064_s6] sm:$0xff] %v5277_v6   ;;  %v5864_v30 = vpop.f32.mrb[4].mxu0  ;;  %v9383_v33 = vld [vmem:[#allocation9_spill] sm:$0xff] }
 0x20b   : > { %vm8072_vm9 = vcmp.lt.s32.totalorder %v9378_v59, 16  ;;  %vm9382_vm3 = vnez %v9332_v42  ;;  %v4116_v59 = vshrl.u32 %v7953_v32, 4  ;;  %v8087_v27 = vadd.f32 %v5864_v30, %v9383_v33  ;;  %v3466_v43 = vpop.f32.mrb[5].mxu0 }
 0x20c   : > { %v9380_v41 = vsel %vm8072_vm9, 4294967295, %v9379_v41  ;;  %v4604_v57 = vsel %vm9382_vm3, %v7956_v9, 0.0  ;;  %vm9384_vm8 = vnez %v9297_v0  ;;  %v9386_v42 = vmov 0 }
 0x20d   : > { %9381 = vst [vmem:[#allocation8_spill] sm:$0xff] %v9380_v41  ;;  %v4639_v20 = vadd.f32 %v4638_v26, %v4604_v57  ;;  %v9385_v60 = vsel %vm9384_vm8, %v7688_v37, %v7636_v56  ;;  %vm9389_vm6 = vcmp.ne.s32.totalorder %v7949_v19, 0  ;;  %vm9390_vm2 = vcmp.lt.s32.totalorder %v7949_v19, 0  ;;  %v9394_v37 = vld [vmem:[#allocation10_spill] sm:$0xff]  ;;  %v5865_v57 = vpop.f32.mrb[6].mxu0 }
 0x20e   : > { %vm8094_vm0 = vcmp.lt.s32.totalorder %v9385_v60, 16  ;;  %vm8102_vm3 = vmand %vm9390_vm2, %vm9389_vm6  ;;  %v9391_v32 = vmov 0  ;;  %v4084_v6 = vmul.u32 18, %v4083_v52  ;;  %v8107_v26 = vadd.s32 200, %v7361_v62  ;;  %v3469_v52 = vpop.f32.mrb[7].mxu0 }
 0x20f   : > { %v9387_v42 = vsel %vm8094_vm0, 4294967295, %v9386_v42  ;;  %v9392_v32 = vsel %vm8102_vm3, 4294967295, %v9391_v32  ;;  %vm9393_vm1 = vnez %v9343_v50  ;;  %v8113_v0 = vadd.f32 %v3466_v43, %v9394_v37  ;;  %v9482_v43 = vld [vmem:[#allocation31_spill] sm:$0xff] }
 0x210   : > { %9388 = vst [vmem:[#allocation20_spill] sm:$0xff] %v9387_v42  ;;  %v4605_v56 = vsel %vm9393_vm1, %v8002_v14, 0.0  ;;  %v8116_v30 = vmul.u32.u64.low 3817748708, %v8060_v25  ;;  %v8117_v33 = vmul.u32.u64.high 3817748708, %v8060_v25, %v8116_v30  ;;  %v8120_v36 = vadd.f32 %v5865_v57, %v9395_v17 }
 0x211   : > { %v4640_v60 = vadd.f32 %v4639_v20, %v4605_v56  ;;  %vm9396_vm6 = vnez %v9304_v40  ;;  %v9398_v50 = vmov 0  ;;  %vm9401_vm2 = vcmp.ne.s32.totalorder %v8022_v11, 0 }
 0x212   : > { %v9397_v9 = vsel %vm9396_vm6, %v7735_v54, %v7664_v31  ;;  %vm9402_vm1 = vcmp.lt.s32.totalorder %v8022_v11, 0  ;;  %v8140_v17 = vadd.s32 18, %v8022_v11  ;;  %v8143_v40 = vadd.s32 18, %v8030_v12  ;;  %v9405_v31 = vld [vmem:[#allocation13_spill] sm:$0xff] }
 0x213   : > { %vm8127_vm8 = vcmp.lt.s32.totalorder %v9397_v9, 16  ;;  %vm8135_vm11 = vmand %vm9402_vm1, %vm9401_vm2  ;;  %v4606_v54 = vsel %vm7963_vm4, %v8113_v0, 0.0  ;;  %v8149_v9 = vadd.f32 %v3469_v52, %v9405_v31  ;;  %vm9407_vm1 = vcmp.ne.s32.totalorder %v8030_v12, 0  ;;  %v9411_v52 = vld [vmem:[#allocation26_spill] sm:$0xff] }
 0x214   : > { %v9399_v50 = vsel %vm8127_vm8, 4294967295, %v9398_v50  ;;  %vm9408_vm6 = vcmp.lt.s32.totalorder %v8030_v12, 0  ;;  %v4139_v37 = vmul.u32 18, %v4138_v22  ;;  %v4641_v57 = vadd.f32 %v4640_v60, %v4606_v54 }
 0x215   : > { %9400 = vst [vmem:[#allocation17_spill] sm:$0xff] %v9399_v50  ;;  %9406 = vst [vmem:[#allocation12_spill] sm:$0xff] %v8149_v9  ;;  %v5292_v30 = vpack.c.bf16 %v8120_v36, %v8087_v27  ;;  %vm9412_vm4 = vnez %v9411_v52  ;;  %v9414_v20 = vmov 0  ;;  %v8175_v14 = vsub.s32 %v9417_v44, %v4084_v6 }
 0x216   : > { %vm8159_vm2 = vmand %vm9408_vm6, %vm9407_vm1  ;;  %v9413_v31 = vsel %vm9412_vm4, %v7678_v18, %v7623_v47  ;;  %v4117_v4 = vmul.u32 18, %v4116_v59  ;;  %v5287_v22 = vpack.c.bf16 %v8149_v9, %v8113_v0  ;;  %v4607_v60 = vsel %vm8009_vm13, %v8149_v9, 0.0  ;;  %v9418_v18 = vld [vmem:[#allocation27_spill] sm:$0xff] }
 0x217   : > { %vm8170_vm3 = vcmp.lt.s32.totalorder %v9413_v31, 16  ;;  %v8183_v54 = vmul.u32.u64.low 3817748708, %v8107_v26  ;;  %v8184_v52 = vmul.u32.u64.high 3817748708, %v8107_v26, %v8183_v54  ;;  %5366 = vst [vmem:[%s8064_s6 + $0x18] sm:$0xff] %v5292_v30   ;;  %v4642_v47 = vadd.f32 %v4641_v57, %v4607_v60  ;;  %v9420_v31 = vld [vmem:[#allocation28_spill] sm:$0xff]  ;;  %v5868_v60 = vpop.f32.mrb[8].mxu0 }
 0x218   : > { %v9415_v20 = vsel %vm8170_vm3, 4294967295, %v9414_v20  ;;  %vm9419_vm4 = vnez %v9418_v18  ;;  %v9423_v59 = vmov 0  ;;  %v8205_v57 = vadd.s32 240, %v7361_v62  ;;  %5365 = vst [vmem:[%s8064_s6 + $0x10] sm:$0xff] %v5287_v22   ;;  %v9426_v54 = vld [vmem:[#allocation34_spill] sm:$0xff]  ;;  %v9427_v30 = vld [vmem:[#allocation15_spill] sm:$0xff] }
 0x219   : > { %9416 = vst [vmem:[#allocation9_spill] sm:$0xff] %v9415_v20  ;;  %v9422_v44 = vsel %vm9419_vm4, %v9420_v31, %v9421_v35  ;;  %v4608_v35 = vsel %vm8039_vm10, %v8087_v27, 0.0  ;;  %v8212_v18 = vsub.s32 %v9426_v54, %v4139_v37  ;;  %v8215_v31 = vadd.s32 224, %v7361_v62  ;;  %v3482_v9 = vpop.f32.mrb[9].mxu0 }
 0x21a   : > { %vm8192_vm1 = vcmp.lt.s32.totalorder %v9422_v44, 16  ;;  %v8218_v44 = vadd.s32 248, %v7361_v62  ;;  %v4643_v6 = vadd.f32 %v4642_v47, %v4608_v35  ;;  %v8221_v7 = vadd.f32 %v5868_v60, %v9427_v30  ;;  %v9432_v30 = vld [vmem:[#allocation16_spill] sm:$0xff]  ;;  %v5869_v39 = vpop.f32.mrb[10].mxu0  ;;  %v9433_v60 = vld [vmem:[#allocation18_spill] sm:$0xff] }
 0x21b   : > { %v9424_v59 = vsel %vm8192_vm1, 4294967295, %v9423_v59  ;;  %v9428_v22 = vsel %vm7854_vm5, %v7795_v3, %v7746_v15  ;;  %v9429_v1 = vmov 0  ;;  %v8233_v37 = vsub.s32 %v7864_v23, %v4117_v4  ;;  %v3485_v23 = vpop.f32.mrb[11].mxu0 }
 0x21c   : > { %9425 = vst [vmem:[#allocation10_spill] sm:$0xff] %v9424_v59  ;;  %vm8228_vm6 = vcmp.lt.s32.totalorder %v9428_v22, 16  ;;  %v8236_v54 = vadd.s32 232, %v7361_v62  ;;  %v4609_v47 = vsel %vm8072_vm9, %v8120_v36, 0.0  ;;  %v8242_v35 = vadd.f32 %v3482_v9, %v9432_v30 }
 0x21d   : > { %v9430_v1 = vsel %vm8228_vm6, 4294967295, %v9429_v1  ;;  %v4149_v15 = vshrl.u32 %v8117_v33, 4  ;;  %v4644_v3 = vadd.f32 %v4643_v6, %v4609_v47  ;;  %v8247_v22 = vadd.f32 %v5869_v39, %v9433_v60  ;;  %v9439_v6 = vld [vmem:[#allocation19_spill] sm:$0xff] }
 0x21e   : > { %9431 = vst [vmem:[#allocation11_spill] sm:$0xff] %v9430_v1  ;;  %v9435_v4 = vsel %vm7893_vm15, %v7826_v45, %v7783_v58  ;;  %v9436_v41 = vmov 0  ;;  %v8259_v9 = vmul.u32.u64.low 3817748708, %v8205_v57  ;;  %v8260_v30 = vmul.u32.u64.high 3817748708, %v8205_v57, %v8259_v9 }
 0x21f   : > { %9434 = vst [vmem:[#allocation13_spill] sm:$0xff] %v8247_v22  ;;  %vm8254_vm4 = vcmp.lt.s32.totalorder %v9435_v4, 16  ;;  %v4610_v33 = vsel %vm8094_vm0, %v8242_v35, 0.0  ;;  %v8266_v47 = vadd.f32 %v3485_v23, %v9439_v6  ;;  %v8270_v2 = vadd.s32 18, %v8175_v14 }
 0x220   : > { %v9437_v41 = vsel %vm8254_vm4, 4294967295, %v9436_v41  ;;  %v4645_v58 = vadd.f32 %v4644_v3, %v4610_v33  ;;  %v5302_v45 = vpack.c.bf16 %v8247_v22, %v8221_v7  ;;  %v9440_v39 = vsel %vm7820_vm7, %v7790_v16, %v7743_v63 }
 0x221   : > { %9438 = vst [vmem:[#allocation26_spill] sm:$0xff] %v9437_v41  ;;  %vm8279_vm15 = vcmp.lt.s32.totalorder %v9440_v39, 16  ;;  %v9441_v60 = vmov 0  ;;  %v8284_v23 = vmul.u32.u64.low 3817748708, %v8215_v31  ;;  %v8285_v4 = vmul.u32.u64.high 3817748708, %v8215_v31, %v8284_v23 }
 0x222   : > { %v9442_v60 = vsel %vm8279_vm15, 4294967295, %v9441_v60  ;;  %v5297_v9 = vpack.c.bf16 %v8266_v47, %v8242_v35  ;;  %v4611_v3 = vsel %vm8127_vm8, %v8266_v47, 0.0  ;;  %v8293_v61 = vadd.s32 18, %v8212_v18  ;;  %5368 = vst [vmem:[%s8064_s6 + $0x28] sm:$0xff] %v5302_v45   ;;  %v9448_v23 = vld [vmem:[#allocation22_spill] sm:$0xff] }
 0x223   : > { %9443 = vst [vmem:[#allocation33_spill] sm:$0xff] %v9442_v60  ;;  %v4127_v63 = vshrl.u32 %v8184_v52, 4  ;;  %v4646_v16 = vadd.f32 %v4645_v58, %v4611_v3  ;;  %v9444_v33 = vsel %vm7870_vm12, %v7807_v24, %v7766_v51  ;;  %v9445_v6 = vmov 0  ;;  %v5872_v58 = vpop.f32.mrb[12].mxu0 }
 0x224   : > { %vm8302_vm7 = vcmp.lt.s32.totalorder %v9444_v33, 16  ;;  %vm4266_vm5 = vcmp.ne.s32.totalorder %v8233_v37, 0  ;;  %v4150_v39 = vmul.u32 18, %v4149_v15  ;;  %v4612_v52 = vsel %vm8170_vm3, %v8221_v7, 0.0  ;;  %5367 = vst [vmem:[%s8064_s6 + $0x20] sm:$0xff] %v5297_v9   ;;  %v3498_v3 = vpop.f32.mrb[13].mxu0 }
 0x225   : > { %v9446_v6 = vsel %vm8302_vm7, 4294967295, %v9445_v6  ;;  %v8315_v51 = vmul.u32.u64.low 3817748708, %v8218_v44  ;;  %v8316_v24 = vmul.u32.u64.high 3817748708, %v8218_v44, %v8315_v51  ;;  %v8319_v21 = vadd.s32 272, %v7361_v62 }
 0x226   : > { %9447 = vst [vmem:[#allocation27_spill] sm:$0xff] %v9446_v6  ;;  %v4647_v45 = vadd.f32 %v4646_v16, %v4612_v52  ;;  %v8322_v15 = vadd.f32 %v5872_v58, %v9448_v23  ;;  %v9450_v9 = vsel %vm7931_vm14, %v7913_v48, %v7803_v13  ;;  %v9451_v33 = vmov 0  ;;  %v9454_v52 = vld [vmem:[#allocation23_spill] sm:$0xff]  ;;  %v5873_v23 = vpop.f32.mrb[14].mxu0 }
 0x227   : > { %vm8329_vm12 = vcmp.lt.s32.totalorder %v9450_v9, 16  ;;  %v8334_v20 = vmul.u32.u64.low 3817748708, %v8236_v54  ;;  %v8335_v51 = vmul.u32.u64.high 3817748708, %v8236_v54, %v8334_v20  ;;  %v4613_v16 = vsel %vm8192_vm1, %v8247_v22, 0.0  ;;  %v9459_v9 = vld [vmem:[#allocation24_spill] sm:$0xff]  ;;  %v3501_v50 = vpop.f32.mrb[15].mxu0 }
 0x228   : > { %9449 = vst [vmem:[#allocation28_spill] sm:$0xff] %v8322_v15  ;;  %v9452_v33 = vsel %vm8329_vm12, 4294967295, %v9451_v33  ;;  %v8341_v58 = vadd.f32 %v3498_v3, %v9454_v52  ;;  %vm9455_vm9 = vcmp.ne.s32.totalorder %v8175_v14, 0  ;;  %vm9456_vm14 = vcmp.lt.s32.totalorder %v8175_v14, 0  ;;  %v8357_v3 = vpop.f32.mrb[20].mxu1 }
 0x229   : > { %9453 = vst [vmem:[#allocation21_spill] sm:$0xff] %v9452_v33  ;;  %vm8347_vm0 = vmand %vm9456_vm14, %vm9455_vm9  ;;  %v8352_v13 = vadd.s32 18, %v8233_v37  ;;  %v4128_v48 = vmul.u32 18, %v4127_v63  ;;  %v4648_v20 = vadd.f32 %v4647_v45, %v4613_v16  ;;  %v8355_v59 = vadd.f32 %v5873_v23, %v9459_v9  ;;  %v8386_v23 = vpop.f32.mrb[21].mxu1 }
 0x22a   : > { %vm9461_vm8 = vnez %v9359_v53  ;;  %v9463_v22 = vmov 0  ;;  %vm9465_vm14 = vcmp.lt.s32.totalorder %v8233_v37, 0  ;;  %v8377_v45 = vsub.s32 %v8060_v25, %v4150_v39 }
 0x22b   : > { %9460 = vst [vmem:[#allocation34_spill] sm:$0xff] %v8355_v59  ;;  %v9462_v52 = vsel %vm9461_vm8, %v7976_v28, %v7861_v10  ;;  %vm8372_vm1 = vmand %vm9465_vm14, %vm4266_vm5  ;;  %v4182_v53 = vshrl.u32 %v8260_v30, 4  ;;  %v4614_v10 = vsel %vm8228_vm6, %v8341_v58, 0.0  ;;  %v9468_v28 = vld [vmem:[#allocation25_spill] sm:$0xff]  ;;  %v5312_v25 = vpack.c.bf16 %v8355_v59, %v8322_v15 }
 0x22c   : > { %vm8364_vm9 = vcmp.lt.s32.totalorder %v9462_v52, 16  ;;  %v8384_v16 = vadd.f32 %v3501_v50, %v9468_v28  ;;  %v8389_v9 = vmul.u32.u64.low 3817748708, %v8319_v21  ;;  %v8390_v52 = vmul.u32.u64.high 3817748708, %v8319_v21, %v8389_v9  ;;  %v8404_v50 = vpop.f32.mrb[22].mxu1 }
 0x22d   : > { %v9464_v22 = vsel %vm8364_vm9, 4294967295, %v9463_v22  ;;  %v4649_v42 = vadd.f32 %v4648_v20, %v4614_v10  ;;  %vm9469_vm8 = vnez %v9340_v55  ;;  %v9471_v39 = vmov 0  ;;  %5370 = vst [vmem:[%s8064_s6 + $0x38] sm:$0xff] %v5312_v25   ;;  %v9477_v25 = vld [vmem:[#allocation29_spill] sm:$0xff] }
 0x22e   : > { %v9470_v30 = vsel %vm9469_vm8, %v7910_v49, %v7798_v46  ;;  %v4407_v20 = vsel %vm8347_vm0, %v8270_v2, %v8175_v14  ;;  %v4160_v10 = vshrl.u32 %v8285_v4, 4  ;;  %v5307_v55 = vpack.c.bf16 %v8384_v16, %v8341_v58  ;;  %v8416_v49 = vpop.f32.mrb[23].mxu1 }
 0x22f   : > { %vm8400_vm5 = vcmp.lt.s32.totalorder %v9470_v30, 16  ;;  %v4615_v46 = vsel %vm8254_vm4, %v8384_v16, 0.0  ;;  %v8423_v9 = vsub.s32 %v8107_v26, %v4128_v48  ;;  %vm9473_vm0 = vnez %v9351_v29  ;;  %v5876_v29 = vpop.f32.mrb[16].mxu0 }
 0x230   : > { %v9472_v39 = vsel %vm8400_vm5, 4294967295, %v9471_v39  ;;  %v4650_v14 = vadd.f32 %v4649_v42, %v4615_v46  ;;  %v9474_v2 = vsel %vm9473_vm0, %v7916_v38, %v7811_v34  ;;  %v9475_v4 = vmov 0  ;;  %5369 = vst [vmem:[%s8064_s6 + $0x30] sm:$0xff] %v5307_v55   ;;  %v3514_v46 = vpop.f32.mrb[17].mxu0 }
 0x231   : > { %vm8431_vm14 = vcmp.lt.s32.totalorder %v9474_v2, 16  ;;  %v8438_v5 = vadd.s32 256, %v7361_v62  ;;  %v4616_v42 = vsel %vm8279_vm15, %v8322_v15, 0.0  ;;  %v8445_v26 = vadd.s32 18, %v8377_v45 }
 0x232   : > { %v9476_v4 = vsel %vm8431_vm14, 4294967295, %v9475_v4  ;;  %v4183_v34 = vmul.u32 18, %v4182_v53  ;;  %v4193_v38 = vshrl.u32 %v8316_v24, 4  ;;  %v4651_v48 = vadd.f32 %v4650_v14, %v4616_v42  ;;  %v9481_v53 = vld [vmem:[#allocation30_spill] sm:$0xff]  ;;  %v5877_v42 = vpop.f32.mrb[18].mxu0 }
 0x233   : > { %v8449_v30 = vadd.f32 %v5876_v29, %v9477_v25  ;;  %v9478_v2 = vsel %vm8135_vm11, %v8140_v17, %v8022_v11  ;;  %v4161_v55 = vmul.u32 18, %v4160_v10  ;;  %v8461_v60 = vadd.s32 264, %v7361_v62  ;;  %v3517_v10 = vpop.f32.mrb[19].mxu0  ;;  %v8474_v29 = vpop.f32.mrb[24].mxu1 }
 0x234   : > { %vm8456_vm0 = vcmp.lt.s32.totalorder %v9478_v2, 16  ;;  %v4617_v24 = vsel %vm8302_vm7, %v8355_v59, 0.0  ;;  %v8467_v14 = vadd.f32 %v3514_v46, %v9481_v53  ;;  %v8472_v17 = vadd.f32 %v5877_v42, %v9482_v43  ;;  %v8498_v42 = vpop.f32.mrb[25].mxu1 }
 0x235   : > { %v4652_v11 = vadd.f32 %v4651_v48, %v4617_v24  ;;  %vm8476_vm8 = vcmp.lt.s32.totalorder %v4407_v20, 16  ;;  %vm9485_vm7 = vcmp.ne.s32.totalorder %v8212_v18, 0  ;;  %vm9486_vm15 = vcmp.lt.s32.totalorder %v8212_v18, 0  ;;  %v9489_v20 = vld [vmem:[#allocation32_spill] sm:$0xff]  ;;  %v8521_v59 = vpop.f32.mrb[26].mxu1 }
 0x236   : > { %vm8484_vm6 = vmand %vm9486_vm15, %vm9485_vm7  ;;  %v8489_v48 = vmul.u32.u64.low 3817748708, %v8438_v5  ;;  %v8490_v2 = vmul.u32.u64.high 3817748708, %v8438_v5, %v8489_v48  ;;  %v4618_v24 = vsel %vm8329_vm12, %v8467_v14, 0.0  ;;  %v8496_v53 = vadd.f32 %v3517_v10, %v9489_v20 }
 0x237   : > { %vm9490_vm11 = vcmp.ne.s32.totalorder %v8377_v45, 0  ;;  %vm9491_vm15 = vcmp.lt.s32.totalorder %v8377_v45, 0  ;;  %v4375_v48 = vadd.s32 18, %v8423_v9  ;;  %v4171_v6 = vshrl.u32 %v8335_v51, 4 }
 0x238   : > { %vm8504_vm7 = vmand %vm9491_vm15, %vm9490_vm11  ;;  %v4653_v33 = vadd.f32 %v4652_v11, %v4618_v24  ;;  %v5322_v10 = vpack.c.bf16 %v8472_v17, %v8449_v30  ;;  %vm9494_vm4 = vnez %v9392_v32  ;;  %vm9498_vm11 = vcmp.ne.s32.totalorder %v8423_v9, 0  ;;  %v8542_v24 = vpop.f32.mrb[27].mxu1 }
 0x239   : > { %v9495_v20 = vsel %vm9494_vm4, %v8048_v8, %v7949_v19  ;;  %vm9499_vm15 = vcmp.lt.s32.totalorder %v8423_v9, 0  ;;  %v8532_v32 = vsub.s32 %v8205_v57, %v4183_v34  ;;  %v8535_v19 = vadd.s32 280, %v7361_v62 }
 0x23a   : > { %vm8517_vm12 = vcmp.lt.s32.totalorder %v9495_v20, 16  ;;  %vm8527_vm3 = vmand %vm9499_vm15, %vm9498_vm11  ;;  %v5317_v8 = vpack.c.bf16 %v8496_v53, %v8467_v14  ;;  %v4619_v11 = vsel %vm8364_vm9, %v8496_v53, 0.0  ;;  %5372 = vst [vmem:[%s8064_s6 + $0x48] sm:$0xff] %v5322_v10   ;;  %v9502_v62 = vsel %vm8159_vm2, %v8143_v40, %v8030_v12  ;;  %v5880_v40 = vpop.f32.mrb[20].mxu0 }
 0x23b   : > { %v8545_v20 = vmul.u32.u64.low 3817748708, %v8461_v60  ;;  %v8546_v1 = vmul.u32.u64.high 3817748708, %v8461_v60, %v8545_v20  ;;  %v4654_v15 = vadd.f32 %v4653_v33, %v4619_v11  ;;  %vm8554_vm4 = vcmp.lt.s32.totalorder %v9502_v62, 16 }
 0x23c   : > { %v4412_v34 = vsel %vm8484_vm6, %v8293_v61, %v8212_v18  ;;  %v4413_v10 = vsel %vm8504_vm7, %v8445_v26, %v8377_v45  ;;  %v8567_v33 = vsub.s32 %v8215_v31, %v4161_v55  ;;  %v4620_v12 = vsel %vm8400_vm5, %v8449_v30, 0.0  ;;  %5371 = vst [vmem:[%s8064_s6 + $0x40] sm:$0xff] %v5317_v8   ;;  %v3530_v45 = vpop.f32.mrb[21].mxu0 }
 0x23d   : > { %v4411_v56 = vsel %vm8527_vm3, %v4375_v48, %v8423_v9  ;;  %v4194_v46 = vmul.u32 18, %v4193_v38  ;;  %v4172_v18 = vmul.u32 18, %v4171_v6  ;;  %v4655_v61 = vadd.f32 %v4654_v15, %v4620_v12  ;;  %v8603_v9 = vpop.f32.mrb[28].mxu1 }
 0x23e   : > { %v8577_v11 = vadd.f32 %v5880_v40, %v8357_v3  ;;  %v9505_v31 = vsel %vm8372_vm1, %v8352_v13, %v8233_v37  ;;  %v8589_v55 = vmul.u32.u64.low 3817748708, %v8535_v19  ;;  %v8590_v43 = vmul.u32.u64.high 3817748708, %v8535_v19, %v8589_v55  ;;  %v5881_v3 = vpop.f32.mrb[22].mxu0  ;;  %v8613_v8 = vpop.f32.mrb[29].mxu1 }
 0x23f   : > { %vm8584_vm2 = vcmp.lt.s32.totalorder %v9505_v31, 16  ;;  %v4621_v6 = vsel %vm8431_vm14, %v8472_v17, 0.0  ;;  %v8596_v15 = vadd.f32 %v3530_v45, %v8386_v23  ;;  %vm4272_vm3 = vcmp.ne.s32.totalorder %v8532_v32, 0  ;;  %v3533_v63 = vpop.f32.mrb[23].mxu0  ;;  %v8625_v12 = vpop.f32.mrb[30].mxu1 }
 0x240   : > { %vm4308_vm1 = vcmp.lt.s32.totalorder %v8532_v32, 0  ;;  %v4656_v37 = vadd.f32 %v4655_v61, %v4621_v6  ;;  %v8601_v13 = vadd.f32 %v5881_v3, %v8404_v50  ;;  %v4226_v38 = vshrl.u32 %v8390_v52, 4  ;;  %v5884_v6 = vpop.f32.mrb[24].mxu0 }
 0x241   : > { %v4204_v48 = vshrl.u32 %v8490_v2, 4  ;;  %v4622_v23 = vsel %vm8456_vm0, %v8596_v15, 0.0  ;;  %v8611_v51 = vadd.f32 %v3533_v63, %v8416_v49  ;;  %v4380_v50 = vadd.s32 18, %v8532_v32  ;;  %vm8635_vm11 = vmand %vm4308_vm1, %vm4272_vm3 }
 0x242   : > { %v8617_v20 = vsub.s32 %v8218_v44, %v4194_v46  ;;  %v4657_v62 = vadd.f32 %v4656_v37, %v4622_v23  ;;  %v5332_v52 = vpack.c.bf16 %v8601_v13, %v8577_v11  ;;  %vm8621_vm6 = vcmp.lt.s32.totalorder %v4412_v34, 16  ;;  %v8647_v46 = vpop.f32.mrb[31].mxu1  ;;  %v3546_v37 = vpop.f32.mrb[25].mxu0 }
 0x243   : > { %v9508_v2 = vmov 0  ;;  %vm8627_vm7 = vcmp.lt.s32.totalorder %v4411_v56, 16  ;;  %v8640_v34 = vsub.s32 %v8236_v54, %v4172_v18  ;;  %v5327_v40 = vpack.c.bf16 %v8611_v51, %v8596_v15  ;;  %v8690_v44 = vpop.f32.mrb[32].mxu1 }
 0x244   : > { %v9509_v2 = vsel %vm8621_vm6, 4294967295, %v9508_v2  ;;  %v4623_v56 = vsel %vm8476_vm8, %v8611_v51, 0.0  ;;  %v4215_v61 = vshrl.u32 %v8546_v1, 4  ;;  %5374 = vst [vmem:[%s8064_s6 + $0x58] sm:$0xff] %v5332_v52   ;;  %vm8652_vm3 = vcmp.lt.s32.totalorder %v4413_v10, 16 }
 0x245   : > { %v4658_v45 = vadd.f32 %v4657_v62, %v4623_v56  ;;  %v9514_v31 = vmov 0  ;;  %v4378_v54 = vadd.s32 18, %v8567_v33  ;;  %v4205_v18 = vmul.u32 18, %v4204_v48  ;;  %5373 = vst [vmem:[%s8064_s6 + $0x50] sm:$0xff] %v5327_v40  }
 0x246   : > { %v9515_v31 = vsel %vm8652_vm3, 4294967295, %v9514_v31  ;;  %v4624_v55 = vsel %vm8517_vm12, %v8577_v11, 0.0  ;;  %v4416_v1 = vsel %vm8635_vm11, %v4380_v50, %v8532_v32  ;;  %v8668_v3 = vadd.f32 %v5884_v6, %v8474_v29  ;;  %v5885_v32 = vpop.f32.mrb[26].mxu0 }
 0x247   : > { %v4659_v10 = vadd.f32 %v4658_v45, %v4624_v55  ;;  %v4237_v63 = vshrl.u32 %v8590_v43, 4  ;;  %v4625_v48 = vsel %vm8554_vm4, %v8601_v13, 0.0  ;;  %v8676_v23 = vadd.f32 %v3546_v37, %v8498_v42  ;;  %v3549_v52 = vpop.f32.mrb[27].mxu0 }
 0x248   : > { %vm9516_vm11 = vcmp.ne.s32.totalorder %v8567_v33, 0  ;;  %vm9517_vm14 = vcmp.lt.s32.totalorder %v8567_v33, 0  ;;  %v4216_v50 = vmul.u32 18, %v4215_v61  ;;  %v8688_v62 = vadd.f32 %v5885_v32, %v8521_v59  ;;  %v8701_v61 = vpop.f32.mrb[33].mxu1 }
 0x249   : > { %vm8682_vm15 = vmand %vm9517_vm14, %vm9516_vm11  ;;  %v4660_v43 = vadd.f32 %v4659_v10, %v4625_v48  ;;  %v4227_v42 = vmul.u32 18, %v4226_v38  ;;  %v8693_v40 = vsub.s32 %v8438_v5, %v4205_v18  ;;  %v4626_v56 = vsel %vm8584_vm2, %v8676_v23, 0.0  ;;  %v8718_v6 = vpop.f32.mrb[34].mxu1 }
 0x24a   : > { %v8699_v45 = vadd.f32 %v3549_v52, %v8542_v24  ;;  %vm9520_vm14 = vcmp.ne.s32.totalorder %v8617_v20, 0  ;;  %vm9521_vm11 = vcmp.lt.s32.totalorder %v8617_v20, 0  ;;  %v4381_v5 = vadd.s32 18, %v8617_v20  ;;  %v5888_v52 = vpop.f32.mrb[28].mxu0 }
 0x24b   : > { %vm8707_vm1 = vmand %vm9521_vm11, %vm9520_vm14  ;;  %v4379_v38 = vadd.s32 18, %v8640_v34  ;;  %v4661_v18 = vadd.f32 %v4660_v43, %v4626_v56  ;;  %v5342_v24 = vpack.c.bf16 %v8688_v62, %v8668_v3  ;;  %v4414_v55 = vsel %vm8682_vm15, %v4378_v54, %v8567_v33  ;;  %v8737_v54 = vpop.f32.mrb[35].mxu1 }
 0x24c   : > { %vm9524_vm14 = vcmp.ne.s32.totalorder %v8640_v34, 0  ;;  %vm9525_vm11 = vcmp.lt.s32.totalorder %v8640_v34, 0  ;;  %v4238_v37 = vmul.u32 18, %v4237_v63  ;;  %v5337_v48 = vpack.c.bf16 %v8699_v45, %v8676_v23 }
 0x24d   : > { %vm8724_vm5 = vmand %vm9525_vm11, %vm9524_vm14  ;;  %v4627_v32 = vsel %vm8627_vm7, %v8699_v45, 0.0  ;;  %vm8733_vm9 = vcmp.lt.s32.totalorder %v4416_v1, 16  ;;  %v8740_v29 = vsub.s32 %v8461_v60, %v4216_v50  ;;  %5376 = vst [vmem:[%s8064_s6 + $0x68] sm:$0xff] %v5342_v24   ;;  %v8744_v63 = vsub.s32 %v8319_v21, %v4227_v42 }
 0x24e   : > { %v4662_v43 = vadd.f32 %v4661_v18, %v4627_v32  ;;  %vm4274_vm15 = vcmp.ne.s32.totalorder %v8693_v40, 0  ;;  %vm4310_vm14 = vcmp.lt.s32.totalorder %v8693_v40, 0  ;;  %v4628_v1 = vsel %vm8621_vm6, %v8668_v3, 0.0  ;;  %5375 = vst [vmem:[%s8064_s6 + $0x60] sm:$0xff] %v5337_v48   ;;  %v3562_v18 = vpop.f32.mrb[29].mxu0 }
 0x24f   : > { %vm8752_vm11 = vcmp.lt.s32.totalorder %v4414_v55, 16  ;;  %v9530_v56 = vmov 0  ;;  %v4417_v60 = vsel %vm8707_vm1, %v4381_v5, %v8617_v20  ;;  %v4415_v21 = vsel %vm8724_vm5, %v4379_v38, %v8640_v34  ;;  %v5889_v20 = vpop.f32.mrb[30].mxu0  ;;  %vm8777_vm5 = vmand %vm4310_vm14, %vm4274_vm15 }
 0x250   : > { %v9531_v56 = vsel %vm8752_vm11, 4294967295, %v9530_v56  ;;  %v4663_v50 = vadd.f32 %v4662_v43, %v4628_v1  ;;  %v8763_v42 = vadd.f32 %v5888_v52, %v8603_v9  ;;  %v4382_v24 = vadd.s32 18, %v8693_v40  ;;  %v3565_v5 = vpop.f32.mrb[31].mxu0 }
 0x251   : > { %v4239_v55 = vsub.s32 %v8535_v19, %v4238_v37  ;;  %v4629_v48 = vsel %vm8652_vm3, %v8688_v62, 0.0  ;;  %v8771_v59 = vadd.f32 %v3562_v18, %v8613_v8  ;;  %vm4275_vm1 = vcmp.ne.s32.totalorder %v8740_v29, 0 }
 0x252   : > { %vm4311_vm10 = vcmp.lt.s32.totalorder %v8740_v29, 0  ;;  %v4664_v19 = vadd.f32 %v4663_v50, %v4629_v48  ;;  %v8784_v34 = vadd.f32 %v5889_v20, %v8625_v12  ;;  %vm8786_vm13 = vcmp.lt.s32.totalorder %v4415_v21, 16  ;;  %v5892_v48 = vpop.f32.mrb[32].mxu0 }
 0x253   : > { %v4630_v38 = vsel %vm8752_vm11, %v8771_v59, 0.0  ;;  %v8795_v10 = vadd.f32 %v3565_v5, %v8647_v46  ;;  %vm4312_vm15 = vcmp.lt.s32.totalorder %v8744_v63, 0  ;;  %v4383_v12 = vadd.s32 18, %v8740_v29  ;;  %vm8807_vm14 = vmand %vm4311_vm10, %vm4275_vm1  ;;  %v3578_v5 = vpop.f32.mrb[33].mxu0 }
 0x254   : > { %v4665_v37 = vadd.f32 %v4664_v19, %v4630_v38  ;;  %v5352_v32 = vpack.c.bf16 %v8784_v34, %v8763_v42  ;;  %v4384_v43 = vadd.s32 18, %v8744_v63  ;;  %v4418_v1 = vsel %vm8777_vm5, %v4382_v24, %v8693_v40 }
 0x255   : > { %v5347_v52 = vpack.c.bf16 %v8795_v10, %v8771_v59  ;;  %v4631_v21 = vsel %vm8786_vm13, %v8795_v10, 0.0  ;;  %vm4277_vm3 = vcmp.ne.s32.totalorder %v4239_v55, 0  ;;  %vm4313_vm11 = vcmp.lt.s32.totalorder %v4239_v55, 0 }
 0x256   : > { %5378 = vst [vmem:[%s8064_s6 + $0x78] sm:$0xff] %v5352_v32   ;;  %vm8817_vm6 = vcmp.lt.s32.totalorder %v4417_v60, 16  ;;  %v4666_v40 = vadd.f32 %v4665_v37, %v4631_v21  ;;  %vm9540_vm10 = vcmp.ne.s32.totalorder %v8744_v63, 0  ;;  %v4632_v24 = vsel %vm8733_vm9, %v8763_v42, 0.0 }
 0x257   : > { %vm8823_vm5 = vmand %vm4312_vm15, %vm9540_vm10  ;;  %5377 = vst [vmem:[%s8064_s6 + $0x70] sm:$0xff] %v5347_v52   ;;  %v4385_v20 = vadd.s32 18, %v4239_v55  ;;  %v4419_v60 = vsel %vm8807_vm14, %v4383_v12, %v8740_v29  ;;  %v8835_v19 = vadd.f32 %v5892_v48, %v8690_v44  ;;  %vm8837_vm1 = vcmp.lt.s32.totalorder %v4418_v1, 16  ;;  %v5893_v12 = vpop.f32.mrb[34].mxu0 }
 0x258   : > { %v4667_v9 = vadd.f32 %v4666_v40, %v4632_v24  ;;  %vm8842_vm15 = vmand %vm4313_vm11, %vm4277_vm3  ;;  %v4633_v32 = vsel %vm8817_vm6, %v8784_v34, 0.0  ;;  %v4420_v29 = vsel %vm8823_vm5, %v4384_v43, %v8744_v63  ;;  %v8853_v44 = vadd.f32 %v3578_v5, %v8701_v61  ;;  %v3581_v52 = vpop.f32.mrb[35].mxu0 }
 0x259   : > { %v8858_v46 = vadd.f32 %v5893_v12, %v8718_v6  ;;  %vm8860_vm3 = vcmp.lt.s32.totalorder %v4419_v60, 16  ;;  %v4421_v61 = vsel %vm8842_vm15, %v4385_v20, %v4239_v55  ;;  %v8870_v43 = vadd.f32 %v3581_v52, %v8737_v54 }
 0x25a   : > { %v4668_v1 = vadd.f32 %v4667_v9, %v4633_v32  ;;  %v4634_v63 = vsel %vm8837_vm1, %v8853_v44, 0.0  ;;  %vm8872_vm11 = vcmp.lt.s32.totalorder %v4420_v29, 16  ;;  %vm8891_vm14 = vcmp.lt.s32.totalorder %v4421_v61, 16 }
 0x25b   : > { %v5362_v18 = vpack.c.bf16 %v8858_v46, %v8835_v19  ;;  %v5357_v24 = vpack.c.bf16 %v8870_v43, %v8853_v44  ;;  %v4635_v54 = vsel %vm8860_vm3, %v8870_v43, 0.0  ;;  %v4636_v20 = vsel %vm8872_vm11, %v8835_v19, 0.0 }
 0x25c   : > { %v4669_v40 = vadd.f32 %v4668_v1, %v4634_v63 }
 0x25d   : > { %5380 = vst [vmem:[%s8064_s6 + $0x88] sm:$0xff] %v5362_v18   ;;  %5379 = vst [vmem:[%s8064_s6 + $0x80] sm:$0xff] %v5357_v24  }
 0x25e   : > { %v4670_v48 = vadd.f32 %v4669_v40, %v4635_v54 }
 0x260   : > { %v4671_v60 = vadd.f32 %v4670_v48, %v4636_v20 }
 0x261   : > { %6401 = shalt.err (!%p6398_p3)
}
 0x262   : > { %s6402_s26 = scalar_lea.hbm %s8888_s11, 2304  ;;  %s6406_s29 = scalar_lea.hbm %s9187_s2, 4608 }
 0x263   : > { %p6403_p4 = scmp.ne.s32.totalorder %s8888_s11, %s6402_s26  ;;  %p6407_p9 = scmp.lt.u32.totalorder %s8888_s11, %s9187_s2 }
 0x264   : > { %p6408_p10 = scmp.lt.u32.totalorder %s6406_s29, %s6402_s26  ;;  %p6410_p12 = scmp.lt.u32.totalorder %s6402_s26, %s8888_s11 }
 0x265   : > { %p6404_p7 = pnand %p6403_p4, %p6546_p5 }
 0x266   : > { %p6409_p11 = por %p6408_p10, %p6407_p9 }
 0x267   : > { %p6405_p8 = pneg %p6404_p7 }
 0x268   : > { %p6411_p13 = por %p6410_p12, %p6409_p11 }
 0x26a   : > { %p6412_p0 = pnand %p6411_p13, %p6405_p8 }
 0x26c   : > { %6415 = shalt.err (!%p6412_p0)
}
 0x26d   : > { %s6485_s6 = smov 64   ;;  %s6486_s7 = smov 4   ;;  %v4637_v9 = vsel %vm8891_vm14, %v8858_v46, 0.0  ;;  %v9553_v61 = vld [vmem:[#allocation41_spill] sm:$0xff]  ;;  %v9554_v18 = vld [vmem:[#allocation44_spill] sm:$0xff]  ;;  %v9558_v50 = vld [vmem:[#allocation39_spill] sm:$0xff] }
 0x26e   : > { %6269 = dma.vmem_to_hbm [thread:$0]  (%p6546_p5), %s8878_s8, 2304, %s8888_s11, %s4834_s17, %s6485_s6, %s6485_s6, %s6486_s7   ;;  %v4672_v5 = vadd.f32 %v4671_v60, %v4637_v9  ;;  %v9563_v21 = vld [vmem:[#allocation42_spill] sm:$0xff]  ;;  %v9564_v55 = vld [vmem:[#allocation37_spill] sm:$0xff] }
 0x26f   : > { %s4963_s8 = sshll.u32 %s7887_s4, 1  ;;  %s5235_s9 = sshll.u32 %s6529_s16, 5 }
 0x270   : > { %v4673_v37 = vrot.slane %v4672_v5, 4  ;;  %s174_s10 = scalar_lea.vmem [#allocation4], %s4963_s8  ;;  %s9141_s20 = scalar_lea.hbm %s9188_s3, %s5235_s9 }
 0x271   : > { %s4868_s11 = sshll.u32 %s174_s10, 4  ;;  %s4839_s24 = scalar_lea.sflag [#allocation5], %s7887_s4  ;;  %s9143_s11 = int_to_ptr.vmem [resolvable:$true] %s4868_s11 }
 0x272   : > { %v4674_v32 = vadd.f32 %v4673_v37, %v4672_v5  ;;  %s6416_s25 = scalar_lea.vmem %s9143_s11, 32  ;;  %s6487_s16 = smov [#allocation4]  }
 0x273   : > { %p6417_p1 = scmp.ne.s32.totalorder %s9143_s11, %s6416_s25  ;;  %s6420_s26 = sshll.u32 %s6487_s16, 4  ;;  %s6421_s26 = int_to_ptr.vmem [resolvable:$false] %s6420_s26 }
 0x274   : > { %v4675_v29 = vrot.slane %v4674_v32, 2  ;;  %s6422_s27 = scalar_lea.vmem %s6421_s26, 64  ;;  %p6423_p4 = scmp.lt.s32.totalorder %s9143_s11, %s6421_s26 }
 0x275   : > { %p6418_p2 = pnand %p6417_p1, %p6546_p5  ;;  %p6424_p7 = scmp.lt.s32.totalorder %s6422_s27, %s6416_s25 }
 0x276   : > { %v4676_v12 = vadd.f32 %v4675_v29, %v4674_v32  ;;  %v9561_v32 = vld [vmem:[#allocation36_spill] sm:$0xff] }
 0x277   : > { %p6419_p3 = pneg %p6418_p2  ;;  %p6425_p8 = por %p6424_p7, %p6423_p4 }
 0x278   : > { %v4677_v1 = vrot.slane %v4676_v12, 1 }
 0x279   : > { %p6426_p9 = pnand %p6425_p8, %p6419_p3 }
 0x27a   : > { %v4678_v52 = vadd.f32 %v4677_v1, %v4676_v12 }
 0x27c   : > { %v8926_v63 = vmul.f32 0.00390625, %v4678_v52 }
 0x27e   : > { %v4681_v40 = vsub.f32 %v9553_v61, %v8926_v63  ;;  %v4682_v24 = vsub.f32 %v9554_v18, %v8926_v63  ;;  %v4701_v54 = vsub.f32 %v8596_v15, %v8926_v63  ;;  %v4702_v48 = vsub.f32 %v8611_v51, %v8926_v63  ;;  %v9566_v18 = vld [vmem:[#allocation12_spill] sm:$0xff] }
 0x27f   : > { %v4703_v20 = vsub.f32 %v8577_v11, %v8926_v63  ;;  %v4704_v60 = vsub.f32 %v8601_v13, %v8926_v63  ;;  %v4705_v9 = vsub.f32 %v8676_v23, %v8926_v63  ;;  %v4706_v5 = vsub.f32 %v8699_v45, %v8926_v63 }
 0x280   : > { %v4707_v37 = vsub.f32 %v8668_v3, %v8926_v63  ;;  %v4708_v15 = vsub.f32 %v8688_v62, %v8926_v63  ;;  %v4709_v51 = vsub.f32 %v8771_v59, %v8926_v63  ;;  %v4710_v11 = vsub.f32 %v8795_v10, %v8926_v63 }
 0x281   : > { %v4711_v13 = vsub.f32 %v8763_v42, %v8926_v63  ;;  %v4712_v23 = vsub.f32 %v8784_v34, %v8926_v63  ;;  %v4713_v45 = vsub.f32 %v8853_v44, %v8926_v63  ;;  %v4714_v3 = vsub.f32 %v8870_v43, %v8926_v63  ;;  %v9559_v43 = vld [vmem:[#allocation35_spill] sm:$0xff] }
 0x282   : > { %v4715_v62 = vsub.f32 %v8835_v19, %v8926_v63  ;;  %v4716_v59 = vsub.f32 %v8858_v46, %v8926_v63  ;;  %v8966_v10 = vsel %vm8456_vm0, %v4701_v54, 0.0  ;;  %v8970_v42 = vsel %vm8476_vm8, %v4702_v48, 0.0  ;;  %v9567_v48 = vld [vmem:[#allocation38_spill] sm:$0xff] }
 0x283   : > { %v8974_v34 = vsel %vm8517_vm12, %v4703_v20, 0.0  ;;  %v8978_v44 = vsel %vm8554_vm4, %v4704_v60, 0.0  ;;  %v8982_v19 = vsel %vm8584_vm2, %v4705_v9, 0.0  ;;  %v8986_v28 = vsel %vm8627_vm7, %v4706_v5, 0.0  ;;  %v9569_v9 = vld [vmem:[#allocation40_spill] sm:$0xff] }
 0x284   : > { %vm9555_vm0 = vnez %v9509_v2  ;;  %vm9556_vm8 = vnez %v9515_v31  ;;  %vm9557_vm12 = vnez %v9531_v56  ;;  %v9002_v26 = vsel %vm8786_vm13, %v4710_v11, 0.0 }
 0x285   : > { %v8990_v25 = vsel %vm9555_vm0, %v4707_v37, 0.0  ;;  %v8994_v41 = vsel %vm9556_vm8, %v4708_v15, 0.0  ;;  %v8998_v57 = vsel %vm9557_vm12, %v4709_v51, 0.0  ;;  %v9006_v49 = vsel %vm8733_vm9, %v4711_v13, 0.0  ;;  %v9571_v51 = vld [vmem:[#allocation43_spill] sm:$0xff] }
 0x286   : > { %v9010_v2 = vsel %vm8817_vm6, %v4712_v23, 0.0  ;;  %v9014_v31 = vsel %vm8837_vm1, %v4713_v45, 0.0  ;;  %v9018_v56 = vsel %vm8860_vm3, %v4714_v3, 0.0  ;;  %v9022_v8 = vsel %vm8872_vm11, %v4715_v62, 0.0  ;;  %v9573_v3 = vld [vmem:[#allocation14_spill] sm:$0xff] }
 0x287   : > { %v9026_v33 = vsel %vm8891_vm14, %v4716_v59, 0.0  ;;  %v4683_v46 = vsub.f32 %v9558_v50, %v8926_v63  ;;  %vm9560_vm13 = vnez %v9559_v43  ;;  %vm9562_vm9 = vnez %v9561_v32 }
 0x288   : > { %v4717_v38 = vsel %vm9560_vm13, %v4681_v40, 0.0  ;;  %v4718_v29 = vsel %vm9562_vm9, %v4682_v24, 0.0  ;;  %v4684_v12 = vsub.f32 %v9563_v21, %v8926_v63  ;;  %v4685_v52 = vsub.f32 %v8113_v0, %v8926_v63 }
 0x289   : > { %v4753_v1 = vmul.f32 %v4717_v38, %v4717_v38  ;;  %v4754_v6 = vmul.f32 %v4718_v29, %v4718_v29  ;;  %vm9565_vm4 = vnez %v9564_v55  ;;  %v4686_v54 = vsub.f32 %v9566_v18, %v8926_v63  ;;  %v9577_v29 = vld [vmem:[#allocation20_spill] sm:$0xff] }
 0x28a   : > { %v4719_v61 = vsel %vm9565_vm4, %v4683_v46, 0.0  ;;  %vm9568_vm2 = vnez %v9567_v48  ;;  %v4687_v24 = vsub.f32 %v8087_v27, %v8926_v63  ;;  %vm9570_vm6 = vnez %v9569_v9  ;;  %v9575_v46 = vld [vmem:[#allocation8_spill] sm:$0xff] }
 0x28b   : > { %v4720_v40 = vsel %vm9568_vm2, %v4684_v12, 0.0  ;;  %v4755_v20 = vmul.f32 %v4719_v61, %v4719_v61  ;;  %v4789_v60 = vadd.f32 %v4754_v6, %v4753_v1  ;;  %v4721_v5 = vsel %vm9570_vm6, %v4685_v52, 0.0  ;;  %v9579_v1 = vld [vmem:[#allocation13_spill] sm:$0xff] }
 0x28c   : > { %v4756_v37 = vmul.f32 %v4720_v40, %v4720_v40  ;;  %v4688_v0 = vsub.f32 %v8120_v36, %v8926_v63  ;;  %vm9572_vm7 = vnez %v9571_v51  ;;  %v4757_v13 = vmul.f32 %v4721_v5, %v4721_v5  ;;  %v9580_v52 = vld [vmem:[#allocation17_spill] sm:$0xff] }
 0x28d   : > { %v4790_v15 = vadd.f32 %v4789_v60, %v4755_v20  ;;  %v4722_v11 = vsel %vm9572_vm7, %v4686_v54, 0.0  ;;  %v4689_v45 = vsub.f32 %v8242_v35, %v8926_v63  ;;  %vm9574_vm10 = vnez %v9573_v3  ;;  %v9582_v54 = vld [vmem:[#allocation9_spill] sm:$0xff]  ;;  %v9584_v60 = vld [vmem:[#allocation10_spill] sm:$0xff] }
 0x28e   : > { %v4723_v62 = vsel %vm9574_vm10, %v4687_v24, 0.0  ;;  %v4758_v27 = vmul.f32 %v4722_v11, %v4722_v11  ;;  %v4690_v50 = vsub.f32 %v8266_v47, %v8926_v63  ;;  %vm9576_vm5 = vnez %v9575_v46 }
 0x28f   : > { %v4791_v23 = vadd.f32 %v4790_v15, %v4756_v37  ;;  %v4724_v43 = vsel %vm9576_vm5, %v4688_v0, 0.0  ;;  %v4759_v36 = vmul.f32 %v4723_v62, %v4723_v62  ;;  %v4691_v32 = vsub.f32 %v8221_v7, %v8926_v63  ;;  %v9586_v37 = vld [vmem:[#allocation28_spill] sm:$0xff]  ;;  %v9587_v0 = vld [vmem:[#allocation11_spill] sm:$0xff] }
 0x290   : > { %vm9578_vm1 = vnez %v9577_v29  ;;  %v4760_v35 = vmul.f32 %v4724_v43, %v4724_v43  ;;  %v4692_v6 = vsub.f32 %v9579_v1, %v8926_v63  ;;  %vm9581_vm15 = vnez %v9580_v52 }
 0x291   : > { %v4792_v59 = vadd.f32 %v4791_v23, %v4757_v13  ;;  %v4725_v21 = vsel %vm9578_vm1, %v4689_v45, 0.0  ;;  %v4726_v55 = vsel %vm9581_vm15, %v4690_v50, 0.0  ;;  %v4693_v18 = vsub.f32 %v8341_v58, %v8926_v63  ;;  %v9589_v13 = vld [vmem:[#allocation34_spill] sm:$0xff] }
 0x292   : > { %v4761_v47 = vmul.f32 %v4725_v21, %v4725_v21  ;;  %vm9583_vm3 = vnez %v9582_v54  ;;  %v4762_v7 = vmul.f32 %v4726_v55, %v4726_v55  ;;  %v4694_v20 = vsub.f32 %v8384_v16, %v8926_v63  ;;  %v9590_v45 = vld [vmem:[#allocation26_spill] sm:$0xff] }
 0x293   : > { %v4793_v38 = vadd.f32 %v4792_v59, %v4758_v27  ;;  %v4727_v48 = vsel %vm9583_vm3, %v4691_v32, 0.0  ;;  %vm9585_vm11 = vnez %v9584_v60  ;;  %v4695_v15 = vsub.f32 %v9586_v37, %v8926_v63  ;;  %v9592_v59 = vld [vmem:[#allocation33_spill] sm:$0xff] }
 0x294   : > { %v4728_v24 = vsel %vm9585_vm11, %v4692_v6, 0.0  ;;  %v4763_v9 = vmul.f32 %v4727_v48, %v4727_v48  ;;  %vm9588_vm14 = vnez %v9587_v0  ;;  %v4696_v23 = vsub.f32 %v9589_v13, %v8926_v63 }
 0x295   : > { %v4794_v12 = vadd.f32 %v4793_v38, %v4759_v36  ;;  %v4729_v51 = vsel %vm9588_vm14, %v4693_v18, 0.0  ;;  %v4764_v58 = vmul.f32 %v4728_v24, %v4728_v24  ;;  %vm9591_vm0 = vnez %v9590_v45  ;;  %v9594_v38 = vld [vmem:[#allocation27_spill] sm:$0xff] }
 0x296   : > { %v4730_v3 = vsel %vm9591_vm0, %v4694_v20, 0.0  ;;  %v4765_v16 = vmul.f32 %v4729_v51, %v4729_v51  ;;  %v4697_v27 = vsub.f32 %v8467_v14, %v8926_v63  ;;  %vm9593_vm8 = vnez %v9592_v59 }
 0x297   : > { %v4795_v61 = vadd.f32 %v4794_v12, %v4760_v35  ;;  %v4731_v50 = vsel %vm9593_vm8, %v4695_v15, 0.0  ;;  %v4766_v46 = vmul.f32 %v4730_v3, %v4730_v3  ;;  %v4698_v36 = vsub.f32 %v8496_v53, %v8926_v63  ;;  %v9596_v12 = vld [vmem:[#allocation21_spill] sm:$0xff] }
 0x298   : > { %vm9595_vm12 = vnez %v9594_v38  ;;  %v4767_v29 = vmul.f32 %v4731_v50, %v4731_v50  ;;  %v4699_v35 = vsub.f32 %v8449_v30, %v8926_v63  ;;  %vm9597_vm13 = vnez %v9596_v12 }
 0x299   : > { %v4796_v40 = vadd.f32 %v4795_v61, %v4761_v47  ;;  %v4732_v32 = vsel %vm9595_vm12, %v4696_v23, 0.0  ;;  %v4733_v1 = vsel %vm9597_vm13, %v4697_v27, 0.0  ;;  %v4700_v52 = vsub.f32 %v8472_v17, %v8926_v63 }
 0x29a   : > { %v4768_v14 = vmul.f32 %v4732_v32, %v4732_v32  ;;  %vm9598_vm9 = vnez %v9464_v22  ;;  %v4769_v53 = vmul.f32 %v4733_v1, %v4733_v1  ;;  %vm9599_vm4 = vnez %v9472_v39 }
 0x29b   : > { %v4797_v5 = vadd.f32 %v4796_v40, %v4762_v7  ;;  %v4734_v55 = vsel %vm9598_vm9, %v4698_v36, 0.0  ;;  %v4735_v61 = vsel %vm9599_vm4, %v4699_v35, 0.0  ;;  %vm9600_vm2 = vnez %v9476_v4 }
 0x29c   : > { %v4770_v18 = vmul.f32 %v4734_v55, %v4734_v55  ;;  %v4736_v30 = vsel %vm9600_vm2, %v4700_v52, 0.0  ;;  %v4771_v48 = vmul.f32 %v4735_v61, %v4735_v61  ;;  %v4773_v17 = vmul.f32 %v8966_v10, %v8966_v10 }
 0x29d   : > { %v4798_v11 = vadd.f32 %v4797_v5, %v4763_v9  ;;  %v4772_v40 = vmul.f32 %v4736_v30, %v4736_v30  ;;  %v4774_v22 = vmul.f32 %v8970_v42, %v8970_v42  ;;  %v4775_v39 = vmul.f32 %v8974_v34, %v8974_v34 }
 0x29e   : > { %v4776_v4 = vmul.f32 %v8978_v44, %v8978_v44  ;;  %v4777_v37 = vmul.f32 %v8982_v19, %v8982_v19  ;;  %v4778_v10 = vmul.f32 %v8986_v28, %v8986_v28  ;;  %v4779_v42 = vmul.f32 %v8990_v25, %v8990_v25 }
 0x29f   : > { %v4799_v62 = vadd.f32 %v4798_v11, %v4764_v58  ;;  %v4780_v34 = vmul.f32 %v8994_v41, %v8994_v41  ;;  %v4781_v44 = vmul.f32 %v8998_v57, %v8998_v57  ;;  %v4782_v19 = vmul.f32 %v9002_v26, %v9002_v26 }
 0x2a0   : > { %v4783_v28 = vmul.f32 %v9006_v49, %v9006_v49  ;;  %v4784_v25 = vmul.f32 %v9010_v2, %v9010_v2  ;;  %v4785_v41 = vmul.f32 %v9014_v31, %v9014_v31  ;;  %v4786_v57 = vmul.f32 %v9018_v56, %v9018_v56 }
 0x2a1   : > { %v4800_v43 = vadd.f32 %v4799_v62, %v4765_v16  ;;  %v4787_v26 = vmul.f32 %v9022_v8, %v9022_v8  ;;  %v4788_v49 = vmul.f32 %v9026_v33, %v9026_v33  ;;  %vm4830_vm6 = vcmask 1040384  }
 0x2a3   : > { %v4801_v21 = vadd.f32 %v4800_v43, %v4766_v46 }
 0x2a5   : > { %v4802_v6 = vadd.f32 %v4801_v21, %v4767_v29 }
 0x2a7   : > { %v4803_v47 = vadd.f32 %v4802_v6, %v4768_v14 }
 0x2a9   : > { %v4804_v54 = vadd.f32 %v4803_v47, %v4769_v53 }
 0x2ab   : > { %v4805_v7 = vadd.f32 %v4804_v54, %v4770_v18 }
 0x2ad   : > { %v4806_v20 = vadd.f32 %v4805_v7, %v4771_v48 }
 0x2af   : > { %v4807_v60 = vadd.f32 %v4806_v20, %v4772_v40 }
 0x2b1   : > { %v4808_v24 = vadd.f32 %v4807_v60, %v4773_v17 }
 0x2b3   : > { %v4809_v9 = vadd.f32 %v4808_v24, %v4774_v22 }
 0x2b5   : > { %v4810_v5 = vadd.f32 %v4809_v9, %v4775_v39 }
 0x2b7   : > { %v4811_v15 = vadd.f32 %v4810_v5, %v4776_v4 }
 0x2b9   : > { %v4812_v0 = vadd.f32 %v4811_v15, %v4777_v37 }
 0x2bb   : > { %v4813_v51 = vadd.f32 %v4812_v0, %v4778_v10 }
 0x2bd   : > { %v4814_v58 = vadd.f32 %v4813_v51, %v4779_v42 }
 0x2bf   : > { %v4815_v11 = vadd.f32 %v4814_v58, %v4780_v34 }
 0x2c1   : > { %v4816_v13 = vadd.f32 %v4815_v11, %v4781_v44 }
 0x2c3   : > { %v4817_v23 = vadd.f32 %v4816_v13, %v4782_v19 }
 0x2c5   : > { %v4818_v45 = vadd.f32 %v4817_v23, %v4783_v28 }
 0x2c7   : > { %v4819_v3 = vadd.f32 %v4818_v45, %v4784_v25 }
 0x2c9   : > { %v4820_v16 = vadd.f32 %v4819_v3, %v4785_v41 }
 0x2cb   : > { %v4821_v62 = vadd.f32 %v4820_v16, %v4786_v57 }
 0x2cd   : > { %v4822_v27 = vadd.f32 %v4821_v62, %v4787_v26 }
 0x2cf   : > { %v4823_v59 = vadd.f32 %v4822_v27, %v4788_v49 }
 0x2d1   : > { %v4824_v2 = vrot.slane %v4823_v59, 4 }
 0x2d3   : > { %v4825_v50 = vadd.f32 %v4824_v2, %v4823_v59 }
 0x2d5   : > { %v4826_v31 = vrot.slane %v4825_v50, 2 }
 0x2d7   : > { %v4827_v46 = vadd.f32 %v4826_v31, %v4825_v50 }
 0x2d9   : > { %v4828_v43 = vrot.slane %v4827_v46, 1 }
 0x2db   : > { %v4829_v56 = vadd.f32 %v4828_v43, %v4827_v46 }
 0x2dd   : > { %v4831_v8 = vsel %vm4830_vm6, %v8926_v63, %v4829_v56 }
 0x2de   : > { %4832 = vst [vmem:[%s174_s10] sm:$0x3] %v4831_v8 }
 0x2df   : > { %6429 = shalt.err (!%p6426_p9)
}
 0x2e0   : > { %s6430_s4 = scalar_lea.hbm %s9141_s20, 32  ;;  %s6434_s30 = scalar_lea.hbm %s9188_s3, 64 }
 0x2e1   : > { %p6431_p10 = scmp.ne.s32.totalorder %s9141_s20, %s6430_s4  ;;  %p6435_p13 = scmp.lt.u32.totalorder %s9141_s20, %s9188_s3 }
 0x2e2   : > { %p6436_p0 = scmp.lt.u32.totalorder %s6434_s30, %s6430_s4  ;;  %p6438_p2 = scmp.lt.u32.totalorder %s6430_s4, %s9141_s20 }
 0x2e3   : > { %p6432_p11 = pnand %p6431_p10, %p6546_p5 }
 0x2e4   : > { %p6437_p1 = por %p6436_p0, %p6435_p13 }
 0x2e5   : > { %p6433_p12 = pneg %p6432_p11 }
 0x2e6   : > { %p6439_p3 = por %p6438_p2, %p6437_p1 }
 0x2e8   : > { %p6440_p4 = pnand %p6439_p3, %p6433_p12 }
 0x2ea   : > { %6443 = shalt.err (!%p6440_p4)
}
 0x2eb   : > { %6270 = dma.vmem_to_hbm [thread:$0]  (%p6546_p5), %s9143_s11, 32, %s9141_s20, %s4839_s24  }
 0x2ec PF: > { %p6280_p7 = scmp.ge.s32.totalorder %s6482_s15, 2  ;;  %s4880_s7 = sand.u32 1, %s6470_s12  }
 0x2ed   : > { %s4881_s8 = scalar_lea.sflag [#allocation3], %s4880_s7 }
 0x2ee   : > { %p6274_p8 = pnand %p6280_p7, %p6550_p6 }
 0x2f0   : > { %6461 = dma.done.wait (!%p6274_p8), %s4881_s8, 2304  }
 0x2f1   : > { %6463 = vsyncadd (!%p6274_p8), %s4881_s8, 4294964992  ;;  %s4890_s9 = scalar_lea.sflag [#allocation5], %s4880_s7 }
 0x2f2   : > { %6465 = dma.done.wait (!%p6274_p8), %s4890_s9, 32  }
 0x2f3   : > { %6467 = vsyncadd (!%p6274_p8), %s4890_s9, 4294967264  ;;  %p17_p5 = scmp.ge.s32.totalorder %s6533_s18, 4   ;;  %s9601_s12 = smov %s6474_s13 }
 0x2f4   : > { %s9602_s13 = smov %s6478_s14  ;;  %s9603_s14 = smov %s6544_s21 }
 0x2f5   : > { %s9604_s15 = smov %s6533_s18  ;;  %19 = sbr.rel (!%p17_p5) target bundleno = 5 (0x5), region = 88 }
 0x2fc   :  { %4895 = vsyncpa [#allocation3], 1 }
 0x2fd   :  { %4897 = vsyncpa [#allocation3 + $0x1], 1 }
 0x2fe   :  { %4898 = vsyncpa [#allocation5], 1 }
 0x2ff   :  { %4900 = vsyncpa [#allocation5 + $0x1], 1 }

</bundles_post_ra>
